<compile_context>
chip_gen: v5e
topology: v5e:2x2
jax: 0.10.0
libtpu: 0.0.40
codegen_flags: <defaults>
</compile_context>

<pallas_src>
import functools

import jax
import jax.numpy as jnp
from jax import lax
from jax.experimental import pallas as pl
from jax.experimental.pallas import tpu as pltpu


# ----------------------------- Pallas kernel --------------------------------

def _mm(a, b):
    # a @ b
    return lax.dot_general(a, b, (((1,), (0,)), ((), ())),
                           preferred_element_type=jnp.float32)


def _mm_tA(a, b):
    # a.T @ b  (contract leading dims)
    return lax.dot_general(a, b, (((0,), (0,)), ((), ())),
                           preferred_element_type=jnp.float32)


def snmf_kernel(x_ref, e_ref, m_ref, bases0_ref, out_ref, gt_ref, *,
                steps, inv_t, eps):
    E = e_ref[...]            # (D, P2p)
    M = m_ref[...]            # (P2p, P2p) = E^T E (host precomputed, shared)
    bases = bases0_ref[...]   # (BB, P2p, R)
    BB, P2p, R = bases.shape

    # --- hoisted loop invariant: GT[b] = E^T @ x[b]  -> (P2p, N) -------------
    for b in range(BB):
        gt_ref[b] = _mm_tA(E, x_ref[b])
    GT = gt_ref[...]          # (BB, P2p, N)

    # hoisted broadcast (reused every step; JAX does not CSE broadcasts)
    Mb = jnp.broadcast_to(M, (BB,) + M.shape)

    def num_coefT(bases_):
        # (x^T E bases)^T = bases^T GT  -> (BB, R, N), lane-dense
        return jnp.einsum('bpr,bpn->brn', bases_, GT,
                          preferred_element_type=jnp.float32)

    def coef_update(bases_, coefT_):
        # bases^T M  -> (BB, R, P2p)
        BMt = jnp.einsum('bqr,bqp->brp', bases_, Mb,
                         preferred_element_type=jnp.float32)
        # bases^T M bases  (== bp^T bp)  -> (BB, R, R)
        BtMB = jnp.einsum('brp,bps->brs', BMt, bases_,
                          preferred_element_type=jnp.float32)
        numT = num_coefT(bases_)                       # (BB, R, N)
        # denT = BtMB @ coefT : unrolled R-term FMA on the VPU (lane-dense),
        # avoids an MXU push/pop round trip on the serial chain.
        denT = BtMB[:, :, 0:1] * coefT_[:, 0:1, :]
        for si in range(1, R):
            denT = denT + BtMB[:, :, si:si + 1] * coefT_[:, si:si + 1, :]
        coefT_new = coefT_ * numT * pl.reciprocal(denT + eps, approx=True)
        return coefT_new, BMt

    # --- local_inference: initial coefficients via softmax over R ------------
    # coef is stored transposed, shape (BB, R, N) -> last dim lane-dense.
    s = inv_t * num_coefT(bases)
    mmax = jnp.max(s, axis=1, keepdims=True)
    ex = jnp.exp(s - mmax)
    coefT = ex * pl.reciprocal(jnp.sum(ex, axis=1, keepdims=True), approx=True)

    # --- iterative multiplicative updates (local_step x steps) ---------------
    for _ in range(steps):
        coefT, BMt = coef_update(bases, coefT)
        numB = jnp.einsum('bpn,brn->bpr', GT, coefT,
                          preferred_element_type=jnp.float32)   # E^T x coef
        CtC = jnp.einsum('brn,bsn->brs', coefT, coefT,
                         preferred_element_type=jnp.float32)    # coef^T coef
        denB = jnp.einsum('brp,brs->bps', BMt, CtC,
                          preferred_element_type=jnp.float32)   # M bases CtC
        bases = bases * numB * pl.reciprocal(denB + eps, approx=True)

    # --- compute_coef ---------------------------------------------------------
    coefT, _ = coef_update(bases, coefT)

    # --- reconstruction: out[b] = E @ (bases[b] @ coefT[b]) -------------------
    # (lane-dense (D, N) output; no duplicate E@bases matmul)
    for b in range(BB):
        bc = _mm(bases[b], coefT[b])       # (P2p, N)
        out_ref[b] = _mm(E, bc)            # (D, N)


# ------------------------------ JAX glue -------------------------------------

def build_rbf_estimators(D):
    """RBF smoothing matrix E of shape (D, P2), matching the torch code."""
    P = D
    tt = jnp.arange(D, dtype=jnp.float32)[:, None]
    nnv = jnp.arange(P, dtype=jnp.float32)[None, :]
    dd = (tt - nnv) ** 2

    def rbf(sig):
        return jnp.exp(-0.5 * dd / (2.0 * sig * sig))

    c1 = jnp.arange(0, P, 1)
    c2 = jnp.arange(0, P, 2)
    c3 = jnp.arange(0, P, 3)
    E = jnp.concatenate(
        [rbf(6.0)[:, c1], rbf(8.0)[:, c1],
         rbf(12.0)[:, c2], rbf(15.0)[:, c2],
         rbf(18.0)[:, c3], rbf(24.0)[:, c3],
         jnp.ones((P, 1), jnp.float32)],
        axis=1)
    return E.astype(jnp.float32)


def build_bases(key, BS, P2, R):
    """_build_bases: uniform [0,1) then L2-normalize along the P2 axis."""
    b = jax.random.uniform(key, (BS, P2, R), dtype=jnp.float32)
    nrm = jnp.sqrt(jnp.sum(b * b, axis=1, keepdims=True))
    return b / jnp.maximum(nrm, 1e-12)


def smooth_md_forward(x, md_config, bases_key, *, batch_block=16):
    """Forward pass of _SmoothMatrixDecompositionBase (dim='3D', rbf type)."""
    S = md_config['MD_S']
    R = md_config['MD_R']
    steps = md_config['MD_STEPS']
    inv_t = float(md_config['INV_T'])
    eps = 1e-6  # float32 path of get_epsilon()

    B, C, T, H, W = x.shape
    D = T // S
    N = C * H * W
    BS = B * S
    xr = jnp.reshape(x, (BS, D, N)).astype(jnp.float32)

    E = build_rbf_estimators(D)                    # (D, P2)
    P2 = E.shape[1]
    bases0 = build_bases(bases_key, BS, P2, R)     # rand_init=True path

    # Pad P2 to a multiple of 8.  Zero columns of E / zero rows of bases stay
    # exactly 0 under the multiplicative updates (num=0, den=eps), so results
    # match the unpadded math up to rounding.
    P2p = -(-P2 // 8) * 8
    Ep = jnp.pad(E, ((0, 0), (0, P2p - P2)))
    bases0p = jnp.pad(bases0, ((0, 0), (0, P2p - P2), (0, 0)))
    M = (Ep.T @ Ep).astype(jnp.float32)            # (P2p, P2p), batch-independent

    # Batch-block the grid: BB slices per grid step.
    BB = min(BS, batch_block)
    BSp = -(-BS // BB) * BB
    if BSp != BS:
        xr_in = jnp.pad(xr, ((0, BSp - BS), (0, 0), (0, 0)))
        bases_in = jnp.pad(bases0p, ((0, BSp - BS), (0, 0), (0, 0)))
    else:
        xr_in, bases_in = xr, bases0p

    kern = functools.partial(snmf_kernel, steps=steps, inv_t=inv_t, eps=eps)
    out = pl.pallas_call(
        kern,
        out_shape=jax.ShapeDtypeStruct((BSp, D, N), jnp.float32),
        grid=(BSp // BB,),
        in_specs=[
            pl.BlockSpec((BB, D, N), lambda g: (g, 0, 0)),
            pl.BlockSpec((D, P2p), lambda g: (0, 0)),
            pl.BlockSpec((P2p, P2p), lambda g: (0, 0)),
            pl.BlockSpec((BB, P2p, R), lambda g: (g, 0, 0)),
        ],
        out_specs=pl.BlockSpec((BB, D, N), lambda g: (g, 0, 0)),
        scratch_shapes=[pltpu.VMEM((BB, P2p, N), jnp.float32)],
        # TODO(synk): on v7x, pltpu.CORE_PARALLEL (or pl.core_map over the
        # 2-core TC mesh) would shard the batch loop across cores.
        compiler_params=pltpu.CompilerParams(
            dimension_semantics=("parallel",)),
    )(xr_in, Ep, M, bases_in)

    out = out[:BS]

    # TODO(synk): online_update / non-rand-init buffered-bases path (and the
    # 'label'-type estimator) are training-state side effects of the module,
    # not part of this forward kernel (rand_init=True, rbf type here).
    return jnp.reshape(out, (B, C, T, H, W)), (xr, E, bases0, steps, inv_t, eps)


# ------------------------ pure-JAX reference (for checking) ------------------

def ref_forward(xr, E, bases0, steps, inv_t, eps):
    BS = xr.shape[0]
    Eb = jnp.broadcast_to(E, (BS,) + E.shape)
    xT = jnp.swapaxes(xr, 1, 2)
    bases = bases0

    bp = Eb @ bases
    coef = jax.nn.softmax(inv_t * (xT @ bp), axis=-1)
    for _ in range(steps):
        bp = Eb @ bases
        num = xT @ bp
        den = coef @ (jnp.swapaxes(bp, 1, 2) @ bp)
        coef = coef * num / (den + eps)
        num = jnp.swapaxes(Eb, 1, 2) @ (xr @ coef)
        den = jnp.swapaxes(Eb, 1, 2) @ (bp @ (jnp.swapaxes(coef, 1, 2) @ coef))
        bases = bases * num / (den + eps)
    bp = Eb @ bases
    num = xT @ bp
    den = coef @ (jnp.swapaxes(bp, 1, 2) @ bp)
    coef = coef * num / (den + eps)
    bp = Eb @ bases
    return bp @ jnp.swapaxes(coef, 1, 2)


# --------------------------------- main ---------------------------------------

if __name__ == "__main__":
    md_config = {
        'MD_TYPE': 'SNMF_RBF',
        'MD_S': 1,
        'MD_R': 4,
        'MD_STEPS': 4,
        'INV_T': 1.0,
        'ETA': 0.9,
        'RAND_INIT': True,
    }

    B, C, T, H, W = 2, 4, 16, 8, 8
    key = jax.random.PRNGKey(0)
    kx, kb = jax.random.split(key)
    # non-negative input, as NMF assumes
    x = jax.random.uniform(kx, (B, C, T, H, W), dtype=jnp.float32)

    out, (xr, E, bases0, steps, inv_t, eps) = smooth_md_forward(x, md_config, kb)
    out = jax.block_until_ready(out)

    ref = ref_forward(xr, E, bases0, steps, inv_t, eps)
    ref = jnp.reshape(ref, (B, C, T, H, W))
    ref = jax.block_until_ready(ref)

    assert out.shape == (B, C, T, H, W)
    assert bool(jnp.all(jnp.isfinite(out)))
    # tolerance accounts for the approximate (EUP) reciprocals in the kernel
    assert bool(jnp.allclose(out, ref, rtol=1e-2, atol=1e-2)), (
        float(jnp.max(jnp.abs(out - ref))))
    print("KERNEL_OK")
</pallas_src>

<mosaic_0001>
module attributes {stable_mosaic.version = 11 : i64} {
  func.func @snmf_kernel(%arg0: i32, %arg1: memref<2x16x256xf32, #tpu.memory_space<vmem>>, %arg2: memref<16x64xf32, #tpu.memory_space<vmem>>, %arg3: memref<64x64xf32, #tpu.memory_space<vmem>>, %arg4: memref<2x64x4xf32, #tpu.memory_space<vmem>>, %arg5: memref<2x16x256xf32, #tpu.memory_space<vmem>>, %arg6: memref<2x64x256xf32, #tpu.memory_space<vmem>>) attributes {dimension_semantics = [#tpu.dimension_semantics<parallel>], iteration_bounds = array<i64: 1>, scalar_prefetch = 0 : i64, scratch_operands = 1 : i64, tpu.core_type = #tpu.core_type<tc>, window_params = [{transform_indices = @transform_0, window_bounds = array<i64: 2, 16, 256>}, {pipeline_mode = #tpu.pipeline_mode<synchronous>, transform_indices = @transform_1, window_bounds = array<i64: 16, 64>}, {pipeline_mode = #tpu.pipeline_mode<synchronous>, transform_indices = @transform_2, window_bounds = array<i64: 64, 64>}, {transform_indices = @transform_3, window_bounds = array<i64: 2, 64, 4>}, {transform_indices = @transform_4, window_bounds = array<i64: 2, 16, 256>}]} {
    %c0 = arith.constant 0 : index
    %c0_0 = arith.constant 0 : index
    %0 = vector.load %arg2[%c0, %c0_0] : memref<16x64xf32, #tpu.memory_space<vmem>>, vector<16x64xf32>
    %c0_1 = arith.constant 0 : index
    %c0_2 = arith.constant 0 : index
    %1 = vector.load %arg3[%c0_1, %c0_2] : memref<64x64xf32, #tpu.memory_space<vmem>>, vector<64x64xf32>
    %c0_3 = arith.constant 0 : index
    %c0_4 = arith.constant 0 : index
    %c0_5 = arith.constant 0 : index
    %2 = vector.load %arg4[%c0_3, %c0_4, %c0_5] : memref<2x64x4xf32, #tpu.memory_space<vmem>>, vector<2x64x4xf32>
    %c0_6 = arith.constant 0 : index
    %c0_7 = arith.constant 0 : index
    %c0_8 = arith.constant 0 : index
    %3 = vector.load %arg1[%c0_6, %c0_7, %c0_8] : memref<2x16x256xf32, #tpu.memory_space<vmem>>, vector<1x16x256xf32>
    %4 = vector.shape_cast %3 : vector<1x16x256xf32> to vector<16x256xf32>
    %cst = arith.constant dense<0.000000e+00> : vector<64x256xf32>
    %5 = tpu.matmul %0, %4, %cst {dimension_numbers = #tpu.dot_dimension_numbers<[0], [0], [1], [1], [0, 1, 1, 1], [], []>} : vector<16x64xf32>, vector<16x256xf32>, vector<64x256xf32> -> vector<64x256xf32>
    %c0_9 = arith.constant 0 : index
    %c0_10 = arith.constant 0 : index
    %c0_11 = arith.constant 0 : index
    %6 = vector.load %arg6[%c0_9, %c0_10, %c0_11] : memref<2x64x256xf32, #tpu.memory_space<vmem>>, vector<1x64x256xf32>
    %7 = vector.shape_cast %6 : vector<1x64x256xf32> to vector<64x256xf32>
    %8 = vector.shape_cast %5 : vector<64x256xf32> to vector<1x64x256xf32>
    tpu.vector_store %arg6[%c0_9, %c0_10, %c0_11], %8 {strides = array<i32>} : memref<2x64x256xf32, #tpu.memory_space<vmem>>, vector<1x64x256xf32>,
    %c1 = arith.constant 1 : index
    %c0_12 = arith.constant 0 : index
    %c0_13 = arith.constant 0 : index
    %9 = vector.load %arg1[%c1, %c0_12, %c0_13] : memref<2x16x256xf32, #tpu.memory_space<vmem>>, vector<1x16x256xf32>
    %10 = vector.shape_cast %9 : vector<1x16x256xf32> to vector<16x256xf32>
    %cst_14 = arith.constant dense<0.000000e+00> : vector<64x256xf32>
    %11 = tpu.matmul %0, %10, %cst_14 {dimension_numbers = #tpu.dot_dimension_numbers<[0], [0], [1], [1], [0, 1, 1, 1], [], []>} : vector<16x64xf32>, vector<16x256xf32>, vector<64x256xf32> -> vector<64x256xf32>
    %c1_15 = arith.constant 1 : index
    %c0_16 = arith.constant 0 : index
    %c0_17 = arith.constant 0 : index
    %12 = vector.load %arg6[%c1_15, %c0_16, %c0_17] : memref<2x64x256xf32, #tpu.memory_space<vmem>>, vector<1x64x256xf32>
    %13 = vector.shape_cast %12 : vector<1x64x256xf32> to vector<64x256xf32>
    %14 = vector.shape_cast %11 : vector<64x256xf32> to vector<1x64x256xf32>
    tpu.vector_store %arg6[%c1_15, %c0_16, %c0_17], %14 {strides = array<i32>} : memref<2x64x256xf32, #tpu.memory_space<vmem>>, vector<1x64x256xf32>,
    %c0_18 = arith.constant 0 : index
    %c0_19 = arith.constant 0 : index
    %c0_20 = arith.constant 0 : index
    %15 = vector.load %arg6[%c0_18, %c0_19, %c0_20] : memref<2x64x256xf32, #tpu.memory_space<vmem>>, vector<2x64x256xf32>
    %16 = vector.shape_cast %1 : vector<64x64xf32> to vector<1x64x64xf32>
    %17 = vector.broadcast %16 : vector<1x64x64xf32> to vector<2x64x64xf32>
    "tpu.trace_start"() <{level = 10 : i32, message = "bpr,bpn->brn"}> : () -> ()
    %cst_21 = arith.constant dense<0.000000e+00> : vector<2x4x256xf32>
    %18 = tpu.matmul %2, %15, %cst_21 {dimension_numbers = #tpu.dot_dimension_numbers<[1], [1], [2], [2], [0, 0, 0, 2, 1, 2], [0], [0]>} : vector<2x64x4xf32>, vector<2x64x256xf32>, vector<2x4x256xf32> -> vector<2x4x256xf32>
    "tpu.trace_stop"() : () -> ()
    %cst_22 = arith.constant 1.000000e+00 : f32
    %19 = vector.broadcast %cst_22 : f32 to vector<2x4x256xf32>
    %20 = arith.mulf %19, %18 : vector<2x4x256xf32>
    %cst_23 = arith.constant dense<0xFF800000> : vector<2x256xf32>
    %21 = vector.multi_reduction <maximumf>, %20, %cst_23 [1] : vector<2x4x256xf32> to vector<2x256xf32>
    %22 = vector.shape_cast %21 : vector<2x256xf32> to vector<2x1x256xf32>
    %23 = vector.broadcast %22 : vector<2x1x256xf32> to vector<2x4x256xf32>
    %24 = arith.subf %20, %23 : vector<2x4x256xf32>
    %25 = math.exp %24 : vector<2x4x256xf32>
    %cst_24 = arith.constant dense<0.000000e+00> : vector<2x256xf32>
    %26 = vector.multi_reduction <add>, %25, %cst_24 [1] : vector<2x4x256xf32> to vector<2x256xf32>
    %27 = vector.shape_cast %26 : vector<2x256xf32> to vector<2x1x256xf32>
    %28 = tpu.reciprocal %27 {approx = true} : vector<2x1x256xf32> -> vector<2x1x256xf32>
    %29 = vector.broadcast %28 : vector<2x1x256xf32> to vector<2x4x256xf32>
    %30 = arith.mulf %25, %29 : vector<2x4x256xf32>
    "tpu.trace_start"() <{level = 10 : i32, message = "bqr,bqp->brp"}> : () -> ()
    %cst_25 = arith.constant dense<0.000000e+00> : vector<2x4x64xf32>
    %31 = tpu.matmul %2, %17, %cst_25 {dimension_numbers = #tpu.dot_dimension_numbers<[1], [1], [2], [2], [0, 0, 0, 2, 1, 2], [0], [0]>} : vector<2x64x4xf32>, vector<2x64x64xf32>, vector<2x4x64xf32> -> vector<2x4x64xf32>
    "tpu.trace_stop"() : () -> ()
    "tpu.trace_start"() <{level = 10 : i32, message = "brp,bps->brs"}> : () -> ()
    %cst_26 = arith.constant dense<0.000000e+00> : vector<2x4x4xf32>
    %32 = tpu.matmul %31, %2, %cst_26 {dimension_numbers = #tpu.dot_dimension_numbers<[2], [1], [1], [2], [0, 0, 0, 1, 1, 2], [0], [0]>} : vector<2x4x64xf32>, vector<2x64x4xf32>, vector<2x4x4xf32> -> vector<2x4x4xf32>
    "tpu.trace_stop"() : () -> ()
    "tpu.trace_start"() <{level = 10 : i32, message = "bpr,bpn->brn"}> : () -> ()
    %cst_27 = arith.constant dense<0.000000e+00> : vector<2x4x256xf32>
    %33 = tpu.matmul %2, %15, %cst_27 {dimension_numbers = #tpu.dot_dimension_numbers<[1], [1], [2], [2], [0, 0, 0, 2, 1, 2], [0], [0]>} : vector<2x64x4xf32>, vector<2x64x256xf32>, vector<2x4x256xf32> -> vector<2x4x256xf32>
    "tpu.trace_stop"() : () -> ()
    %34 = vector.extract_strided_slice %32 {offsets = [0, 0, 0], sizes = [2, 4, 1], strides = [1, 1, 1]} : vector<2x4x4xf32> to vector<2x4x1xf32>
    %35 = vector.extract_strided_slice %30 {offsets = [0, 0, 0], sizes = [2, 1, 256], strides = [1, 1, 1]} : vector<2x4x256xf32> to vector<2x1x256xf32>
    %36 = vector.broadcast %34 : vector<2x4x1xf32> to vector<2x4x256xf32>
    %37 = vector.broadcast %35 : vector<2x1x256xf32> to vector<2x4x256xf32>
    %38 = arith.mulf %36, %37 : vector<2x4x256xf32>
    %39 = vector.extract_strided_slice %32 {offsets = [0, 0, 1], sizes = [2, 4, 1], strides = [1, 1, 1]} : vector<2x4x4xf32> to vector<2x4x1xf32>
    %40 = vector.extract_strided_slice %30 {offsets = [0, 1, 0], sizes = [2, 1, 256], strides = [1, 1, 1]} : vector<2x4x256xf32> to vector<2x1x256xf32>
    %41 = vector.broadcast %39 : vector<2x4x1xf32> to vector<2x4x256xf32>
    %42 = vector.broadcast %40 : vector<2x1x256xf32> to vector<2x4x256xf32>
    %43 = arith.mulf %41, %42 : vector<2x4x256xf32>
    %44 = arith.addf %38, %43 : vector<2x4x256xf32>
    %45 = vector.extract_strided_slice %32 {offsets = [0, 0, 2], sizes = [2, 4, 1], strides = [1, 1, 1]} : vector<2x4x4xf32> to vector<2x4x1xf32>
    %46 = vector.extract_strided_slice %30 {offsets = [0, 2, 0], sizes = [2, 1, 256], strides = [1, 1, 1]} : vector<2x4x256xf32> to vector<2x1x256xf32>
    %47 = vector.broadcast %45 : vector<2x4x1xf32> to vector<2x4x256xf32>
    %48 = vector.broadcast %46 : vector<2x1x256xf32> to vector<2x4x256xf32>
    %49 = arith.mulf %47, %48 : vector<2x4x256xf32>
    %50 = arith.addf %44, %49 : vector<2x4x256xf32>
    %51 = vector.extract_strided_slice %32 {offsets = [0, 0, 3], sizes = [2, 4, 1], strides = [1, 1, 1]} : vector<2x4x4xf32> to vector<2x4x1xf32>
    %52 = vector.extract_strided_slice %30 {offsets = [0, 3, 0], sizes = [2, 1, 256], strides = [1, 1, 1]} : vector<2x4x256xf32> to vector<2x1x256xf32>
    %53 = vector.broadcast %51 : vector<2x4x1xf32> to vector<2x4x256xf32>
    %54 = vector.broadcast %52 : vector<2x1x256xf32> to vector<2x4x256xf32>
    %55 = arith.mulf %53, %54 : vector<2x4x256xf32>
    %56 = arith.addf %50, %55 : vector<2x4x256xf32>
    %57 = arith.mulf %30, %33 : vector<2x4x256xf32>
    %cst_28 = arith.constant 9.99999997E-7 : f32
    %58 = vector.broadcast %cst_28 : f32 to vector<2x4x256xf32>
    %59 = arith.addf %56, %58 : vector<2x4x256xf32>
    %60 = tpu.reciprocal %59 {approx = true} : vector<2x4x256xf32> -> vector<2x4x256xf32>
    %61 = arith.mulf %57, %60 : vector<2x4x256xf32>
    "tpu.trace_start"() <{level = 10 : i32, message = "bpn,brn->bpr"}> : () -> ()
    %cst_29 = arith.constant dense<0.000000e+00> : vector<2x64x4xf32>
    %62 = tpu.matmul %15, %61, %cst_29 {dimension_numbers = #tpu.dot_dimension_numbers<[2], [2], [1], [1], [0, 0, 0, 1, 1, 1], [0], [0]>} : vector<2x64x256xf32>, vector<2x4x256xf32>, vector<2x64x4xf32> -> vector<2x64x4xf32>
    "tpu.trace_stop"() : () -> ()
    "tpu.trace_start"() <{level = 10 : i32, message = "brn,bsn->brs"}> : () -> ()
    %cst_30 = arith.constant dense<0.000000e+00> : vector<2x4x4xf32>
    %63 = tpu.matmul %61, %61, %cst_30 {dimension_numbers = #tpu.dot_dimension_numbers<[2], [2], [1], [1], [0, 0, 0, 1, 1, 1], [0], [0]>} : vector<2x4x256xf32>, vector<2x4x256xf32>, vector<2x4x4xf32> -> vector<2x4x4xf32>
    "tpu.trace_stop"() : () -> ()
    "tpu.trace_start"() <{level = 10 : i32, message = "brp,brs->bps"}> : () -> ()
    %cst_31 = arith.constant dense<0.000000e+00> : vector<2x64x4xf32>
    %64 = tpu.matmul %31, %63, %cst_31 {dimension_numbers = #tpu.dot_dimension_numbers<[1], [1], [2], [2], [0, 0, 0, 2, 1, 2], [0], [0]>} : vector<2x4x64xf32>, vector<2x4x4xf32>, vector<2x64x4xf32> -> vector<2x64x4xf32>
    "tpu.trace_stop"() : () -> ()
    %65 = arith.mulf %2, %62 : vector<2x64x4xf32>
    %cst_32 = arith.constant 9.99999997E-7 : f32
    %66 = vector.broadcast %cst_32 : f32 to vector<2x64x4xf32>
    %67 = arith.addf %64, %66 : vector<2x64x4xf32>
    %68 = tpu.reciprocal %67 {approx = true} : vector<2x64x4xf32> -> vector<2x64x4xf32>
    %69 = arith.mulf %65, %68 : vector<2x64x4xf32>
    "tpu.trace_start"() <{level = 10 : i32, message = "bqr,bqp->brp"}> : () -> ()
    %cst_33 = arith.constant dense<0.000000e+00> : vector<2x4x64xf32>
    %70 = tpu.matmul %69, %17, %cst_33 {dimension_numbers = #tpu.dot_dimension_numbers<[1], [1], [2], [2], [0, 0, 0, 2, 1, 2], [0], [0]>} : vector<2x64x4xf32>, vector<2x64x64xf32>, vector<2x4x64xf32> -> vector<2x4x64xf32>
    "tpu.trace_stop"() : () -> ()
    "tpu.trace_start"() <{level = 10 : i32, message = "brp,bps->brs"}> : () -> ()
    %cst_34 = arith.constant dense<0.000000e+00> : vector<2x4x4xf32>
    %71 = tpu.matmul %70, %69, %cst_34 {dimension_numbers = #tpu.dot_dimension_numbers<[2], [1], [1], [2], [0, 0, 0, 1, 1, 2], [0], [0]>} : vector<2x4x64xf32>, vector<2x64x4xf32>, vector<2x4x4xf32> -> vector<2x4x4xf32>
    "tpu.trace_stop"() : () -> ()
    "tpu.trace_start"() <{level = 10 : i32, message = "bpr,bpn->brn"}> : () -> ()
    %cst_35 = arith.constant dense<0.000000e+00> : vector<2x4x256xf32>
    %72 = tpu.matmul %69, %15, %cst_35 {dimension_numbers = #tpu.dot_dimension_numbers<[1], [1], [2], [2], [0, 0, 0, 2, 1, 2], [0], [0]>} : vector<2x64x4xf32>, vector<2x64x256xf32>, vector<2x4x256xf32> -> vector<2x4x256xf32>
    "tpu.trace_stop"() : () -> ()
    %73 = vector.extract_strided_slice %71 {offsets = [0, 0, 0], sizes = [2, 4, 1], strides = [1, 1, 1]} : vector<2x4x4xf32> to vector<2x4x1xf32>
    %74 = vector.extract_strided_slice %61 {offsets = [0, 0, 0], sizes = [2, 1, 256], strides = [1, 1, 1]} : vector<2x4x256xf32> to vector<2x1x256xf32>
    %75 = vector.broadcast %73 : vector<2x4x1xf32> to vector<2x4x256xf32>
    %76 = vector.broadcast %74 : vector<2x1x256xf32> to vector<2x4x256xf32>
    %77 = arith.mulf %75, %76 : vector<2x4x256xf32>
    %78 = vector.extract_strided_slice %71 {offsets = [0, 0, 1], sizes = [2, 4, 1], strides = [1, 1, 1]} : vector<2x4x4xf32> to vector<2x4x1xf32>
    %79 = vector.extract_strided_slice %61 {offsets = [0, 1, 0], sizes = [2, 1, 256], strides = [1, 1, 1]} : vector<2x4x256xf32> to vector<2x1x256xf32>
    %80 = vector.broadcast %78 : vector<2x4x1xf32> to vector<2x4x256xf32>
    %81 = vector.broadcast %79 : vector<2x1x256xf32> to vector<2x4x256xf32>
    %82 = arith.mulf %80, %81 : vector<2x4x256xf32>
    %83 = arith.addf %77, %82 : vector<2x4x256xf32>
    %84 = vector.extract_strided_slice %71 {offsets = [0, 0, 2], sizes = [2, 4, 1], strides = [1, 1, 1]} : vector<2x4x4xf32> to vector<2x4x1xf32>
    %85 = vector.extract_strided_slice %61 {offsets = [0, 2, 0], sizes = [2, 1, 256], strides = [1, 1, 1]} : vector<2x4x256xf32> to vector<2x1x256xf32>
    %86 = vector.broadcast %84 : vector<2x4x1xf32> to vector<2x4x256xf32>
    %87 = vector.broadcast %85 : vector<2x1x256xf32> to vector<2x4x256xf32>
    %88 = arith.mulf %86, %87 : vector<2x4x256xf32>
    %89 = arith.addf %83, %88 : vector<2x4x256xf32>
    %90 = vector.extract_strided_slice %71 {offsets = [0, 0, 3], sizes = [2, 4, 1], strides = [1, 1, 1]} : vector<2x4x4xf32> to vector<2x4x1xf32>
    %91 = vector.extract_strided_slice %61 {offsets = [0, 3, 0], sizes = [2, 1, 256], strides = [1, 1, 1]} : vector<2x4x256xf32> to vector<2x1x256xf32>
    %92 = vector.broadcast %90 : vector<2x4x1xf32> to vector<2x4x256xf32>
    %93 = vector.broadcast %91 : vector<2x1x256xf32> to vector<2x4x256xf32>
    %94 = arith.mulf %92, %93 : vector<2x4x256xf32>
    %95 = arith.addf %89, %94 : vector<2x4x256xf32>
    %96 = arith.mulf %61, %72 : vector<2x4x256xf32>
    %cst_36 = arith.constant 9.99999997E-7 : f32
    %97 = vector.broadcast %cst_36 : f32 to vector<2x4x256xf32>
    %98 = arith.addf %95, %97 : vector<2x4x256xf32>
    %99 = tpu.reciprocal %98 {approx = true} : vector<2x4x256xf32> -> vector<2x4x256xf32>
    %100 = arith.mulf %96, %99 : vector<2x4x256xf32>
    "tpu.trace_start"() <{level = 10 : i32, message = "bpn,brn->bpr"}> : () -> ()
    %cst_37 = arith.constant dense<0.000000e+00> : vector<2x64x4xf32>
    %101 = tpu.matmul %15, %100, %cst_37 {dimension_numbers = #tpu.dot_dimension_numbers<[2], [2], [1], [1], [0, 0, 0, 1, 1, 1], [0], [0]>} : vector<2x64x256xf32>, vector<2x4x256xf32>, vector<2x64x4xf32> -> vector<2x64x4xf32>
    "tpu.trace_stop"() : () -> ()
    "tpu.trace_start"() <{level = 10 : i32, message = "brn,bsn->brs"}> : () -> ()
    %cst_38 = arith.constant dense<0.000000e+00> : vector<2x4x4xf32>
    %102 = tpu.matmul %100, %100, %cst_38 {dimension_numbers = #tpu.dot_dimension_numbers<[2], [2], [1], [1], [0, 0, 0, 1, 1, 1], [0], [0]>} : vector<2x4x256xf32>, vector<2x4x256xf32>, vector<2x4x4xf32> -> vector<2x4x4xf32>
    "tpu.trace_stop"() : () -> ()
    "tpu.trace_start"() <{level = 10 : i32, message = "brp,brs->bps"}> : () -> ()
    %cst_39 = arith.constant dense<0.000000e+00> : vector<2x64x4xf32>
    %103 = tpu.matmul %70, %102, %cst_39 {dimension_numbers = #tpu.dot_dimension_numbers<[1], [1], [2], [2], [0, 0, 0, 2, 1, 2], [0], [0]>} : vector<2x4x64xf32>, vector<2x4x4xf32>, vector<2x64x4xf32> -> vector<2x64x4xf32>
    "tpu.trace_stop"() : () -> ()
    %104 = arith.mulf %69, %101 : vector<2x64x4xf32>
    %cst_40 = arith.constant 9.99999997E-7 : f32
    %105 = vector.broadcast %cst_40 : f32 to vector<2x64x4xf32>
    %106 = arith.addf %103, %105 : vector<2x64x4xf32>
    %107 = tpu.reciprocal %106 {approx = true} : vector<2x64x4xf32> -> vector<2x64x4xf32>
    %108 = arith.mulf %104, %107 : vector<2x64x4xf32>
    "tpu.trace_start"() <{level = 10 : i32, message = "bqr,bqp->brp"}> : () -> ()
    %cst_41 = arith.constant dense<0.000000e+00> : vector<2x4x64xf32>
    %109 = tpu.matmul %108, %17, %cst_41 {dimension_numbers = #tpu.dot_dimension_numbers<[1], [1], [2], [2], [0, 0, 0, 2, 1, 2], [0], [0]>} : vector<2x64x4xf32>, vector<2x64x64xf32>, vector<2x4x64xf32> -> vector<2x4x64xf32>
    "tpu.trace_stop"() : () -> ()
    "tpu.trace_start"() <{level = 10 : i32, message = "brp,bps->brs"}> : () -> ()
    %cst_42 = arith.constant dense<0.000000e+00> : vector<2x4x4xf32>
    %110 = tpu.matmul %109, %108, %cst_42 {dimension_numbers = #tpu.dot_dimension_numbers<[2], [1], [1], [2], [0, 0, 0, 1, 1, 2], [0], [0]>} : vector<2x4x64xf32>, vector<2x64x4xf32>, vector<2x4x4xf32> -> vector<2x4x4xf32>
    "tpu.trace_stop"() : () -> ()
    "tpu.trace_start"() <{level = 10 : i32, message = "bpr,bpn->brn"}> : () -> ()
    %cst_43 = arith.constant dense<0.000000e+00> : vector<2x4x256xf32>
    %111 = tpu.matmul %108, %15, %cst_43 {dimension_numbers = #tpu.dot_dimension_numbers<[1], [1], [2], [2], [0, 0, 0, 2, 1, 2], [0], [0]>} : vector<2x64x4xf32>, vector<2x64x256xf32>, vector<2x4x256xf32> -> vector<2x4x256xf32>
    "tpu.trace_stop"() : () -> ()
    %112 = vector.extract_strided_slice %110 {offsets = [0, 0, 0], sizes = [2, 4, 1], strides = [1, 1, 1]} : vector<2x4x4xf32> to vector<2x4x1xf32>
    %113 = vector.extract_strided_slice %100 {offsets = [0, 0, 0], sizes = [2, 1, 256], strides = [1, 1, 1]} : vector<2x4x256xf32> to vector<2x1x256xf32>
    %114 = vector.broadcast %112 : vector<2x4x1xf32> to vector<2x4x256xf32>
    %115 = vector.broadcast %113 : vector<2x1x256xf32> to vector<2x4x256xf32>
    %116 = arith.mulf %114, %115 : vector<2x4x256xf32>
    %117 = vector.extract_strided_slice %110 {offsets = [0, 0, 1], sizes = [2, 4, 1], strides = [1, 1, 1]} : vector<2x4x4xf32> to vector<2x4x1xf32>
    %118 = vector.extract_strided_slice %100 {offsets = [0, 1, 0], sizes = [2, 1, 256], strides = [1, 1, 1]} : vector<2x4x256xf32> to vector<2x1x256xf32>
    %119 = vector.broadcast %117 : vector<2x4x1xf32> to vector<2x4x256xf32>
    %120 = vector.broadcast %118 : vector<2x1x256xf32> to vector<2x4x256xf32>
    %121 = arith.mulf %119, %120 : vector<2x4x256xf32>
    %122 = arith.addf %116, %121 : vector<2x4x256xf32>
    %123 = vector.extract_strided_slice %110 {offsets = [0, 0, 2], sizes = [2, 4, 1], strides = [1, 1, 1]} : vector<2x4x4xf32> to vector<2x4x1xf32>
    %124 = vector.extract_strided_slice %100 {offsets = [0, 2, 0], sizes = [2, 1, 256], strides = [1, 1, 1]} : vector<2x4x256xf32> to vector<2x1x256xf32>
    %125 = vector.broadcast %123 : vector<2x4x1xf32> to vector<2x4x256xf32>
    %126 = vector.broadcast %124 : vector<2x1x256xf32> to vector<2x4x256xf32>
    %127 = arith.mulf %125, %126 : vector<2x4x256xf32>
    %128 = arith.addf %122, %127 : vector<2x4x256xf32>
    %129 = vector.extract_strided_slice %110 {offsets = [0, 0, 3], sizes = [2, 4, 1], strides = [1, 1, 1]} : vector<2x4x4xf32> to vector<2x4x1xf32>
    %130 = vector.extract_strided_slice %100 {offsets = [0, 3, 0], sizes = [2, 1, 256], strides = [1, 1, 1]} : vector<2x4x256xf32> to vector<2x1x256xf32>
    %131 = vector.broadcast %129 : vector<2x4x1xf32> to vector<2x4x256xf32>
    %132 = vector.broadcast %130 : vector<2x1x256xf32> to vector<2x4x256xf32>
    %133 = arith.mulf %131, %132 : vector<2x4x256xf32>
    %134 = arith.addf %128, %133 : vector<2x4x256xf32>
    %135 = arith.mulf %100, %111 : vector<2x4x256xf32>
    %cst_44 = arith.constant 9.99999997E-7 : f32
    %136 = vector.broadcast %cst_44 : f32 to vector<2x4x256xf32>
    %137 = arith.addf %134, %136 : vector<2x4x256xf32>
    %138 = tpu.reciprocal %137 {approx = true} : vector<2x4x256xf32> -> vector<2x4x256xf32>
    %139 = arith.mulf %135, %138 : vector<2x4x256xf32>
    "tpu.trace_start"() <{level = 10 : i32, message = "bpn,brn->bpr"}> : () -> ()
    %cst_45 = arith.constant dense<0.000000e+00> : vector<2x64x4xf32>
    %140 = tpu.matmul %15, %139, %cst_45 {dimension_numbers = #tpu.dot_dimension_numbers<[2], [2], [1], [1], [0, 0, 0, 1, 1, 1], [0], [0]>} : vector<2x64x256xf32>, vector<2x4x256xf32>, vector<2x64x4xf32> -> vector<2x64x4xf32>
    "tpu.trace_stop"() : () -> ()
    "tpu.trace_start"() <{level = 10 : i32, message = "brn,bsn->brs"}> : () -> ()
    %cst_46 = arith.constant dense<0.000000e+00> : vector<2x4x4xf32>
    %141 = tpu.matmul %139, %139, %cst_46 {dimension_numbers = #tpu.dot_dimension_numbers<[2], [2], [1], [1], [0, 0, 0, 1, 1, 1], [0], [0]>} : vector<2x4x256xf32>, vector<2x4x256xf32>, vector<2x4x4xf32> -> vector<2x4x4xf32>
    "tpu.trace_stop"() : () -> ()
    "tpu.trace_start"() <{level = 10 : i32, message = "brp,brs->bps"}> : () -> ()
    %cst_47 = arith.constant dense<0.000000e+00> : vector<2x64x4xf32>
    %142 = tpu.matmul %109, %141, %cst_47 {dimension_numbers = #tpu.dot_dimension_numbers<[1], [1], [2], [2], [0, 0, 0, 2, 1, 2], [0], [0]>} : vector<2x4x64xf32>, vector<2x4x4xf32>, vector<2x64x4xf32> -> vector<2x64x4xf32>
    "tpu.trace_stop"() : () -> ()
    %143 = arith.mulf %108, %140 : vector<2x64x4xf32>
    %cst_48 = arith.constant 9.99999997E-7 : f32
    %144 = vector.broadcast %cst_48 : f32 to vector<2x64x4xf32>
    %145 = arith.addf %142, %144 : vector<2x64x4xf32>
    %146 = tpu.reciprocal %145 {approx = true} : vector<2x64x4xf32> -> vector<2x64x4xf32>
    %147 = arith.mulf %143, %146 : vector<2x64x4xf32>
    "tpu.trace_start"() <{level = 10 : i32, message = "bqr,bqp->brp"}> : () -> ()
    %cst_49 = arith.constant dense<0.000000e+00> : vector<2x4x64xf32>
    %148 = tpu.matmul %147, %17, %cst_49 {dimension_numbers = #tpu.dot_dimension_numbers<[1], [1], [2], [2], [0, 0, 0, 2, 1, 2], [0], [0]>} : vector<2x64x4xf32>, vector<2x64x64xf32>, vector<2x4x64xf32> -> vector<2x4x64xf32>
    "tpu.trace_stop"() : () -> ()
    "tpu.trace_start"() <{level = 10 : i32, message = "brp,bps->brs"}> : () -> ()
    %cst_50 = arith.constant dense<0.000000e+00> : vector<2x4x4xf32>
    %149 = tpu.matmul %148, %147, %cst_50 {dimension_numbers = #tpu.dot_dimension_numbers<[2], [1], [1], [2], [0, 0, 0, 1, 1, 2], [0], [0]>} : vector<2x4x64xf32>, vector<2x64x4xf32>, vector<2x4x4xf32> -> vector<2x4x4xf32>
    "tpu.trace_stop"() : () -> ()
    "tpu.trace_start"() <{level = 10 : i32, message = "bpr,bpn->brn"}> : () -> ()
    %cst_51 = arith.constant dense<0.000000e+00> : vector<2x4x256xf32>
    %150 = tpu.matmul %147, %15, %cst_51 {dimension_numbers = #tpu.dot_dimension_numbers<[1], [1], [2], [2], [0, 0, 0, 2, 1, 2], [0], [0]>} : vector<2x64x4xf32>, vector<2x64x256xf32>, vector<2x4x256xf32> -> vector<2x4x256xf32>
    "tpu.trace_stop"() : () -> ()
    %151 = vector.extract_strided_slice %149 {offsets = [0, 0, 0], sizes = [2, 4, 1], strides = [1, 1, 1]} : vector<2x4x4xf32> to vector<2x4x1xf32>
    %152 = vector.extract_strided_slice %139 {offsets = [0, 0, 0], sizes = [2, 1, 256], strides = [1, 1, 1]} : vector<2x4x256xf32> to vector<2x1x256xf32>
    %153 = vector.broadcast %151 : vector<2x4x1xf32> to vector<2x4x256xf32>
    %154 = vector.broadcast %152 : vector<2x1x256xf32> to vector<2x4x256xf32>
    %155 = arith.mulf %153, %154 : vector<2x4x256xf32>
    %156 = vector.extract_strided_slice %149 {offsets = [0, 0, 1], sizes = [2, 4, 1], strides = [1, 1, 1]} : vector<2x4x4xf32> to vector<2x4x1xf32>
    %157 = vector.extract_strided_slice %139 {offsets = [0, 1, 0], sizes = [2, 1, 256], strides = [1, 1, 1]} : vector<2x4x256xf32> to vector<2x1x256xf32>
    %158 = vector.broadcast %156 : vector<2x4x1xf32> to vector<2x4x256xf32>
    %159 = vector.broadcast %157 : vector<2x1x256xf32> to vector<2x4x256xf32>
    %160 = arith.mulf %158, %159 : vector<2x4x256xf32>
    %161 = arith.addf %155, %160 : vector<2x4x256xf32>
    %162 = vector.extract_strided_slice %149 {offsets = [0, 0, 2], sizes = [2, 4, 1], strides = [1, 1, 1]} : vector<2x4x4xf32> to vector<2x4x1xf32>
    %163 = vector.extract_strided_slice %139 {offsets = [0, 2, 0], sizes = [2, 1, 256], strides = [1, 1, 1]} : vector<2x4x256xf32> to vector<2x1x256xf32>
    %164 = vector.broadcast %162 : vector<2x4x1xf32> to vector<2x4x256xf32>
    %165 = vector.broadcast %163 : vector<2x1x256xf32> to vector<2x4x256xf32>
    %166 = arith.mulf %164, %165 : vector<2x4x256xf32>
    %167 = arith.addf %161, %166 : vector<2x4x256xf32>
    %168 = vector.extract_strided_slice %149 {offsets = [0, 0, 3], sizes = [2, 4, 1], strides = [1, 1, 1]} : vector<2x4x4xf32> to vector<2x4x1xf32>
    %169 = vector.extract_strided_slice %139 {offsets = [0, 3, 0], sizes = [2, 1, 256], strides = [1, 1, 1]} : vector<2x4x256xf32> to vector<2x1x256xf32>
    %170 = vector.broadcast %168 : vector<2x4x1xf32> to vector<2x4x256xf32>
    %171 = vector.broadcast %169 : vector<2x1x256xf32> to vector<2x4x256xf32>
    %172 = arith.mulf %170, %171 : vector<2x4x256xf32>
    %173 = arith.addf %167, %172 : vector<2x4x256xf32>
    %174 = arith.mulf %139, %150 : vector<2x4x256xf32>
    %cst_52 = arith.constant 9.99999997E-7 : f32
    %175 = vector.broadcast %cst_52 : f32 to vector<2x4x256xf32>
    %176 = arith.addf %173, %175 : vector<2x4x256xf32>
    %177 = tpu.reciprocal %176 {approx = true} : vector<2x4x256xf32> -> vector<2x4x256xf32>
    %178 = arith.mulf %174, %177 : vector<2x4x256xf32>
    "tpu.trace_start"() <{level = 10 : i32, message = "bpn,brn->bpr"}> : () -> ()
    %cst_53 = arith.constant dense<0.000000e+00> : vector<2x64x4xf32>
    %179 = tpu.matmul %15, %178, %cst_53 {dimension_numbers = #tpu.dot_dimension_numbers<[2], [2], [1], [1], [0, 0, 0, 1, 1, 1], [0], [0]>} : vector<2x64x256xf32>, vector<2x4x256xf32>, vector<2x64x4xf32> -> vector<2x64x4xf32>
    "tpu.trace_stop"() : () -> ()
    "tpu.trace_start"() <{level = 10 : i32, message = "brn,bsn->brs"}> : () -> ()
    %cst_54 = arith.constant dense<0.000000e+00> : vector<2x4x4xf32>
    %180 = tpu.matmul %178, %178, %cst_54 {dimension_numbers = #tpu.dot_dimension_numbers<[2], [2], [1], [1], [0, 0, 0, 1, 1, 1], [0], [0]>} : vector<2x4x256xf32>, vector<2x4x256xf32>, vector<2x4x4xf32> -> vector<2x4x4xf32>
    "tpu.trace_stop"() : () -> ()
    "tpu.trace_start"() <{level = 10 : i32, message = "brp,brs->bps"}> : () -> ()
    %cst_55 = arith.constant dense<0.000000e+00> : vector<2x64x4xf32>
    %181 = tpu.matmul %148, %180, %cst_55 {dimension_numbers = #tpu.dot_dimension_numbers<[1], [1], [2], [2], [0, 0, 0, 2, 1, 2], [0], [0]>} : vector<2x4x64xf32>, vector<2x4x4xf32>, vector<2x64x4xf32> -> vector<2x64x4xf32>
    "tpu.trace_stop"() : () -> ()
    %182 = arith.mulf %147, %179 : vector<2x64x4xf32>
    %cst_56 = arith.constant 9.99999997E-7 : f32
    %183 = vector.broadcast %cst_56 : f32 to vector<2x64x4xf32>
    %184 = arith.addf %181, %183 : vector<2x64x4xf32>
    %185 = tpu.reciprocal %184 {approx = true} : vector<2x64x4xf32> -> vector<2x64x4xf32>
    %186 = arith.mulf %182, %185 : vector<2x64x4xf32>
    "tpu.trace_start"() <{level = 10 : i32, message = "bqr,bqp->brp"}> : () -> ()
    %cst_57 = arith.constant dense<0.000000e+00> : vector<2x4x64xf32>
    %187 = tpu.matmul %186, %17, %cst_57 {dimension_numbers = #tpu.dot_dimension_numbers<[1], [1], [2], [2], [0, 0, 0, 2, 1, 2], [0], [0]>} : vector<2x64x4xf32>, vector<2x64x64xf32>, vector<2x4x64xf32> -> vector<2x4x64xf32>
    "tpu.trace_stop"() : () -> ()
    "tpu.trace_start"() <{level = 10 : i32, message = "brp,bps->brs"}> : () -> ()
    %cst_58 = arith.constant dense<0.000000e+00> : vector<2x4x4xf32>
    %188 = tpu.matmul %187, %186, %cst_58 {dimension_numbers = #tpu.dot_dimension_numbers<[2], [1], [1], [2], [0, 0, 0, 1, 1, 2], [0], [0]>} : vector<2x4x64xf32>, vector<2x64x4xf32>, vector<2x4x4xf32> -> vector<2x4x4xf32>
    "tpu.trace_stop"() : () -> ()
    "tpu.trace_start"() <{level = 10 : i32, message = "bpr,bpn->brn"}> : () -> ()
    %cst_59 = arith.constant dense<0.000000e+00> : vector<2x4x256xf32>
    %189 = tpu.matmul %186, %15, %cst_59 {dimension_numbers = #tpu.dot_dimension_numbers<[1], [1], [2], [2], [0, 0, 0, 2, 1, 2], [0], [0]>} : vector<2x64x4xf32>, vector<2x64x256xf32>, vector<2x4x256xf32> -> vector<2x4x256xf32>
    "tpu.trace_stop"() : () -> ()
    %190 = vector.extract_strided_slice %188 {offsets = [0, 0, 0], sizes = [2, 4, 1], strides = [1, 1, 1]} : vector<2x4x4xf32> to vector<2x4x1xf32>
    %191 = vector.extract_strided_slice %178 {offsets = [0, 0, 0], sizes = [2, 1, 256], strides = [1, 1, 1]} : vector<2x4x256xf32> to vector<2x1x256xf32>
    %192 = vector.broadcast %190 : vector<2x4x1xf32> to vector<2x4x256xf32>
    %193 = vector.broadcast %191 : vector<2x1x256xf32> to vector<2x4x256xf32>
    %194 = arith.mulf %192, %193 : vector<2x4x256xf32>
    %195 = vector.extract_strided_slice %188 {offsets = [0, 0, 1], sizes = [2, 4, 1], strides = [1, 1, 1]} : vector<2x4x4xf32> to vector<2x4x1xf32>
    %196 = vector.extract_strided_slice %178 {offsets = [0, 1, 0], sizes = [2, 1, 256], strides = [1, 1, 1]} : vector<2x4x256xf32> to vector<2x1x256xf32>
    %197 = vector.broadcast %195 : vector<2x4x1xf32> to vector<2x4x256xf32>
    %198 = vector.broadcast %196 : vector<2x1x256xf32> to vector<2x4x256xf32>
    %199 = arith.mulf %197, %198 : vector<2x4x256xf32>
    %200 = arith.addf %194, %199 : vector<2x4x256xf32>
    %201 = vector.extract_strided_slice %188 {offsets = [0, 0, 2], sizes = [2, 4, 1], strides = [1, 1, 1]} : vector<2x4x4xf32> to vector<2x4x1xf32>
    %202 = vector.extract_strided_slice %178 {offsets = [0, 2, 0], sizes = [2, 1, 256], strides = [1, 1, 1]} : vector<2x4x256xf32> to vector<2x1x256xf32>
    %203 = vector.broadcast %201 : vector<2x4x1xf32> to vector<2x4x256xf32>
    %204 = vector.broadcast %202 : vector<2x1x256xf32> to vector<2x4x256xf32>
    %205 = arith.mulf %203, %204 : vector<2x4x256xf32>
    %206 = arith.addf %200, %205 : vector<2x4x256xf32>
    %207 = vector.extract_strided_slice %188 {offsets = [0, 0, 3], sizes = [2, 4, 1], strides = [1, 1, 1]} : vector<2x4x4xf32> to vector<2x4x1xf32>
    %208 = vector.extract_strided_slice %178 {offsets = [0, 3, 0], sizes = [2, 1, 256], strides = [1, 1, 1]} : vector<2x4x256xf32> to vector<2x1x256xf32>
    %209 = vector.broadcast %207 : vector<2x4x1xf32> to vector<2x4x256xf32>
    %210 = vector.broadcast %208 : vector<2x1x256xf32> to vector<2x4x256xf32>
    %211 = arith.mulf %209, %210 : vector<2x4x256xf32>
    %212 = arith.addf %206, %211 : vector<2x4x256xf32>
    %213 = arith.mulf %178, %189 : vector<2x4x256xf32>
    %cst_60 = arith.constant 9.99999997E-7 : f32
    %214 = vector.broadcast %cst_60 : f32 to vector<2x4x256xf32>
    %215 = arith.addf %212, %214 : vector<2x4x256xf32>
    %216 = tpu.reciprocal %215 {approx = true} : vector<2x4x256xf32> -> vector<2x4x256xf32>
    %217 = arith.mulf %213, %216 : vector<2x4x256xf32>
    %218 = vector.extract_strided_slice %186 {offsets = [0, 0, 0], sizes = [1, 64, 4], strides = [1, 1, 1]} : vector<2x64x4xf32> to vector<1x64x4xf32>
    %219 = vector.shape_cast %218 : vector<1x64x4xf32> to vector<64x4xf32>
    %220 = vector.extract_strided_slice %217 {offsets = [0, 0, 0], sizes = [1, 4, 256], strides = [1, 1, 1]} : vector<2x4x256xf32> to vector<1x4x256xf32>
    %221 = vector.shape_cast %220 : vector<1x4x256xf32> to vector<4x256xf32>
    %cst_61 = arith.constant dense<0.000000e+00> : vector<64x256xf32>
    %222 = tpu.matmul %219, %221, %cst_61 {dimension_numbers = #tpu.dot_dimension_numbers<[1], [0], [0], [1], [0, 0, 1, 1], [], []>} : vector<64x4xf32>, vector<4x256xf32>, vector<64x256xf32> -> vector<64x256xf32>
    %cst_62 = arith.constant dense<0.000000e+00> : vector<16x256xf32>
    %223 = tpu.matmul %0, %222, %cst_62 {dimension_numbers = #tpu.dot_dimension_numbers<[1], [0], [0], [1], [0, 0, 1, 1], [], []>} : vector<16x64xf32>, vector<64x256xf32>, vector<16x256xf32> -> vector<16x256xf32>
    %c0_63 = arith.constant 0 : index
    %c0_64 = arith.constant 0 : index
    %c0_65 = arith.constant 0 : index
    %224 = vector.load %arg5[%c0_63, %c0_64, %c0_65] : memref<2x16x256xf32, #tpu.memory_space<vmem>>, vector<1x16x256xf32>
    %225 = vector.shape_cast %224 : vector<1x16x256xf32> to vector<16x256xf32>
    %226 = vector.shape_cast %223 : vector<16x256xf32> to vector<1x16x256xf32>
    tpu.vector_store %arg5[%c0_63, %c0_64, %c0_65], %226 {strides = array<i32>} : memref<2x16x256xf32, #tpu.memory_space<vmem>>, vector<1x16x256xf32>,
    %227 = vector.extract_strided_slice %186 {offsets = [1, 0, 0], sizes = [1, 64, 4], strides = [1, 1, 1]} : vector<2x64x4xf32> to vector<1x64x4xf32>
    %228 = vector.shape_cast %227 : vector<1x64x4xf32> to vector<64x4xf32>
    %229 = vector.extract_strided_slice %217 {offsets = [1, 0, 0], sizes = [1, 4, 256], strides = [1, 1, 1]} : vector<2x4x256xf32> to vector<1x4x256xf32>
    %230 = vector.shape_cast %229 : vector<1x4x256xf32> to vector<4x256xf32>
    %cst_66 = arith.constant dense<0.000000e+00> : vector<64x256xf32>
    %231 = tpu.matmul %228, %230, %cst_66 {dimension_numbers = #tpu.dot_dimension_numbers<[1], [0], [0], [1], [0, 0, 1, 1], [], []>} : vector<64x4xf32>, vector<4x256xf32>, vector<64x256xf32> -> vector<64x256xf32>
    %cst_67 = arith.constant dense<0.000000e+00> : vector<16x256xf32>
    %232 = tpu.matmul %0, %231, %cst_67 {dimension_numbers = #tpu.dot_dimension_numbers<[1], [0], [0], [1], [0, 0, 1, 1], [], []>} : vector<16x64xf32>, vector<64x256xf32>, vector<16x256xf32> -> vector<16x256xf32>
    %c1_68 = arith.constant 1 : index
    %c0_69 = arith.constant 0 : index
    %c0_70 = arith.constant 0 : index
    %233 = vector.load %arg5[%c1_68, %c0_69, %c0_70] : memref<2x16x256xf32, #tpu.memory_space<vmem>>, vector<1x16x256xf32>
    %234 = vector.shape_cast %233 : vector<1x16x256xf32> to vector<16x256xf32>
    %235 = vector.shape_cast %232 : vector<16x256xf32> to vector<1x16x256xf32>
    tpu.vector_store %arg5[%c1_68, %c0_69, %c0_70], %235 {strides = array<i32>} : memref<2x16x256xf32, #tpu.memory_space<vmem>>, vector<1x16x256xf32>,
    return
  }
  func.func @transform_0(%arg0: i32) -> (i32, i32, i32) {
    %c0_i32 = arith.constant 0 : i32
    %c0_i32_0 = arith.constant 0 : i32
    %c0_i32_1 = arith.constant 0 : i32
    return %arg0, %c0_i32, %c0_i32_0 : i32, i32, i32
  }
  func.func @transform_1(%arg0: i32) -> (i32, i32) {
    %c0_i32 = arith.constant 0 : i32
    %c0_i32_0 = arith.constant 0 : i32
    %c0_i32_1 = arith.constant 0 : i32
    return %c0_i32, %c0_i32_0 : i32, i32
  }
  func.func @transform_2(%arg0: i32) -> (i32, i32) {
    %c0_i32 = arith.constant 0 : i32
    %c0_i32_0 = arith.constant 0 : i32
    %c0_i32_1 = arith.constant 0 : i32
    return %c0_i32, %c0_i32_0 : i32, i32
  }
  func.func @transform_3(%arg0: i32) -> (i32, i32, i32) {
    %c0_i32 = arith.constant 0 : i32
    %c0_i32_0 = arith.constant 0 : i32
    %c0_i32_1 = arith.constant 0 : i32
    return %arg0, %c0_i32, %c0_i32_0 : i32, i32, i32
  }
  func.func @transform_4(%arg0: i32) -> (i32, i32, i32) {
    %c0_i32 = arith.constant 0 : i32
    %c0_i32_0 = arith.constant 0 : i32
    %c0_i32_1 = arith.constant 0 : i32
    return %arg0, %c0_i32, %c0_i32_0 : i32, i32, i32
  }
}

</mosaic_0001>

<bundles_post_ra>
// kernel: tpu_custom_call.1
= control target key start
LH: loop header
LB: loop body
LE: loop exit
PB: predicated region body
PF: predicated region fallthrough
CT: control target
= control target key end

     0   :  { %9 = vsyncpa [#allocation4], 0  ;;  %s6774_s0 = inlined_call_operand.vmem [shape: f32[2,16,256], index: 0, kind: input, shape index: {}]   ;;  %s6775_s1 = inlined_call_operand.hbm [shape: f32[16,64], index: 1, kind: input, shape index: {}]   ;;  %s6776_s2 = inlined_call_operand.vmem [shape: f32[64,64], index: 2, kind: input, shape index: {}]   ;;  %s6777_s3 = inlined_call_operand.vmem [shape: f32[2,64,4], index: 3, kind: input, shape index: {}]   ;;  %s6778_s4 = inlined_call_operand.hbm [shape: f32[2,16,256], index: 4, kind: output, shape index: {}]  }
   0x1   :  { %10 = vsyncpa [#allocation5], 0  ;;  %s17_s17 = sshll.u32 %s6775_s1, 4  ;;  %s4914_s18 = smov [#allocation3]   ;;  %s18_s17 = int_to_ptr.hbm [resolvable:$true] %s17_s17 }
   0x2   :  { %s19_s19 = sshll.u32 %s4914_s18, 4  ;;  %s4915_s20 = smov 128   ;;  %s20_s19 = int_to_ptr.vmem [resolvable:$true] %s19_s19 }
   0x3   :  { %s4916_s21 = smov 8  }
   0x4   :  { %25 = dma.hbm_to_vmem [thread:$0]  %s18_s17, 256, %s20_s19, [#allocation4], %s4915_s20, %s4915_s20, %s4916_s21  }
   0x5   :  { %4910 = dma.done.wait [#allocation4], 256  }
   0x6   :  { %4911 = vsyncadd [#allocation4], 4294967040  ;;  %v34_v0 = vld [vmem:[#allocation3] sm:$0xff]  ;;  %v62_v1 = vld [vmem:[%s6774_s0 + $0x10] sm:$0xff]  ;;  %vm96_vm0 = vcmask 130048   ;;  %vm387_vm1 = vcmask 523264  }
   0x7   :  { %64 = vxpose.xlu0.b32.start [1/2] (short) (narrow) %v34_v0, 64  ;;  %135 = vmatpush.msra.mxu0 %v62_v1  ;;  %v63_v2 = vld [vmem:[%s6774_s0 + $0x18] sm:$0xff]  ;;  %v4420_v3 = vld [vmem:[%s6774_s0 + $0x30] sm:$0xff]  ;;  %v60_v5 = vld [vmem:[%s6774_s0] sm:$0xff]  ;;  %vm506_vm2 = vcmask 1043456   ;;  %vm1055_vm3 = vcmask 31744  }
   0x8   :  { %v4421_v4 = vld [vmem:[%s6774_s0 + $0x38] sm:$0xff]  ;;  %176 = vmatpush.msra.mxu1 %v63_v2  ;;  %238 = vmatpush.msra.mxu2 %v4420_v3  ;;  %v61_v6 = vld [vmem:[%s6774_s0 + $0x8] sm:$0xff]  ;;  %v4418_v7 = vld [vmem:[%s6774_s0 + $0x20] sm:$0xff]  ;;  %s4389_s10 = sshll.u32 %s6778_s4, 4  ;;  %s4922_s11 = smov 256   ;;  %s4390_s10 = int_to_ptr.hbm [resolvable:$true] %s4389_s10 }
   0x9   :  { %279 = vmatpush.msra.mxu3 %v4421_v4  ;;  %136 = vmatpush.msra.mxu0 %v60_v5  ;;  %v4419_v8 = vld [vmem:[%s6774_s0 + $0x28] sm:$0xff]  ;;  %v4979_v11 = vld [vmem:[%s6777_s3] sm:$0xff]  ;;  %v4999_v15 = vld [vmem:[%s6777_s3 + $0x10] sm:$0xff]  ;;  %s4923_s12 = smov 16  }
   0xa   :  { %177 = vmatpush.msra.mxu1 %v61_v6  ;;  %239 = vmatpush.msra.mxu2 %v4418_v7  ;;  %v35_v9 = vld [vmem:[#allocation3 + $0x8] sm:$0xff]  ;;  %6962 = vst [vmem:[#allocation9_spill] sm:$0xff] %v4979_v11  ;;  %v5008_v16 = vld [vmem:[%s6777_s3 + $0x40] sm:$0xff]  ;;  %v5015_v18 = vld [vmem:[%s6777_s3 + $0x18] sm:$0xff] }
   0xb   :  { %280 = vmatpush.msra.mxu3 %v4419_v8  ;;  %355 = vxpose.xlu1.b32.start [1/8] (short) (narrow) %v4979_v11, 8  ;;  %v4989_v13 = vld [vmem:[%s6777_s3 + $0x8] sm:$0xff]  ;;  %v5031_v21 = vld [vmem:[%s6777_s3 + $0x20] sm:$0xff]  ;;  %v5036_v22 = vld [vmem:[%s6777_s3 + $0x50] sm:$0xff] }
   0xc   :  { %431 = vxpose.xlu2.b32.start [1/8] (short) (narrow) %v5008_v16, 8  ;;  %v5024_v19 = vld [vmem:[%s6777_s3 + $0x48] sm:$0xff]  ;;  %v5052_v25 = vld [vmem:[%s6777_s3 + $0x58] sm:$0xff]  ;;  %v5063_v27 = vld [vmem:[%s6777_s3 + $0x30] sm:$0xff] }
   0xd   :  { %v5047_v24 = vld [vmem:[%s6777_s3 + $0x28] sm:$0xff]  ;;  %v5068_v28 = vld [vmem:[%s6777_s3 + $0x60] sm:$0xff]  ;;  %v5079_v30 = vld [vmem:[%s6777_s3 + $0x38] sm:$0xff] }
   0xe   :  { %v5084_v31 = vld [vmem:[%s6777_s3 + $0x68] sm:$0xff]  ;;  %v5095_v32 = vld [vmem:[%s6777_s3 + $0x70] sm:$0xff]  ;;  %v5101_v33 = vld [vmem:[%s6777_s3 + $0x78] sm:$0xff] }
   0xf   :  { %65 = vxpose.xlu0.b32.end [2/2] (short) (narrow) %v35_v9, 64  ;;  %v5195_v3 = vld [vmem:[%s6776_s2 + $0x38] sm:$0xff]  ;;  %v5204_v4 = vld [vmem:[%s6776_s2 + $0x30] sm:$0xff]  ;;  %v5212_v5 = vld [vmem:[%s6776_s2 + $0x28] sm:$0xff] }
  0x10   :  { %v5221_v7 = vld [vmem:[%s6776_s2 + $0x20] sm:$0xff]  ;;  %v5230_v8 = vld [vmem:[%s6776_s2 + $0x18] sm:$0xff]  ;;  %v5238_v9 = vld [vmem:[%s6776_s2 + $0x10] sm:$0xff] }
  0x13   :  { %356 = vxpose.xlu1.b32.cont [2/8] (short) (narrow) %v4989_v13, 8 }
  0x14   :  { %432 = vxpose.xlu2.b32.cont [2/8] (short) (narrow) %v5024_v19, 8 }
  0x1b   :  { %357 = vxpose.xlu1.b32.cont [3/8] (short) (narrow) %v4999_v15, 8 }
  0x1c   :  { %433 = vxpose.xlu2.b32.cont [3/8] (short) (narrow) %v5036_v22, 8 }
  0x23   :  { %358 = vxpose.xlu1.b32.cont [4/8] (short) (narrow) %v5015_v18, 8 }
  0x24   :  { %434 = vxpose.xlu2.b32.cont [4/8] (short) (narrow) %v5052_v25, 8 }
  0x2b   :  { %359 = vxpose.xlu1.b32.cont [5/8] (short) (narrow) %v5031_v21, 8 }
  0x2c   :  { %435 = vxpose.xlu2.b32.cont [5/8] (short) (narrow) %v5068_v28, 8 }
  0x33   :  { %360 = vxpose.xlu1.b32.cont [6/8] (short) (narrow) %v5047_v24, 8 }
  0x34   :  { %436 = vxpose.xlu2.b32.cont [6/8] (short) (narrow) %v5084_v31, 8 }
  0x3b   :  { %361 = vxpose.xlu1.b32.cont [7/8] (short) (narrow) %v5063_v27, 8 }
  0x3c   :  { %437 = vxpose.xlu2.b32.cont [7/8] (short) (narrow) %v5095_v32, 8 }
  0x43   :  { %362 = vxpose.xlu1.b32.end [8/8] (short) (narrow) %v5079_v30, 8 }
  0x44   :  { %438 = vxpose.xlu2.b32.end [8/8] (short) (narrow) %v5101_v33, 8 }
  0xa5   :  { %v447_v6 = vpop.trf.xlu2 }
  0xab   :  { %v80_v10 = vpop.trf.xlu0 }
  0xac   :  { %4402 = vmatmul.msk.f32.vlgmr.msra.gmra.mxu0 %vm96_vm0, %v80_v10  ;;  %4410 = vmatmul.msk.f32.vlgmr.msra.gmra.mxu1 %vm96_vm0, %v80_v10 }
  0xad   :  { %4422 = vmatmul.msk.f32.vlgmr.msra.gmra.mxu2 %vm96_vm0, %v80_v10  ;;  %4430 = vmatmul.msk.f32.vlgmr.msra.gmra.mxu3 %vm96_vm0, %v80_v10  ;;  %v5247_v10 = vld [vmem:[%s6776_s2 + $0x8] sm:$0xff] }
  0xaf   :  { %v371_v2 = vpop.trf.xlu1 }
  0xb3   :  { %v81_v12 = vpop.trf.xlu0 }
  0xb4   :  { %4403 = vmatmul.msk.f32.gmra.mxu0 %vm96_vm0, %v81_v12  ;;  %4411 = vmatmul.msk.f32.gmra.mxu1 %vm96_vm0, %v81_v12 }
  0xb5   :  { %4423 = vmatmul.msk.f32.gmra.mxu2 %vm96_vm0, %v81_v12  ;;  %4431 = vmatmul.msk.f32.gmra.mxu3 %vm96_vm0, %v81_v12  ;;  %v5256_v12 = vld [vmem:[%s6776_s2] sm:$0xff] }
  0xbb   :  { %v82_v14 = vpop.trf.xlu0 }
  0xbc   :  { %4404 = vmatmul.msk.f32.gmra.mxu0 %vm96_vm0, %v82_v14  ;;  %4412 = vmatmul.msk.f32.gmra.mxu1 %vm96_vm0, %v82_v14 }
  0xbd   :  { %4424 = vmatmul.msk.f32.gmra.mxu2 %vm96_vm0, %v82_v14  ;;  %4432 = vmatmul.msk.f32.gmra.mxu3 %vm96_vm0, %v82_v14 }
  0xc3   :  { %v83_v17 = vpop.trf.xlu0 }
  0xc4   :  { %4405 = vmatmul.msk.f32.gmra.mxu0 %vm96_vm0, %v83_v17  ;;  %4413 = vmatmul.msk.f32.gmra.mxu1 %vm96_vm0, %v83_v17 }
  0xc5   :  { %4425 = vmatmul.msk.f32.gmra.mxu2 %vm96_vm0, %v83_v17  ;;  %4433 = vmatmul.msk.f32.gmra.mxu3 %vm96_vm0, %v83_v17 }
  0xcb   :  { %v84_v20 = vpop.trf.xlu0 }
  0xcc   :  { %4406 = vmatmul.msk.f32.gmra.mxu0 %vm96_vm0, %v84_v20  ;;  %4414 = vmatmul.msk.f32.gmra.mxu1 %vm96_vm0, %v84_v20 }
  0xcd   :  { %4426 = vmatmul.msk.f32.gmra.mxu2 %vm96_vm0, %v84_v20  ;;  %4434 = vmatmul.msk.f32.gmra.mxu3 %vm96_vm0, %v84_v20 }
  0xd3   :  { %v85_v23 = vpop.trf.xlu0 }
  0xd4   :  { %4407 = vmatmul.msk.f32.gmra.mxu0 %vm96_vm0, %v85_v23  ;;  %4415 = vmatmul.msk.f32.gmra.mxu1 %vm96_vm0, %v85_v23 }
  0xd5   :  { %4427 = vmatmul.msk.f32.gmra.mxu2 %vm96_vm0, %v85_v23  ;;  %4435 = vmatmul.msk.f32.gmra.mxu3 %vm96_vm0, %v85_v23 }
  0xdb   :  { %v86_v26 = vpop.trf.xlu0 }
  0xdc   :  { %4408 = vmatmul.msk.f32.gmra.mxu0 %vm96_vm0, %v86_v26  ;;  %4416 = vmatmul.msk.f32.gmra.mxu1 %vm96_vm0, %v86_v26 }
  0xdd   :  { %4428 = vmatmul.msk.f32.gmra.mxu2 %vm96_vm0, %v86_v26  ;;  %4436 = vmatmul.msk.f32.gmra.mxu3 %vm96_vm0, %v86_v26 }
  0xe3   :  { %v87_v29 = vpop.trf.xlu0 }
  0xe4   :  { %4409 = vmatmul.msk.f32.gmra.mxu0 %vm96_vm0, %v87_v29  ;;  %4417 = vmatmul.msk.f32.gmra.mxu1 %vm96_vm0, %v87_v29 }
  0xe5   :  { %4429 = vmatmul.msk.f32.gmra.mxu2 %vm96_vm0, %v87_v29  ;;  %4437 = vmatmul.msk.f32.gmra.mxu3 %vm96_vm0, %v87_v29 }
 0x129   :  { %v5104_v34 = vpop.f32.mrf.mxu0  ;;  %v5106_v35 = vpop.f32.mrf.mxu1 }
 0x12a   :  { %6963 = vst [vmem:[#allocation10_spill] sm:$0xff] %v5106_v35 }
 0x130   :  { %v5108_v36 = vpop.f32.mrf.mxu2  ;;  %v5110_v37 = vpop.f32.mrf.mxu3 }
 0x131   :  { %6964 = vst [vmem:[#allocation11_spill] sm:$0xff] %v5108_v36  ;;  %v5112_v38 = vpop.f32.mrf.mxu0  ;;  %v5114_v39 = vpop.f32.mrf.mxu1 }
 0x132   :  { %6965 = vst [vmem:[#allocation12_spill] sm:$0xff] %v5110_v37 }
 0x133   :  { %6966 = vst [vmem:[#allocation13_spill] sm:$0xff] %v5114_v39 }
 0x138   :  { %v5116_v40 = vpop.f32.mrf.mxu2  ;;  %v5118_v41 = vpop.f32.mrf.mxu3 }
 0x139   :  { %6967 = vst [vmem:[#allocation14_spill] sm:$0xff] %v5116_v40  ;;  %v5120_v42 = vpop.f32.mrf.mxu0  ;;  %v5122_v43 = vpop.f32.mrf.mxu1 }
 0x13a   :  { %6968 = vst [vmem:[#allocation15_spill] sm:$0xff] %v5118_v41 }
 0x13b   :  { %6969 = vst [vmem:[#allocation16_spill] sm:$0xff] %v5122_v43 }
 0x140   :  { %v5124_v44 = vpop.f32.mrf.mxu2  ;;  %v5126_v45 = vpop.f32.mrf.mxu3 }
 0x141   :  { %6970 = vst [vmem:[#allocation17_spill] sm:$0xff] %v5124_v44  ;;  %v5128_v46 = vpop.f32.mrf.mxu0  ;;  %v5130_v47 = vpop.f32.mrf.mxu1 }
 0x142   :  { %6971 = vst [vmem:[#allocation18_spill] sm:$0xff] %v5126_v45 }
 0x148   :  { %v5132_v48 = vpop.f32.mrf.mxu2  ;;  %v5134_v49 = vpop.f32.mrf.mxu3 }
 0x149   :  { %6972 = vst [vmem:[#allocation19_spill] sm:$0xff] %v5132_v48  ;;  %v5136_v50 = vpop.f32.mrf.mxu0  ;;  %v5138_v51 = vpop.f32.mrf.mxu1 }
 0x14a   :  { %6973 = vst [vmem:[#allocation20_spill] sm:$0xff] %v5134_v49 }
 0x150   :  { %v5140_v52 = vpop.f32.mrf.mxu2  ;;  %v5142_v53 = vpop.f32.mrf.mxu3 }
 0x151   :  { %6974 = vst [vmem:[#allocation21_spill] sm:$0xff] %v5140_v52  ;;  %v5144_v54 = vpop.f32.mrf.mxu0  ;;  %v5146_v55 = vpop.f32.mrf.mxu1 }
 0x152   :  { %6975 = vst [vmem:[#allocation22_spill] sm:$0xff] %v5142_v53 }
 0x158   :  { %v5148_v56 = vpop.f32.mrf.mxu2  ;;  %v5150_v57 = vpop.f32.mrf.mxu3 }
 0x159   :  { %6976 = vst [vmem:[#allocation23_spill] sm:$0xff] %v5148_v56  ;;  %v5152_v58 = vpop.f32.mrf.mxu0  ;;  %v5154_v59 = vpop.f32.mrf.mxu1 }
 0x15a   :  { %6977 = vst [vmem:[#allocation24_spill] sm:$0xff] %v5150_v57 }
 0x15b   :  { %6978 = vst [vmem:[#allocation25_spill] sm:$0xff] %v5152_v58 }
 0x15c   :  { %6979 = vst [vmem:[#allocation26_spill] sm:$0xff] %v5154_v59 }
 0x160   :  { %v5156_v60 = vpop.f32.mrf.mxu2  ;;  %v5158_v61 = vpop.f32.mrf.mxu3 }
 0x161   :  { %6980 = vst [vmem:[#allocation27_spill] sm:$0xff] %v5156_v60  ;;  %v5160_v62 = vpop.f32.mrf.mxu0  ;;  %v5162_v63 = vpop.f32.mrf.mxu1 }
 0x162   :  { %6981 = vst [vmem:[#allocation28_spill] sm:$0xff] %v5158_v61  ;;  %399 = vmatpush.msrb.mxu0 %v5160_v62  ;;  %419 = vmatpush.msrb.mxu1 %v5162_v63 }
 0x163   :  { %6982 = vst [vmem:[#allocation29_spill] sm:$0xff] %v5160_v62 }
 0x164   :  { %6983 = vst [vmem:[#allocation30_spill] sm:$0xff] %v5162_v63  ;;  %400 = vmatpush.msrb.mxu0 %v5152_v58  ;;  %420 = vmatpush.msrb.mxu1 %v5154_v59 }
 0x166   :  { %401 = vmatpush.msrb.mxu0 %v5144_v54  ;;  %421 = vmatpush.msrb.mxu1 %v5146_v55 }
 0x168   :  { %v5170_v0 = vpop.f32.mrf.mxu2  ;;  %v5172_v1 = vpop.f32.mrf.mxu3  ;;  %402 = vmatpush.msrb.mxu0 %v5136_v50  ;;  %422 = vmatpush.msrb.mxu1 %v5138_v51 }
 0x169   :  { %6984 = vst [vmem:[#allocation31_spill] sm:$0xff] %v5170_v0  ;;  %474 = vmatpush.msrb.mxu2 %v5170_v0  ;;  %494 = vmatpush.msrb.mxu3 %v5172_v1 }
 0x16a   :  { %6985 = vst [vmem:[#allocation32_spill] sm:$0xff] %v5172_v1  ;;  %403 = vmatpush.msrb.mxu0 %v5128_v46  ;;  %423 = vmatpush.msrb.mxu1 %v5130_v47 }
 0x16b   :  { %475 = vmatpush.msrb.mxu2 %v5156_v60  ;;  %495 = vmatpush.msrb.mxu3 %v5158_v61 }
 0x16c   :  { %404 = vmatpush.msrb.mxu0 %v5120_v42  ;;  %424 = vmatpush.msrb.mxu1 %v5122_v43 }
 0x16d   :  { %476 = vmatpush.msrb.mxu2 %v5148_v56  ;;  %496 = vmatpush.msrb.mxu3 %v5150_v57 }
 0x16e   :  { %405 = vmatpush.msrb.mxu0 %v5112_v38  ;;  %425 = vmatpush.msrb.mxu1 %v5114_v39 }
 0x16f   :  { %477 = vmatpush.msrb.mxu2 %v5140_v52  ;;  %497 = vmatpush.msrb.mxu3 %v5142_v53 }
 0x170   :  { %406 = vmatpush.msrb.mxu0 %v5104_v34  ;;  %426 = vmatpush.msrb.mxu1 %v5106_v35 }
 0x171   :  { %478 = vmatpush.msrb.mxu2 %v5132_v48  ;;  %498 = vmatpush.msrb.mxu3 %v5134_v49 }
 0x172   :  { %4438 = vmatmul.msk.f32.vlgmr.msrb.gmra.mxu0 %vm387_vm1, %v371_v2  ;;  %4439 = vmatmul.msk.f32.vlgmr.msrb.gmra.mxu1 %vm387_vm1, %v371_v2 }
 0x173   :  { %591 = vmatpush.msra.mxu0 %v5195_v3  ;;  %479 = vmatpush.msrb.mxu2 %v5124_v44 }
 0x174   :  { %499 = vmatpush.msrb.mxu3 %v5126_v45  ;;  %611 = vmatpush.msra.mxu1 %v5195_v3 }
 0x175   :  { %592 = vmatpush.msra.mxu0 %v5204_v4  ;;  %480 = vmatpush.msrb.mxu2 %v5116_v40 }
 0x176   :  { %500 = vmatpush.msrb.mxu3 %v5118_v41  ;;  %612 = vmatpush.msra.mxu1 %v5204_v4 }
 0x177   :  { %593 = vmatpush.msra.mxu0 %v5212_v5  ;;  %481 = vmatpush.msrb.mxu2 %v5108_v36 }
 0x178   :  { %501 = vmatpush.msrb.mxu3 %v5110_v37  ;;  %4440 = vmatmul.msk.f32.vlgmr.msrb.gmra.mxu2 %vm387_vm1, %v447_v6 }
 0x179   :  { %594 = vmatpush.msra.mxu0 %v5221_v7  ;;  %4441 = vmatmul.msk.f32.vlgmr.msrb.gmra.mxu3 %vm387_vm1, %v447_v6 }
 0x17a   :  { %613 = vmatpush.msra.mxu1 %v5212_v5  ;;  %634 = vmatpush.msra.mxu2 %v5079_v30 }
 0x17b   :  { %595 = vmatpush.msra.mxu0 %v5230_v8  ;;  %657 = vmatpush.msra.mxu3 %v5101_v33 }
 0x17c   :  { %614 = vmatpush.msra.mxu1 %v5221_v7  ;;  %635 = vmatpush.msra.mxu2 %v5063_v27 }
 0x17d   :  { %596 = vmatpush.msra.mxu0 %v5238_v9  ;;  %658 = vmatpush.msra.mxu3 %v5095_v32 }
 0x17e   :  { %615 = vmatpush.msra.mxu1 %v5230_v8  ;;  %636 = vmatpush.msra.mxu2 %v5047_v24  ;;  %v6779_v24 = vmov 3  }
 0x17f   :  { %597 = vmatpush.msra.mxu0 %v5247_v10  ;;  %659 = vmatpush.msra.mxu3 %v5084_v31 }
 0x180   :  { %616 = vmatpush.msra.mxu1 %v5238_v9  ;;  %637 = vmatpush.msra.mxu2 %v5031_v21 }
 0x181   :  { %598 = vmatpush.msra.mxu0 %v5256_v12  ;;  %660 = vmatpush.msra.mxu3 %v5068_v28 }
 0x182   :  { %4442 = vmatmul.msk.f32.vlgmr.msra.gmra.mxu0 %vm387_vm1, %v371_v2  ;;  %617 = vmatpush.msra.mxu1 %v5247_v10 }
 0x183   :  { %638 = vmatpush.msra.mxu2 %v5015_v18  ;;  %661 = vmatpush.msra.mxu3 %v5052_v25 }
 0x184   :  { %618 = vmatpush.msra.mxu1 %v5256_v12 }
 0x185   :  { %4443 = vmatmul.msk.f32.vlgmr.msra.gmra.mxu1 %vm387_vm1, %v447_v6  ;;  %639 = vmatpush.msra.mxu2 %v4999_v15  ;;  %v6781_v15 = vmov 2  }
 0x186   :  { %662 = vmatpush.msra.mxu3 %v5036_v22  ;;  %4607 = vset.pattern.permute.xlu2 %v6781_v15 }
 0x187   :  { %640 = vmatpush.msra.mxu2 %v4989_v13  ;;  %v6783_v13 = vmov 1  }
 0x188   :  { %663 = vmatpush.msra.mxu3 %v5024_v19  ;;  %4606 = vset.pattern.permute.xlu1 %v6783_v13  ;;  %v6785_v19 = vmov 0  }
 0x189   :  { %641 = vmatpush.msra.mxu2 %v4979_v11  ;;  %4605 = vset.pattern.permute.xlu0 %v6785_v19 }
 0x18a   :  { %664 = vmatpush.msra.mxu3 %v5008_v16 }
 0x1ef   :  { %v5278_v14 = vpop.f32.mrf.mxu0  ;;  %v5280_v17 = vpop.f32.mrf.mxu1 }
 0x1f0   :  { %v507_v25 = vsel %vm506_vm2, %v5278_v14, -inf  ;;  %v514_v26 = vsel %vm506_vm2, %v5280_v17, -inf }
 0x1f1   :  { %v508_v27 = vrot.slane %v507_v25, 4  ;;  %v515_v28 = vrot.slane %v514_v26, 4 }
 0x1f3   :  { %v509_v29 = vmax.f32 %v507_v25, %v508_v27  ;;  %v516_v30 = vmax.f32 %v514_v26, %v515_v28 }
 0x1f5   :  { %v510_v31 = vrot.slane %v509_v29, 2  ;;  %v517_v32 = vrot.slane %v516_v30, 2 }
 0x1f7   :  { %v511_v33 = vmax.f32 %v509_v29, %v510_v31  ;;  %v518_v2 = vmax.f32 %v516_v30, %v517_v32 }
 0x1f9   :  { %v512_v6 = vrot.slane %v511_v33, 1 }
 0x1fb   :  { %v5290_v16 = vpop.f32.mrf.mxu2 }
 0x1fc   :  { %v5292_v21 = vpop.f32.mrf.mxu3 }
 0x1ff   :  { %v600_v18 = vpop.f32.mrf.mxu0 }
 0x200   :  { %4444 = vmatmul.msk.f32.vlgmr.msra.gmra.mxu2 %vm387_vm1, %v600_v18 }
 0x202   :  { %v5283_v20 = vpop.f32.mrf.mxu1 }
 0x203   :  { %4445 = vmatmul.msk.f32.vlgmr.msra.gmra.mxu3 %vm387_vm1, %v5283_v20 }
 0x283   :  { %v643_v22 = vpop.f32.mrf.mxu2 }
 0x284   :  { %708 = vperm.xlu2 %4607, %v643_v22   ;;  %688 = vperm.xlu1 %4606, %v643_v22  }
 0x285   :  { %671 = vperm.xlu0 %4605, %v643_v22  }
 0x286   :  { %v666_v23 = vpop.f32.mrf.mxu3 }
 0x28c   :  { %4610 = vset.pattern.permute.xlu2 %v6783_v13  ;;  %4608 = vset.pattern.permute.xlu1 %v6779_v24  ;;  %v528_v13 = vsel %vm506_vm2, %v5292_v21, -inf }
 0x28d   :  { %4612 = vset.pattern.permute.xlu0 %v6779_v24  ;;  %692 = vperm.xlu2 %4610, %v666_v23   ;;  %v513_v24 = vmax.f32 %v511_v33, %v512_v6  ;;  %v529_v26 = vrot.slane %v528_v13, 4 }
 0x28e   :  { %728 = vperm.xlu1 %4608, %v643_v22   ;;  %732 = vperm.xlu0 %4612, %v666_v23   ;;  %v519_v22 = vrot.slane %v518_v2, 1 }
 0x28f   :  { %v535_v11 = vsub.f32 %v5278_v14, %v513_v24 }
 0x291   :  { %v539_v28 = vmul.f32 1.442695, %v535_v11 }
 0x293   :  { %4645 = vpow2.f32 %v539_v28 }
 0x296   :  { %4609 = vset.pattern.permute.xlu1 %v6785_v19 }
 0x297   :  { %676 = vperm.xlu1 %4609, %v666_v23  }
 0x29f   :  { %4611 = vset.pattern.permute.xlu1 %v6781_v15  ;;  %v520_v15 = vmax.f32 %v518_v2, %v519_v22  ;;  %v4646_v2 = vpop.eup %4645 }
 0x2a0   :  { %712 = vperm.xlu1 %4611, %v666_v23   ;;  %v521_v23 = vsel %vm506_vm2, %v5290_v16, -inf  ;;  %v547_v1 = vsel %vm506_vm2, %v4646_v2, 0.0 }
 0x2a1   :  { %v522_v19 = vrot.slane %v521_v23, 4  ;;  %v536_v25 = vsub.f32 %v5280_v17, %v520_v15  ;;  %v548_v61 = vrot.slane %v547_v1, 4 }
 0x2a3   :  { %v523_v27 = vmax.f32 %v521_v23, %v522_v19  ;;  %v541_v29 = vmul.f32 1.442695, %v536_v25  ;;  %v549_v23 = vadd.f32 %v548_v61, %v547_v1 }
 0x2a5   :  { %v524_v30 = vrot.slane %v523_v27, 2  ;;  %4647 = vpow2.f32 %v541_v29  ;;  %v550_v28 = vrot.slane %v549_v23, 2 }
 0x2a7   :  { %v525_v32 = vmax.f32 %v523_v27, %v524_v30  ;;  %v551_v30 = vadd.f32 %v550_v28, %v549_v23 }
 0x2a9   :  { %v526_v22 = vrot.slane %v525_v32, 1 }
 0x2ab   :  { %v4648_v6 = vpop.eup %4647  ;;  %v527_v15 = vmax.f32 %v525_v32, %v526_v22  ;;  %v552_v32 = vrot.slane %v551_v30, 1 }
 0x2ac   :  { %v554_v24 = vsel %vm506_vm2, %v4648_v6, 0.0 }
 0x2ad   :  { %v555_v19 = vrot.slane %v554_v24, 4 }
 0x2af   :  { %v556_v25 = vadd.f32 %v555_v19, %v554_v24 }
 0x2b1   :  { %v557_v29 = vrot.slane %v556_v25, 2 }
 0x2b3   :  { %1023 = vxpose.xlu2.b32.start.end [1/1] (short) (narrow) %v600_v18, 64  ;;  %v530_v18 = vmax.f32 %v528_v13, %v529_v26  ;;  %v537_v13 = vsub.f32 %v5290_v16, %v527_v15 }
 0x2b5   :  { %v531_v31 = vrot.slane %v530_v18, 2  ;;  %v543_v27 = vmul.f32 1.442695, %v537_v13 }
 0x2b7   :  { %v532_v33 = vmax.f32 %v530_v18, %v531_v31  ;;  %4649 = vpow2.f32 %v543_v27  ;;  %v558_v31 = vadd.f32 %v557_v29, %v556_v25 }
 0x2b9   :  { %v533_v0 = vrot.slane %v532_v33, 1  ;;  %v559_v60 = vrot.slane %v558_v31, 1 }
 0x2bb   :  { %v534_v11 = vmax.f32 %v532_v33, %v533_v0  ;;  %v553_v33 = vadd.f32 %v552_v32, %v551_v30  ;;  %v560_v1 = vadd.f32 %v559_v60, %v558_v31 }
 0x2bd   :  { %v538_v26 = vsub.f32 %v5292_v21, %v534_v11  ;;  %v4650_v22 = vpop.eup %4649 }
 0x2be   :  { %v561_v61 = vsel %vm506_vm2, %v4650_v22, 0.0 }
 0x2bf   :  { %v545_v18 = vmul.f32 1.442695, %v538_v26  ;;  %v562_v24 = vrot.slane %v561_v61, 4 }
 0x2c1   :  { %4651 = vpow2.f32 %v545_v18  ;;  %v563_v19 = vadd.f32 %v562_v24, %v561_v61 }
 0x2c2   :  { %4653 = vrcp.f32 %v553_v33 }
 0x2c3   :  { %4655 = vrcp.f32 %v560_v1  ;;  %v564_v25 = vrot.slane %v563_v19, 2 }
 0x2c5   :  { %v565_v29 = vadd.f32 %v564_v25, %v563_v19 }
 0x2c7   :  { %v4652_v0 = vpop.eup %4651  ;;  %v566_v63 = vrot.slane %v565_v29, 1 }
 0x2c8   :  { %v4654_v13 = vpop.eup %4653 }
 0x2c9   :  { %v4656_v23 = vpop.eup %4655  ;;  %v579_v27 = vmul.f32 %v4654_v13, %v4646_v2  ;;  %v567_v24 = vadd.f32 %v566_v63, %v565_v29 }
 0x2ca   :  { %v580_v28 = vmul.f32 %v4656_v23, %v4648_v6 }
 0x2cb   :  { %v695_v57 = vperm.slane %v579_v27, 1  ;;  %v679_v56 = vperm.slane %v579_v27, 0  ;;  %v715_v52 = vperm.slane %v579_v27, 2  ;;  %v735_v25 = vperm.slane %v579_v27, 3 }
 0x2cc   :  { %v696_v32 = vperm.slane %v580_v28, 1  ;;  %v680_v60 = vperm.slane %v580_v28, 0  ;;  %v716_v53 = vperm.slane %v580_v28, 2  ;;  %v736_v23 = vperm.slane %v580_v28, 3 }
 0x2cd   :  { %4657 = vrcp.f32 %v567_v24 }
 0x2d5   :  { %1124 = vxpose.xlu1.b32.start.end [1/1] (short) (narrow) %v5283_v20, 64  ;;  %v568_v20 = vsel %vm506_vm2, %v4652_v0, 0.0 }
 0x2d6   :  { %v569_v15 = vrot.slane %v568_v20, 4 }
 0x2d8   :  { %v570_v11 = vadd.f32 %v569_v15, %v568_v20 }
 0x2da   :  { %v571_v26 = vrot.slane %v570_v11, 2 }
 0x2dc   :  { %v572_v18 = vadd.f32 %v571_v26, %v570_v11 }
 0x2de   :  { %v573_v20 = vrot.slane %v572_v18, 1  ;;  %v709_v15 = vpop.permute.xlu2 %708 }
 0x2df   :  { %v719_v11 = vmul.f32 %v715_v52, %v709_v15  ;;  %v720_v13 = vmul.f32 %v716_v53, %v709_v15 }
 0x2e0   :  { %v574_v19 = vadd.f32 %v573_v20, %v572_v18 }
 0x2e2   :  { %4659 = vrcp.f32 %v574_v19 }
 0x2f6   :  { %v689_v30 = vpop.permute.xlu1 %688 }
 0x2f7   :  { %v672_v31 = vpop.permute.xlu0 %671  ;;  %v699_v33 = vmul.f32 %v695_v57, %v689_v30  ;;  %v700_v1 = vmul.f32 %v696_v32, %v689_v30 }
 0x2f8   :  { %v683_v62 = vmul.f32 %v679_v56, %v672_v31  ;;  %v684_v61 = vmul.f32 %v680_v60, %v672_v31  ;;  %v4658_v60 = vpop.eup %4657  ;;  %v747_v31 = vmul.f32 %v579_v27, %v5278_v14 }
 0x2f9   :  { %v581_v52 = vmul.f32 %v4658_v60, %v4650_v22 }
 0x2fa   :  { %v703_v2 = vadd.f32 %v699_v33, %v683_v62  ;;  %v704_v6 = vadd.f32 %v700_v1, %v684_v61  ;;  %v4660_v62 = vpop.eup %4659  ;;  %v748_v1 = vmul.f32 %v580_v28, %v5280_v17 }
 0x2fb   :  { %v582_v53 = vmul.f32 %v4660_v62, %v4652_v0  ;;  %v681_v61 = vperm.slane %v581_v52, 0  ;;  %v697_v15 = vperm.slane %v581_v52, 1  ;;  %v717_v14 = vperm.slane %v581_v52, 2 }
 0x2fc   :  { %v723_v59 = vadd.f32 %v719_v11, %v703_v2  ;;  %v724_v58 = vadd.f32 %v720_v13, %v704_v6  ;;  %v737_v27 = vperm.slane %v581_v52, 3 }
 0x2fd   :  { %v682_v20 = vperm.slane %v582_v53, 0  ;;  %v698_v2 = vperm.slane %v582_v53, 1  ;;  %v718_v17 = vperm.slane %v582_v53, 2  ;;  %v738_v28 = vperm.slane %v582_v53, 3 }
 0x300   :  { %v729_v26 = vpop.permute.xlu1 %728  ;;  %v733_v13 = vpop.permute.xlu0 %732 }
 0x301   :  { %v739_v57 = vmul.f32 %v735_v25, %v729_v26  ;;  %v740_v30 = vmul.f32 %v736_v23, %v729_v26 }
 0x303   :  { %v743_v56 = vadd.f32 %v739_v57, %v723_v59  ;;  %v744_v32 = vadd.f32 %v740_v30, %v724_v58  ;;  %v693_v59 = vpop.permute.xlu2 %692 }
 0x304   :  { %v701_v22 = vmul.f32 %v697_v15, %v693_v59  ;;  %v702_v0 = vmul.f32 %v698_v2, %v693_v59  ;;  %v7002_v59 = vld [vmem:[#allocation32_spill] sm:$0xff] }
 0x305   :  { %v751_v63 = vadd.f32 1e-06, %v743_v56  ;;  %v752_v29 = vadd.f32 1e-06, %v744_v32  ;;  %v741_v56 = vmul.f32 %v737_v27, %v733_v13  ;;  %v742_v32 = vmul.f32 %v738_v28, %v733_v13 }
 0x307   :  { %4661 = vrcp.f32 %v751_v63 }
 0x308   :  { %4663 = vrcp.f32 %v752_v29 }
 0x309   :  { %v677_v18 = vpop.permute.xlu1 %676 }
 0x30a   :  { %v685_v19 = vmul.f32 %v681_v61, %v677_v18  ;;  %v686_v11 = vmul.f32 %v682_v20, %v677_v18  ;;  %v750_v61 = vmul.f32 %v582_v53, %v5292_v21  ;;  %v6999_v21 = vld [vmem:[#allocation27_spill] sm:$0xff] }
 0x30b   :  { %v7001_v53 = vld [vmem:[#allocation31_spill] sm:$0xff] }
 0x30c   :  { %v705_v25 = vadd.f32 %v701_v22, %v685_v19  ;;  %v706_v26 = vadd.f32 %v702_v0, %v686_v11 }
 0x30d   :  { %v4662_v33 = vpop.eup %4661 }
 0x30e   :  { %v4664_v24 = vpop.eup %4663  ;;  %v5318_v58 = vmul.f32 %v4662_v33, %v747_v31  ;;  %v749_v33 = vmul.f32 %v581_v52, %v5290_v16  ;;  %v6990_v16 = vmov 0   ;;  %v7000_v52 = vld [vmem:[#allocation28_spill] sm:$0xff] }
 0x30f   :  { %v5320_v6 = vmul.f32 %v4664_v24, %v748_v1 }
 0x310   :  { %6986 = vst [vmem:[#allocation33_spill] sm:$0xff] %v5318_v58  ;;  %778 = vmatpush.xpose.msrb.mxu0 %v5318_v58 }
 0x311   :  { %6987 = vst [vmem:[#allocation34_spill] sm:$0xff] %v5320_v6  ;;  %819 = vmatpush.xpose.msrb.mxu1 %v5320_v6 }
 0x312   :  { %v713_v23 = vpop.permute.xlu1 %712 }
 0x313   :  { %v721_v57 = vmul.f32 %v717_v14, %v713_v23  ;;  %v722_v30 = vmul.f32 %v718_v17, %v713_v23  ;;  %779 = vmatmul.f32.vlgmr.msrb.gmra.mxu0 %v5104_v34 }
 0x314   :  { %942 = vmatpush.xpose.msra.mxu0 %v5318_v58  ;;  %820 = vmatmul.f32.vlgmr.msrb.gmra.mxu1 %v5106_v35 }
 0x315   :  { %962 = vmatpush.xpose.msra.mxu1 %v5320_v6  ;;  %v725_v63 = vadd.f32 %v721_v57, %v705_v25  ;;  %v726_v29 = vadd.f32 %v722_v30, %v706_v26 }
 0x317   :  { %v745_v60 = vadd.f32 %v741_v56, %v725_v63  ;;  %v746_v62 = vadd.f32 %v742_v32, %v726_v29 }
 0x319   :  { %v753_v18 = vadd.f32 1e-06, %v745_v60  ;;  %v754_v31 = vadd.f32 1e-06, %v746_v62 }
 0x31b   :  { %4665 = vrcp.f32 %v753_v18  ;;  %782 = vmatmul.f32.gmra.mxu0 %v5112_v38 }
 0x31c   :  { %4667 = vrcp.f32 %v754_v31  ;;  %823 = vmatmul.f32.gmra.mxu1 %v5114_v39 }
 0x321   :  { %v4666_v1 = vpop.eup %4665 }
 0x322   :  { %v4668_v20 = vpop.eup %4667  ;;  %v5332_v24 = vmul.f32 %v4666_v1, %v749_v33 }
 0x323   :  { %v5334_v15 = vmul.f32 %v4668_v20, %v750_v61  ;;  %785 = vmatmul.f32.gmra.mxu0 %v5120_v42 }
 0x324   :  { %6988 = vst [vmem:[#allocation35_spill] sm:$0xff] %v5332_v24  ;;  %826 = vmatmul.f32.gmra.mxu1 %v5122_v43  ;;  %860 = vmatpush.xpose.msrb.mxu2 %v5332_v24 }
 0x325   :  { %6989 = vst [vmem:[#allocation36_spill] sm:$0xff] %v5334_v15  ;;  %901 = vmatpush.xpose.msrb.mxu3 %v5334_v15 }
 0x327   :  { %861 = vmatmul.f32.vlgmr.msrb.gmra.mxu2 %v5108_v36 }
 0x328   :  { %982 = vmatpush.xpose.msra.mxu2 %v5332_v24  ;;  %902 = vmatmul.f32.vlgmr.msrb.gmra.mxu3 %v5110_v37 }
 0x329   :  { %1002 = vmatpush.xpose.msra.mxu3 %v5334_v15  ;;  %4613 = vset.pattern.permute.xlu1 %v6990_v16 }
 0x32b   :  { %788 = vmatmul.f32.gmra.mxu0 %v5128_v46 }
 0x32c   :  { %1299 = vmatpush.msrb.mxu2 %v5195_v3  ;;  %829 = vmatmul.f32.gmra.mxu1 %v5130_v47 }
 0x32d   :  { %1354 = vmatpush.msrb.mxu3 %v5195_v3  ;;  %v6991_v3 = vld [vmem:[#allocation25_spill] sm:$0xff] }
 0x32e   :  { %1300 = vmatpush.msrb.mxu2 %v5204_v4 }
 0x32f   :  { %1355 = vmatpush.msrb.mxu3 %v5204_v4  ;;  %864 = vmatmul.f32.gmra.mxu2 %v5116_v40  ;;  %v6992_v4 = vld [vmem:[#allocation26_spill] sm:$0xff] }
 0x330   :  { %1301 = vmatpush.msrb.mxu2 %v5212_v5  ;;  %905 = vmatmul.f32.gmra.mxu3 %v5118_v41 }
 0x331   :  { %1356 = vmatpush.msrb.mxu3 %v5212_v5  ;;  %v6993_v5 = vld [vmem:[#allocation21_spill] sm:$0xff] }
 0x332   :  { %1302 = vmatpush.msrb.mxu2 %v5221_v7 }
 0x333   :  { %1357 = vmatpush.msrb.mxu3 %v5221_v7  ;;  %791 = vmatmul.f32.gmra.mxu0 %v5136_v50  ;;  %v6994_v7 = vld [vmem:[#allocation22_spill] sm:$0xff] }
 0x334   :  { %1303 = vmatpush.msrb.mxu2 %v5230_v8  ;;  %832 = vmatmul.f32.gmra.mxu1 %v5138_v51 }
 0x335   :  { %1358 = vmatpush.msrb.mxu3 %v5230_v8  ;;  %v6995_v8 = vld [vmem:[#allocation29_spill] sm:$0xff] }
 0x336   :  { %1304 = vmatpush.msrb.mxu2 %v5238_v9 }
 0x337   :  { %1359 = vmatpush.msrb.mxu3 %v5238_v9  ;;  %867 = vmatmul.f32.gmra.mxu2 %v5124_v44  ;;  %v6996_v9 = vld [vmem:[#allocation30_spill] sm:$0xff] }
 0x338   :  { %1305 = vmatpush.msrb.mxu2 %v5247_v10  ;;  %908 = vmatmul.f32.gmra.mxu3 %v5126_v45 }
 0x339   :  { %1360 = vmatpush.msrb.mxu3 %v5247_v10  ;;  %v6997_v10 = vld [vmem:[#allocation23_spill] sm:$0xff] }
 0x33a   :  { %1306 = vmatpush.msrb.mxu2 %v5256_v12 }
 0x33b   :  { %1361 = vmatpush.msrb.mxu3 %v5256_v12  ;;  %794 = vmatmul.f32.gmra.mxu0 %v5144_v54  ;;  %v6998_v12 = vld [vmem:[#allocation24_spill] sm:$0xff] }
 0x33c   :  { %835 = vmatmul.f32.gmra.mxu1 %v5146_v55 }
 0x33f   :  { %870 = vmatmul.f32.gmra.mxu2 %v5132_v48 }
 0x340   :  { %911 = vmatmul.f32.gmra.mxu3 %v5134_v49 }
 0x343   :  { %797 = vmatmul.f32.gmra.mxu0 %v6991_v3 }
 0x344   :  { %838 = vmatmul.f32.gmra.mxu1 %v6992_v4 }
 0x347   :  { %873 = vmatmul.f32.gmra.mxu2 %v6993_v5 }
 0x348   :  { %914 = vmatmul.f32.gmra.mxu3 %v6994_v7 }
 0x34b   :  { %800 = vmatmul.f32.gmra.mxu0 %v6995_v8 }
 0x34c   :  { %841 = vmatmul.f32.gmra.mxu1 %v6996_v9  ;;  %v1039_v31 = vpop.trf.xlu2 }
 0x34f   :  { %876 = vmatmul.f32.gmra.mxu2 %v6997_v10 }
 0x350   :  { %917 = vmatmul.f32.gmra.mxu3 %v6998_v12 }
 0x353   :  { %943 = vmatmul.f32.vlgmr.msra.gmra.mxu0 %v5318_v58 }
 0x354   :  { %963 = vmatmul.f32.vlgmr.msra.gmra.mxu1 %v5320_v6 }
 0x357   :  { %879 = vmatmul.f32.gmra.mxu2 %v6999_v21 }
 0x358   :  { %920 = vmatmul.f32.gmra.mxu3 %v7000_v52 }
 0x35f   :  { %882 = vmatmul.f32.gmra.mxu2 %v7001_v53 }
 0x360   :  { %923 = vmatmul.f32.gmra.mxu3 %v7002_v59 }
 0x367   :  { %983 = vmatmul.f32.vlgmr.msra.gmra.mxu2 %v5332_v24 }
 0x368   :  { %1003 = vmatmul.f32.vlgmr.msra.gmra.mxu3 %v5334_v15  ;;  %v1040_v15 = vpop.trf.xlu2 }
 0x370   :  { %v1041_v41 = vpop.trf.xlu2 }
 0x379   :  { %v1140_v7 = vpop.trf.xlu1 }
 0x381   :  { %v1141_v52 = vpop.trf.xlu1 }
 0x390   :  { %v5389_v2 = vpop.f32.mrf.mxu0 }
 0x391   :  { %v5391_v19 = vpop.f32.mrf.mxu1 }
 0x398   :  { %v5393_v11 = vpop.f32.mrf.mxu0 }
 0x399   :  { %v5395_v22 = vpop.f32.mrf.mxu1 }
 0x3a0   :  { %v5397_v0 = vpop.f32.mrf.mxu0 }
 0x3a1   :  { %v5399_v14 = vpop.f32.mrf.mxu1 }
 0x3a8   :  { %v5401_v17 = vpop.f32.mrf.mxu0 }
 0x3a9   :  { %v5403_v27 = vpop.f32.mrf.mxu1 }
 0x3aa   :  { %v5405_v28 = vpop.f32.mrf.mxu2 }
 0x3ab   :  { %v5407_v13 = vpop.f32.mrf.mxu3 }
 0x3b0   :  { %v5409_v23 = vpop.f32.mrf.mxu0 }
 0x3b1   :  { %v5411_v25 = vpop.f32.mrf.mxu1 }
 0x3b2   :  { %v5413_v26 = vpop.f32.mrf.mxu2 }
 0x3b3   :  { %v5415_v57 = vpop.f32.mrf.mxu3 }
 0x3b8   :  { %v5417_v30 = vpop.f32.mrf.mxu0 }
 0x3b9   :  { %v5419_v56 = vpop.f32.mrf.mxu1 }
 0x3ba   :  { %v5421_v32 = vpop.f32.mrf.mxu2 }
 0x3bb   :  { %v5423_v63 = vpop.f32.mrf.mxu3 }
 0x3c0   :  { %v5425_v29 = vpop.f32.mrf.mxu0 }
 0x3c1   :  { %v5427_v60 = vpop.f32.mrf.mxu1 }
 0x3c2   :  { %v5429_v62 = vpop.f32.mrf.mxu2 }
 0x3c3   :  { %v5431_v18 = vpop.f32.mrf.mxu3 }
 0x3c8   :  { %v5433_v33 = vpop.f32.mrf.mxu0 }
 0x3c9   :  { %v5435_v1 = vpop.f32.mrf.mxu1 }
 0x3ca   :  { %v5437_v61 = vpop.f32.mrf.mxu2 }
 0x3cb   :  { %v5439_v20 = vpop.f32.mrf.mxu3 }
 0x3d0   :  { %v944_v24 = vpop.f32.mrf.mxu0 }
 0x3d1   :  { %v964_v6 = vpop.f32.mrf.mxu1 }
 0x3d2   :  { %v965_v58 = vadd.f32 %v964_v6, %v944_v24  ;;  %v5441_v16 = vpop.f32.mrf.mxu2  ;;  %v1042_v6 = vpop.trf.xlu2 }
 0x3d3   :  { %v5443_v37 = vpop.f32.mrf.mxu3 }
 0x3d4   :  { %4446 = vmatpush.msk.msrb.mxu0 %vm506_vm2, %v965_v58 }
 0x3d5   :  { %4447 = vmatmul.msk.f32.vlgmr.msrb.gmra.mxu0 %vm1055_vm3, %v1039_v31 }
 0x3da   :  { %v5447_v45 = vpop.f32.mrf.mxu2  ;;  %v1043_v31 = vpop.trf.xlu2 }
 0x3db   :  { %v5449_v49 = vpop.f32.mrf.mxu3 }
 0x3dd   :  { %4448 = vmatmul.msk.f32.gmra.mxu0 %vm1055_vm3, %v1040_v15  ;;  %v1142_v15 = vpop.trf.xlu1 }
 0x3e2   :  { %v5452_v12 = vpop.f32.mrf.mxu2  ;;  %v1044_v40 = vpop.trf.xlu2 }
 0x3e3   :  { %v5454_v24 = vpop.f32.mrf.mxu3 }
 0x3e5   :  { %4449 = vmatmul.msk.f32.gmra.mxu0 %vm1055_vm3, %v1041_v41  ;;  %v1143_v44 = vpop.trf.xlu1 }
 0x3ea   :  { %v984_v59 = vpop.f32.mrf.mxu2  ;;  %v1045_v41 = vpop.trf.xlu2 }
 0x3eb   :  { %v1004_v58 = vpop.f32.mrf.mxu3 }
 0x3ec   :  { %v1005_v36 = vadd.f32 %v1004_v58, %v984_v59 }
 0x3ed   :  { %4450 = vmatmul.msk.f32.gmra.mxu0 %vm1055_vm3, %v1042_v6  ;;  %v1144_v59 = vpop.trf.xlu1 }
 0x3ee   :  { %4455 = vmatpush.msk.msrb.mxu1 %vm506_vm2, %v1005_v36 }
 0x3ef   :  { %4456 = vmatmul.msk.f32.vlgmr.msrb.gmra.mxu1 %vm1055_vm3, %v1140_v7 }
 0x3f2   :  { %v1046_v36 = vpop.trf.xlu2 }
 0x3f5   :  { %4451 = vmatmul.msk.f32.gmra.mxu0 %vm1055_vm3, %v1043_v31  ;;  %v1145_v7 = vpop.trf.xlu1  ;;  %v7003_v31 = vld [vmem:[#allocation9_spill] sm:$0xff] }
 0x3f7   :  { %4457 = vmatmul.msk.f32.gmra.mxu1 %vm1055_vm3, %v1141_v52 }
 0x3fd   :  { %4452 = vmatmul.msk.f32.gmra.mxu0 %vm1055_vm3, %v1044_v40  ;;  %v1146_v52 = vpop.trf.xlu1 }
 0x3ff   :  { %4458 = vmatmul.msk.f32.gmra.mxu1 %vm1055_vm3, %v1142_v15 }
 0x405   :  { %4453 = vmatmul.msk.f32.gmra.mxu0 %vm1055_vm3, %v1045_v41  ;;  %v1147_v40 = vpop.trf.xlu1 }
 0x407   :  { %4459 = vmatmul.msk.f32.gmra.mxu1 %vm1055_vm3, %v1143_v44  ;;  %v822_v44 = vadd.f32 %v5391_v19, %v5389_v2 }
 0x409   :  { %v1007_v15 = vmul.f32 %v822_v44, %v7003_v31  ;;  %v828_v44 = vadd.f32 %v5399_v14, %v5397_v0  ;;  %v904_v0 = vadd.f32 %v5407_v13, %v5405_v28  ;;  %v4831_v14 = vld [vmem:[%s6777_s3 + $0x18] sm:$0xff]  ;;  %v834_v28 = vadd.f32 %v5411_v25, %v5409_v23  ;;  %v4834_v23 = vld [vmem:[%s6777_s3 + $0x48] sm:$0xff] }
 0x40d   :  { %4454 = vmatmul.msk.f32.gmra.mxu0 %vm1055_vm3, %v1046_v36 }
 0x40f   :  { %4460 = vmatmul.msk.f32.gmra.mxu1 %vm1055_vm3, %v1144_v59 }
 0x417   :  { %4461 = vmatmul.msk.f32.gmra.mxu1 %vm1055_vm3, %v1145_v7  ;;  %v825_v7 = vadd.f32 %v5395_v22, %v5393_v11  ;;  %v4830_v11 = vld [vmem:[%s6777_s3 + $0x10] sm:$0xff] }
 0x418   :  { %v1009_v22 = vmul.f32 %v4830_v11, %v828_v44  ;;  %v4832_v44 = vld [vmem:[%s6777_s3 + $0x40] sm:$0xff] }
 0x419   :  { %v1015_v11 = vmul.f32 %v4832_v44, %v904_v0  ;;  %v4835_v44 = vld [vmem:[%s6777_s3 + $0x28] sm:$0xff] }
 0x41f   :  { %4462 = vmatmul.msk.f32.gmra.mxu1 %vm1055_vm3, %v1146_v52  ;;  %v4829_v52 = vld [vmem:[%s6777_s3 + $0x8] sm:$0xff] }
 0x427   :  { %4463 = vmatmul.msk.f32.gmra.mxu1 %vm1055_vm3, %v1147_v40  ;;  %v1008_v40 = vmul.f32 %v4829_v52, %v825_v7  ;;  %v831_v52 = vadd.f32 %v5403_v27, %v5401_v17 }
 0x452   :  { %v1100_v6 = vpop.f32.mrf.mxu0 }
 0x453   :  { %v1101_v58 = vadd.f32 1e-06, %v1100_v6 }
 0x455   :  { %4669 = vrcp.f32 %v1101_v58 }
 0x45a   :  { %v1103_v41 = vpop.f32.mrf.mxu0 }
 0x45b   :  { %v4670_v36 = vpop.eup %4669  ;;  %v1104_v59 = vadd.f32 1e-06, %v1103_v41 }
 0x45c   :  { %v5474_v48 = vmul.f32 %v4670_v36, %v1007_v15 }
 0x45d   :  { %4671 = vrcp.f32 %v1104_v59 }
 0x45e   :  { %1256 = vxpose.xlu0.b32.start [1/8] (short) (narrow) %v5474_v48, 8 }
 0x462   :  { %v1106_v6 = vpop.f32.mrf.mxu0 }
 0x463   :  { %v4672_v2 = vpop.eup %4671  ;;  %v1107_v19 = vadd.f32 1e-06, %v1106_v6 }
 0x464   :  { %v5482_v58 = vmul.f32 %v4672_v2, %v1008_v40  ;;  %v1010_v40 = vmul.f32 %v4831_v14, %v831_v52 }
 0x465   :  { %4673 = vrcp.f32 %v1107_v19 }
 0x466   :  { %1257 = vxpose.xlu0.b32.cont [2/8] (short) (narrow) %v5482_v58, 8 }
 0x46a   :  { %v1109_v31 = vpop.f32.mrf.mxu0 }
 0x46b   :  { %v4674_v15 = vpop.eup %4673  ;;  %v1110_v41 = vadd.f32 1e-06, %v1109_v31 }
 0x46c   :  { %v5490_v36 = vmul.f32 %v4674_v15, %v1009_v22  ;;  %v1200_v59 = vpop.f32.mrf.mxu1  ;;  %v907_v15 = vadd.f32 %v5415_v57, %v5413_v26  ;;  %v837_v57 = vadd.f32 %v5419_v56, %v5417_v30  ;;  %v4836_v30 = vld [vmem:[%s6777_s3 + $0x50] sm:$0xff] }
 0x46d   :  { %4675 = vrcp.f32 %v1110_v41  ;;  %v1201_v7 = vadd.f32 1e-06, %v1200_v59  ;;  %v4833_v41 = vld [vmem:[%s6777_s3 + $0x20] sm:$0xff] }
 0x46e   :  { %1258 = vxpose.xlu0.b32.cont [3/8] (short) (narrow) %v5490_v36, 8  ;;  %v1011_v59 = vmul.f32 %v4833_v41, %v834_v28  ;;  %v1016_v25 = vmul.f32 %v4834_v23, %v907_v15 }
 0x46f   :  { %4677 = vrcp.f32 %v1201_v7 }
 0x472   :  { %v1112_v6 = vpop.f32.mrf.mxu0 }
 0x473   :  { %v4676_v2 = vpop.eup %4675  ;;  %v1113_v19 = vadd.f32 1e-06, %v1112_v6 }
 0x474   :  { %v5503_v17 = vmul.f32 %v4676_v2, %v1010_v40  ;;  %v1203_v27 = vpop.f32.mrf.mxu1 }
 0x475   :  { %v4678_v22 = vpop.eup %4677  ;;  %4679 = vrcp.f32 %v1113_v19  ;;  %v1204_v31 = vadd.f32 1e-06, %v1203_v27  ;;  %v910_v19 = vadd.f32 %v5423_v63, %v5421_v32  ;;  %v840_v63 = vadd.f32 %v5427_v60, %v5425_v29  ;;  %v4838_v29 = vld [vmem:[%s6777_s3 + $0x58] sm:$0xff] }
 0x476   :  { %1259 = vxpose.xlu0.b32.cont [4/8] (short) (narrow) %v5503_v17, 8  ;;  %v5508_v13 = vmul.f32 %v4678_v22, %v1015_v11  ;;  %v1012_v11 = vmul.f32 %v4835_v44, %v837_v57  ;;  %v916_v44 = vadd.f32 %v5439_v20, %v5437_v61  ;;  %v919_v20 = vadd.f32 %v5443_v37, %v5441_v16  ;;  %v4842_v16 = vld [vmem:[%s6777_s3 + $0x70] sm:$0xff] }
 0x477   :  { %4681 = vrcp.f32 %v1204_v31  ;;  %v1017_v56 = vmul.f32 %v4836_v30, %v910_v19  ;;  %v922_v37 = vadd.f32 %v5449_v49, %v5447_v45  ;;  %v925_v45 = vadd.f32 %v5454_v24, %v5452_v12  ;;  %v4843_v49 = vld [vmem:[%s6777_s3 + $0x78] sm:$0xff] }
 0x478   :  { %1311 = vxpose.xlu2.b32.start [1/8] (short) (narrow) %v5508_v13, 8  ;;  %v7015_v12 = vmov 1  }
 0x47a   :  { %v1115_v7 = vpop.f32.mrf.mxu0 }
 0x47b   :  { %v4680_v52 = vpop.eup %4679  ;;  %v1116_v0 = vadd.f32 1e-06, %v1115_v7  ;;  %v913_v7 = vadd.f32 %v5431_v18, %v5429_v62  ;;  %v843_v18 = vadd.f32 %v5435_v1, %v5433_v33  ;;  %v4840_v33 = vld [vmem:[%s6777_s3 + $0x60] sm:$0xff] }
 0x47c   :  { %v5519_v14 = vmul.f32 %v4680_v52, %v1011_v59  ;;  %v1206_v40 = vpop.f32.mrf.mxu1  ;;  %v4837_v52 = vld [vmem:[%s6777_s3 + $0x30] sm:$0xff]  ;;  %v1019_v1 = vmul.f32 %v4840_v33, %v916_v44  ;;  %v7016_v44 = vmov 2   ;;  %v7019_v33 = vld [vmem:[#allocation14_spill] sm:$0xff] }
 0x47d   :  { %v4682_v6 = vpop.eup %4681  ;;  %4683 = vrcp.f32 %v1116_v0  ;;  %v1207_v26 = vadd.f32 1e-06, %v1206_v40  ;;  %v1013_v0 = vmul.f32 %v4837_v52, %v840_v63  ;;  %v1018_v60 = vmul.f32 %v4838_v29, %v913_v7 }
 0x47e   :  { %7004 = vst [vmem:[#allocation25_spill] sm:$0xff] %v5519_v14  ;;  %1260 = vxpose.xlu0.b32.cont [5/8] (short) (narrow) %v5519_v14, 8  ;;  %v5524_v2 = vmul.f32 %v4682_v6, %v1016_v25 }
 0x47f   :  { %4685 = vrcp.f32 %v1207_v26 }
 0x480   :  { %7005 = vst [vmem:[#allocation26_spill] sm:$0xff] %v5524_v2  ;;  %1312 = vxpose.xlu2.b32.cont [2/8] (short) (narrow) %v5524_v2, 8 }
 0x482   :  { %v1118_v27 = vpop.f32.mrf.mxu0 }
 0x483   :  { %v4684_v22 = vpop.eup %4683  ;;  %v1119_v31 = vadd.f32 1e-06, %v1118_v27 }
 0x484   :  { %v5535_v28 = vmul.f32 %v4684_v22, %v1012_v11  ;;  %v1209_v15 = vpop.f32.mrf.mxu1  ;;  %v4839_v11 = vld [vmem:[%s6777_s3 + $0x38] sm:$0xff] }
 0x485   :  { %v4686_v41 = vpop.eup %4685  ;;  %4687 = vrcp.f32 %v1119_v31  ;;  %v1210_v32 = vadd.f32 1e-06, %v1209_v15  ;;  %v1014_v27 = vmul.f32 %v4839_v11, %v843_v18 }
 0x486   :  { %7006 = vst [vmem:[#allocation29_spill] sm:$0xff] %v5535_v28  ;;  %1261 = vxpose.xlu0.b32.cont [6/8] (short) (narrow) %v5535_v28, 8  ;;  %v5540_v59 = vmul.f32 %v4686_v41, %v1017_v56  ;;  %v4841_v41 = vld [vmem:[%s6777_s3 + $0x68] sm:$0xff] }
 0x487   :  { %4689 = vrcp.f32 %v1210_v32  ;;  %v1020_v32 = vmul.f32 %v4841_v41, %v919_v20  ;;  %v7023_v20 = vld [vmem:[#allocation24_spill] sm:$0xff]  ;;  %v7024_v41 = vld [vmem:[#allocation22_spill] sm:$0xff] }
 0x488   :  { %7007 = vst [vmem:[#allocation30_spill] sm:$0xff] %v5540_v59  ;;  %1313 = vxpose.xlu2.b32.cont [3/8] (short) (narrow) %v5540_v59, 8 }
 0x48a   :  { %v1121_v23 = vpop.f32.mrf.mxu0 }
 0x48b   :  { %v4688_v25 = vpop.eup %4687  ;;  %v1122_v40 = vadd.f32 1e-06, %v1121_v23  ;;  %v1021_v23 = vmul.f32 %v4842_v16, %v922_v37  ;;  %v7029_v16 = vmov 3  }
 0x48c   :  { %v5551_v6 = vmul.f32 %v4688_v25, %v1013_v0  ;;  %v1212_v26 = vpop.f32.mrf.mxu1 }
 0x48d   :  { %v4690_v57 = vpop.eup %4689  ;;  %4691 = vrcp.f32 %v1122_v40  ;;  %v1213_v62 = vadd.f32 1e-06, %v1212_v26  ;;  %v1022_v26 = vmul.f32 %v4843_v49, %v925_v45  ;;  %v7032_v49 = vld [vmem:[#allocation34_spill] sm:$0xff] }
 0x48e   :  { %7008 = vst [vmem:[#allocation9_spill] sm:$0xff] %v5551_v6  ;;  %1262 = vxpose.xlu0.b32.cont [7/8] (short) (narrow) %v5551_v6, 8  ;;  %v5556_v19 = vmul.f32 %v4690_v57, %v1018_v60 }
 0x48f   :  { %4693 = vrcp.f32 %v1213_v62 }
 0x490   :  { %7009 = vst [vmem:[#allocation37_spill] sm:$0xff] %v5556_v19  ;;  %1314 = vxpose.xlu2.b32.cont [4/8] (short) (narrow) %v5556_v19, 8 }
 0x493   :  { %v4692_v22 = vpop.eup %4691 }
 0x494   :  { %v5567_v31 = vmul.f32 %v4692_v22, %v1014_v27  ;;  %v1215_v30 = vpop.f32.mrf.mxu1  ;;  %v7017_v27 = vld [vmem:[#allocation19_spill] sm:$0xff]  ;;  %v7018_v22 = vld [vmem:[#allocation17_spill] sm:$0xff] }
 0x495   :  { %v4694_v56 = vpop.eup %4693  ;;  %v1216_v15 = vadd.f32 1e-06, %v1215_v30  ;;  %v7020_v30 = vld [vmem:[#allocation11_spill] sm:$0xff] }
 0x496   :  { %7010 = vst [vmem:[#allocation38_spill] sm:$0xff] %v5567_v31  ;;  %1263 = vxpose.xlu0.b32.end [8/8] (short) (narrow) %v5567_v31, 8  ;;  %1377 = vmatpush.msra.mxu2 %v5567_v31  ;;  %v5571_v61 = vmul.f32 %v4694_v56, %v1019_v1  ;;  %v7021_v56 = vld [vmem:[#allocation32_spill] sm:$0xff] }
 0x497   :  { %4695 = vrcp.f32 %v1216_v15  ;;  %v7022_v15 = vld [vmem:[#allocation28_spill] sm:$0xff] }
 0x498   :  { %7011 = vst [vmem:[#allocation39_spill] sm:$0xff] %v5571_v61  ;;  %1315 = vxpose.xlu2.b32.cont [5/8] (short) (narrow) %v5571_v61, 8  ;;  %1378 = vmatpush.msra.mxu2 %v5551_v6 }
 0x49a   :  { %1379 = vmatpush.msra.mxu2 %v5535_v28 }
 0x49c   :  { %v1218_v63 = vpop.f32.mrf.mxu1  ;;  %1380 = vmatpush.msra.mxu2 %v5519_v14 }
 0x49d   :  { %v4696_v7 = vpop.eup %4695  ;;  %v1219_v52 = vadd.f32 1e-06, %v1218_v63  ;;  %v7026_v63 = vld [vmem:[#allocation18_spill] sm:$0xff] }
 0x49e   :  { %1381 = vmatpush.msra.mxu2 %v5503_v17  ;;  %v5583_v0 = vmul.f32 %v4696_v7, %v1020_v32  ;;  %v7025_v32 = vld [vmem:[#allocation20_spill] sm:$0xff]  ;;  %v7027_v7 = vld [vmem:[#allocation15_spill] sm:$0xff] }
 0x49f   :  { %4697 = vrcp.f32 %v1219_v52  ;;  %v7028_v52 = vld [vmem:[#allocation12_spill] sm:$0xff] }
 0x4a0   :  { %7012 = vst [vmem:[#allocation40_spill] sm:$0xff] %v5583_v0  ;;  %1316 = vxpose.xlu2.b32.cont [6/8] (short) (narrow) %v5583_v0, 8  ;;  %1382 = vmatpush.msra.mxu2 %v5490_v36 }
 0x4a2   :  { %1383 = vmatpush.msra.mxu2 %v5482_v58 }
 0x4a4   :  { %v1221_v25 = vpop.f32.mrf.mxu1  ;;  %1384 = vmatpush.msra.mxu2 %v5474_v48 }
 0x4a5   :  { %v4698_v40 = vpop.eup %4697  ;;  %v1222_v29 = vadd.f32 1e-06, %v1221_v25  ;;  %v7030_v25 = vmov 0  }
 0x4a6   :  { %v5594_v60 = vmul.f32 %v4698_v40, %v1021_v23 }
 0x4a7   :  { %4699 = vrcp.f32 %v1222_v29  ;;  %v7031_v29 = vld [vmem:[#allocation33_spill] sm:$0xff] }
 0x4a8   :  { %7013 = vst [vmem:[#allocation41_spill] sm:$0xff] %v5594_v60  ;;  %1317 = vxpose.xlu2.b32.cont [7/8] (short) (narrow) %v5594_v60, 8  ;;  %v1518_v45 = vperm.slane %v7031_v29, 1  ;;  %v1558_v31 = vperm.slane %v7031_v29, 3 }
 0x4ad   :  { %v4700_v57 = vpop.eup %4699 }
 0x4ae   :  { %v5602_v62 = vmul.f32 %v4700_v57, %v1022_v26  ;;  %v1519_v26 = vperm.slane %v7032_v49, 1  ;;  %v1502_v57 = vperm.slane %v7031_v29, 0 }
 0x4b0   :  { %7014 = vst [vmem:[#allocation42_spill] sm:$0xff] %v5602_v62  ;;  %1318 = vxpose.xlu2.b32.end [8/8] (short) (narrow) %v5602_v62, 8  ;;  %1400 = vmatpush.msra.mxu3 %v5602_v62 }
 0x4b2   :  { %1401 = vmatpush.msra.mxu3 %v5594_v60 }
 0x4b4   :  { %1402 = vmatpush.msra.mxu3 %v5583_v0 }
 0x4b6   :  { %1403 = vmatpush.msra.mxu3 %v5571_v61 }
 0x4b8   :  { %1404 = vmatpush.msra.mxu3 %v5556_v19  ;;  %v1559_v19 = vperm.slane %v7032_v49, 3 }
 0x4ba   :  { %1405 = vmatpush.msra.mxu3 %v5540_v59 }
 0x4bc   :  { %1406 = vmatpush.msra.mxu3 %v5524_v2 }
 0x4be   :  { %1407 = vmatpush.msra.mxu3 %v5508_v13 }
 0x4fd   :  { %4614 = vset.pattern.permute.xlu0 %v7015_v12 }
 0x502   :  { %v1272_v24 = vpop.trf.xlu0 }
 0x503   :  { %4464 = vmatmul.msk.f32.vlgmr.msrb.gmra.mxu2 %vm387_vm1, %v1272_v24 }
 0x504   :  { %1420 = vmatpush.msrb.mxu2 %v6995_v8 }
 0x506   :  { %1421 = vmatpush.msrb.mxu2 %v6991_v3 }
 0x508   :  { %1422 = vmatpush.msrb.mxu2 %v5144_v54 }
 0x50a   :  { %1423 = vmatpush.msrb.mxu2 %v5136_v50 }
 0x50c   :  { %1424 = vmatpush.msrb.mxu2 %v5128_v46 }
 0x50e   :  { %1425 = vmatpush.msrb.mxu2 %v5120_v42 }
 0x510   :  { %1426 = vmatpush.msrb.mxu2 %v5112_v38 }
 0x511   :  { %v1327_v18 = vpop.trf.xlu2 }
 0x512   :  { %1427 = vmatpush.msrb.mxu2 %v5104_v34  ;;  %4465 = vmatmul.msk.f32.vlgmr.msrb.gmra.mxu3 %vm387_vm1, %v1327_v18 }
 0x513   :  { %1440 = vmatpush.msrb.mxu3 %v6996_v9  ;;  %4615 = vset.pattern.permute.xlu2 %v7016_v44 }
 0x515   :  { %1441 = vmatpush.msrb.mxu3 %v6992_v4 }
 0x517   :  { %1442 = vmatpush.msrb.mxu3 %v5146_v55 }
 0x519   :  { %1443 = vmatpush.msrb.mxu3 %v5138_v51 }
 0x51b   :  { %1444 = vmatpush.msrb.mxu3 %v5130_v47 }
 0x51d   :  { %1445 = vmatpush.msrb.mxu3 %v5122_v43 }
 0x51f   :  { %1446 = vmatpush.msrb.mxu3 %v5114_v39 }
 0x521   :  { %1447 = vmatpush.msrb.mxu3 %v5106_v35 }
 0x586   :  { %v1308_v11 = vpop.f32.mrf.mxu2 }
 0x587   :  { %4466 = vmatmul.msk.f32.vlgmr.msra.gmra.mxu2 %vm387_vm1, %v1308_v11 }
 0x588   :  { %1460 = vmatpush.msra.mxu2 %v7001_v53 }
 0x58a   :  { %1461 = vmatpush.msra.mxu2 %v6999_v21 }
 0x58c   :  { %1462 = vmatpush.msra.mxu2 %v6997_v10 }
 0x58e   :  { %1463 = vmatpush.msra.mxu2 %v6993_v5 }
 0x58f   :  { %4468 = vmatmul.msk.f32.vlgmr.msrb.gmra.mxu2 %vm387_vm1, %v1272_v24 }
 0x590   :  { %1464 = vmatpush.msra.mxu2 %v7017_v27 }
 0x592   :  { %1465 = vmatpush.msra.mxu2 %v7018_v22 }
 0x594   :  { %1466 = vmatpush.msra.mxu2 %v7019_v33 }
 0x595   :  { %v1363_v1 = vpop.f32.mrf.mxu3 }
 0x596   :  { %1467 = vmatpush.msra.mxu2 %v7020_v30  ;;  %4467 = vmatmul.msk.f32.vlgmr.msra.gmra.mxu3 %vm387_vm1, %v1363_v1 }
 0x597   :  { %1480 = vmatpush.msra.mxu3 %v7021_v56  ;;  %4470 = vmatmul.msk.f32.vlgmr.msra.gmra.mxu2 %vm387_vm1, %v1327_v18 }
 0x599   :  { %1481 = vmatpush.msra.mxu3 %v7022_v15 }
 0x59b   :  { %1482 = vmatpush.msra.mxu3 %v7023_v20 }
 0x59d   :  { %1483 = vmatpush.msra.mxu3 %v7024_v41 }
 0x59e   :  { %4469 = vmatmul.msk.f32.vlgmr.msrb.gmra.mxu3 %vm387_vm1, %v1272_v24  ;;  %v1503_v24 = vperm.slane %v7032_v49, 0 }
 0x59f   :  { %1484 = vmatpush.msra.mxu3 %v7025_v32 }
 0x5a1   :  { %1485 = vmatpush.msra.mxu3 %v7026_v63 }
 0x5a3   :  { %1486 = vmatpush.msra.mxu3 %v7027_v7 }
 0x5a5   :  { %1487 = vmatpush.msra.mxu3 %v7028_v52 }
 0x5a6   :  { %4471 = vmatmul.msk.f32.vlgmr.msra.gmra.mxu3 %vm387_vm1, %v1327_v18 }
 0x60a   :  { %v1386_v37 = vpop.f32.mrf.mxu2 }
 0x60b   :  { %1531 = vperm.xlu2 %4615, %v1386_v37   ;;  %1511 = vperm.xlu0 %4614, %v1386_v37  }
 0x60c   :  { %1494 = vperm.xlu1 %4613, %v1386_v37  }
 0x614   :  { %4616 = vset.pattern.permute.xlu1 %v7029_v16 }
 0x615   :  { %1551 = vperm.xlu1 %4616, %v1386_v37  }
 0x619   :  { %v1409_v23 = vpop.f32.mrf.mxu3 }
 0x61a   :  { %1515 = vperm.xlu0 %4614, %v1409_v23  }
 0x61d   :  { %4617 = vset.pattern.permute.xlu1 %v7030_v25 }
 0x61e   :  { %1499 = vperm.xlu1 %4617, %v1409_v23  }
 0x622   :  { %4619 = vset.pattern.permute.xlu0 %v7029_v16 }
 0x623   :  { %1555 = vperm.xlu0 %4619, %v1409_v23  }
 0x626   :  { %4618 = vset.pattern.permute.xlu1 %v7016_v44  ;;  %v1538_v44 = vperm.slane %v7031_v29, 2 }
 0x627   :  { %1535 = vperm.xlu1 %4618, %v1409_v23  }
 0x645   :  { %1946 = vxpose.xlu0.b32.start.end [1/1] (short) (narrow) %v1363_v1, 64  ;;  %v1539_v1 = vperm.slane %v7032_v49, 2 }
 0x65c   :  { %1846 = vxpose.xlu1.b32.start.end [1/1] (short) (narrow) %v1308_v11, 64 }
 0x665   :  { %v1532_v60 = vpop.permute.xlu2 %1531 }
 0x666   :  { %v1542_v0 = vmul.f32 %v1538_v44, %v1532_v60  ;;  %v1543_v61 = vmul.f32 %v1539_v1, %v1532_v60  ;;  %v1449_v44 = vpop.f32.mrf.mxu3  ;;  %v7033_v1 = vld [vmem:[#allocation35_spill] sm:$0xff] }
 0x67d   :  { %v1512_v40 = vpop.permute.xlu0 %1511 }
 0x67e   :  { %v1495_v18 = vpop.permute.xlu1 %1494  ;;  %v1522_v37 = vmul.f32 %v1518_v45, %v1512_v40  ;;  %v1523_v12 = vmul.f32 %v1519_v26, %v1512_v40 }
 0x67f   :  { %v1506_v62 = vmul.f32 %v1502_v57, %v1495_v18  ;;  %v1507_v16 = vmul.f32 %v1503_v24, %v1495_v18 }
 0x681   :  { %v1526_v11 = vadd.f32 %v1522_v37, %v1506_v62  ;;  %v1527_v23 = vadd.f32 %v1523_v12, %v1507_v16  ;;  %v1429_v62 = vpop.f32.mrf.mxu2  ;;  %v1571_v37 = vmul.f32 %v1449_v44, %v7032_v49  ;;  %v1540_v49 = vperm.slane %v7033_v1, 2 }
 0x682   :  { %v1570_v60 = vmul.f32 %v1429_v62, %v7031_v29 }
 0x683   :  { %v1546_v59 = vadd.f32 %v1542_v0, %v1526_v11  ;;  %v1547_v28 = vadd.f32 %v1543_v61, %v1527_v23  ;;  %v1504_v0 = vperm.slane %v7033_v1, 0  ;;  %v7034_v61 = vld [vmem:[#allocation36_spill] sm:$0xff] }
 0x684   :  { %v1521_v11 = vperm.slane %v7034_v61, 1 }
 0x687   :  { %v1552_v6 = vpop.permute.xlu1 %1551 }
 0x688   :  { %v1562_v45 = vmul.f32 %v1558_v31, %v1552_v6  ;;  %v1563_v40 = vmul.f32 %v1559_v19, %v1552_v6  ;;  %v1505_v31 = vperm.slane %v7034_v61, 0 }
 0x68a   :  { %v1566_v26 = vadd.f32 %v1562_v45, %v1546_v59  ;;  %v1567_v57 = vadd.f32 %v1563_v40, %v1547_v28  ;;  %v1520_v28 = vperm.slane %v7033_v1, 1 }
 0x68c   :  { %v1574_v24 = vadd.f32 1e-06, %v1566_v26  ;;  %v1575_v18 = vadd.f32 1e-06, %v1567_v57  ;;  %v1516_v2 = vpop.permute.xlu0 %1515  ;;  %v1541_v26 = vperm.slane %v7034_v61, 2  ;;  %v1560_v57 = vperm.slane %v7033_v1, 3 }
 0x68d   :  { %v1524_v29 = vmul.f32 %v1520_v28, %v1516_v2  ;;  %v1525_v40 = vmul.f32 %v1521_v11, %v1516_v2 }
 0x68e   :  { %4701 = vrcp.f32 %v1574_v24  ;;  %v1561_v24 = vperm.slane %v7034_v61, 3 }
 0x68f   :  { %4703 = vrcp.f32 %v1575_v18 }
 0x690   :  { %v1500_v12 = vpop.permute.xlu1 %1499 }
 0x691   :  { %v1508_v23 = vmul.f32 %v1504_v0, %v1500_v12  ;;  %v1509_v45 = vmul.f32 %v1505_v31, %v1500_v12 }
 0x693   :  { %v1528_v12 = vadd.f32 %v1524_v29, %v1508_v23  ;;  %v1529_v44 = vadd.f32 %v1525_v40, %v1509_v45  ;;  %v1469_v23 = vpop.f32.mrf.mxu2  ;;  %v1489_v45 = vpop.f32.mrf.mxu3 }
 0x694   :  { %v4702_v16 = vpop.eup %4701  ;;  %v1572_v29 = vmul.f32 %v1469_v23, %v7033_v1  ;;  %v5714_v1 = vld [vmem:[%s6776_s2 + $0x30] sm:$0xff] }
 0x695   :  { %v4704_v6 = vpop.eup %4703  ;;  %v5671_v59 = vmul.f32 %v4702_v16, %v1570_v60  ;;  %v1556_v18 = vpop.permute.xlu0 %1555  ;;  %7040 = vst [vmem:[#allocation44_spill] sm:$0xff] %v5714_v1 }
 0x696   :  { %v5674_v19 = vmul.f32 %v4704_v6, %v1571_v37  ;;  %v1564_v16 = vmul.f32 %v1560_v57, %v1556_v18  ;;  %v1565_v37 = vmul.f32 %v1561_v24, %v1556_v18  ;;  %v5730_v18 = vld [vmem:[%s6776_s2 + $0x20] sm:$0xff] }
 0x697   :  { %7035 = vst [vmem:[#allocation33_spill] sm:$0xff] %v5671_v59  ;;  %1601 = vmatpush.xpose.msra.mxu0 %v5671_v59 }
 0x698   :  { %7036 = vst [vmem:[#allocation34_spill] sm:$0xff] %v5674_v19  ;;  %1642 = vmatpush.xpose.msra.mxu1 %v5674_v19 }
 0x699   :  { %v1536_v62 = vpop.permute.xlu1 %1535  ;;  %7042 = vst [vmem:[#allocation46_spill] sm:$0xff] %v5730_v18 }
 0x69a   :  { %v1544_v60 = vmul.f32 %v1540_v49, %v1536_v62  ;;  %v1545_v2 = vmul.f32 %v1541_v26, %v1536_v62  ;;  %1602 = vmatmul.f32.vlgmr.msra.gmra.mxu0 %v5104_v34  ;;  %v1573_v49 = vmul.f32 %v1489_v45, %v7034_v61  ;;  %v5723_v61 = vld [vmem:[%s6776_s2 + $0x28] sm:$0xff]  ;;  %v5739_v62 = vld [vmem:[%s6776_s2 + $0x18] sm:$0xff] }
 0x69b   :  { %1765 = vmatpush.xpose.msrb.mxu0 %v5671_v59  ;;  %1643 = vmatmul.f32.vlgmr.msra.gmra.mxu1 %v5106_v35  ;;  %7041 = vst [vmem:[#allocation45_spill] sm:$0xff] %v5723_v61 }
 0x69c   :  { %1785 = vmatpush.xpose.msrb.mxu1 %v5674_v19  ;;  %v1548_v0 = vadd.f32 %v1544_v60, %v1528_v12  ;;  %v1549_v31 = vadd.f32 %v1545_v2, %v1529_v44  ;;  %7043 = vst [vmem:[#allocation47_spill] sm:$0xff] %v5739_v62  ;;  %v5746_v12 = vld [vmem:[%s6776_s2 + $0x10] sm:$0xff]  ;;  %v5755_v44 = vld [vmem:[%s6776_s2 + $0x8] sm:$0xff]  ;;  %v5762_v60 = vld [vmem:[%s6776_s2] sm:$0xff] }
 0x69d   :  { %7044 = vst [vmem:[#allocation48_spill] sm:$0xff] %v5746_v12 }
 0x69e   :  { %v1568_v6 = vadd.f32 %v1564_v16, %v1548_v0  ;;  %v1569_v28 = vadd.f32 %v1565_v37, %v1549_v31  ;;  %7045 = vst [vmem:[#allocation49_spill] sm:$0xff] %v5755_v44 }
 0x69f   :  { %7046 = vst [vmem:[#allocation50_spill] sm:$0xff] %v5762_v60 }
 0x6a0   :  { %v1576_v11 = vadd.f32 1e-06, %v1568_v6  ;;  %v1577_v14 = vadd.f32 1e-06, %v1569_v28 }
 0x6a2   :  { %4705 = vrcp.f32 %v1576_v11  ;;  %1605 = vmatmul.f32.gmra.mxu0 %v5112_v38 }
 0x6a3   :  { %4707 = vrcp.f32 %v1577_v14  ;;  %1646 = vmatmul.f32.gmra.mxu1 %v5114_v39  ;;  %v5706_v14 = vld [vmem:[%s6776_s2 + $0x38] sm:$0xff] }
 0x6a4   :  { %7039 = vst [vmem:[#allocation43_spill] sm:$0xff] %v5706_v14 }
 0x6a8   :  { %v4706_v40 = vpop.eup %4705 }
 0x6a9   :  { %v4708_v26 = vpop.eup %4707  ;;  %v5691_v57 = vmul.f32 %v4706_v40, %v1572_v29 }
 0x6aa   :  { %v5693_v24 = vmul.f32 %v4708_v26, %v1573_v49  ;;  %1608 = vmatmul.f32.gmra.mxu0 %v5120_v42 }
 0x6ab   :  { %7037 = vst [vmem:[#allocation35_spill] sm:$0xff] %v5691_v57  ;;  %1649 = vmatmul.f32.gmra.mxu1 %v5122_v43  ;;  %1683 = vmatpush.xpose.msrb.mxu2 %v5691_v57 }
 0x6ac   :  { %7038 = vst [vmem:[#allocation36_spill] sm:$0xff] %v5693_v24  ;;  %1724 = vmatpush.xpose.msrb.mxu3 %v5693_v24 }
 0x6ae   :  { %1684 = vmatmul.f32.vlgmr.msrb.gmra.mxu2 %v7020_v30 }
 0x6af   :  { %1805 = vmatpush.xpose.msra.mxu2 %v5691_v57  ;;  %1725 = vmatmul.f32.vlgmr.msrb.gmra.mxu3 %v7028_v52 }
 0x6b0   :  { %1825 = vmatpush.xpose.msra.mxu3 %v5693_v24  ;;  %4620 = vset.pattern.permute.xlu1 %v7030_v25 }
 0x6b2   :  { %1611 = vmatmul.f32.gmra.mxu0 %v5128_v46 }
 0x6b3   :  { %2121 = vmatpush.msrb.mxu2 %v5706_v14  ;;  %1652 = vmatmul.f32.gmra.mxu1 %v5130_v47 }
 0x6b4   :  { %2176 = vmatpush.msrb.mxu3 %v5706_v14 }
 0x6b5   :  { %2122 = vmatpush.msrb.mxu2 %v5714_v1 }
 0x6b6   :  { %2177 = vmatpush.msrb.mxu3 %v5714_v1  ;;  %1687 = vmatmul.f32.gmra.mxu2 %v7019_v33 }
 0x6b7   :  { %2123 = vmatpush.msrb.mxu2 %v5723_v61  ;;  %1728 = vmatmul.f32.gmra.mxu3 %v7027_v7 }
 0x6b8   :  { %2178 = vmatpush.msrb.mxu3 %v5723_v61 }
 0x6b9   :  { %2124 = vmatpush.msrb.mxu2 %v5730_v18 }
 0x6ba   :  { %2179 = vmatpush.msrb.mxu3 %v5730_v18  ;;  %1614 = vmatmul.f32.gmra.mxu0 %v5136_v50 }
 0x6bb   :  { %2125 = vmatpush.msrb.mxu2 %v5739_v62  ;;  %1655 = vmatmul.f32.gmra.mxu1 %v5138_v51 }
 0x6bc   :  { %2180 = vmatpush.msrb.mxu3 %v5739_v62 }
 0x6bd   :  { %2126 = vmatpush.msrb.mxu2 %v5746_v12 }
 0x6be   :  { %2181 = vmatpush.msrb.mxu3 %v5746_v12  ;;  %1690 = vmatmul.f32.gmra.mxu2 %v7018_v22 }
 0x6bf   :  { %2127 = vmatpush.msrb.mxu2 %v5755_v44  ;;  %1731 = vmatmul.f32.gmra.mxu3 %v7026_v63 }
 0x6c0   :  { %2182 = vmatpush.msrb.mxu3 %v5755_v44 }
 0x6c1   :  { %2128 = vmatpush.msrb.mxu2 %v5762_v60 }
 0x6c2   :  { %2183 = vmatpush.msrb.mxu3 %v5762_v60  ;;  %1617 = vmatmul.f32.gmra.mxu0 %v5144_v54 }
 0x6c3   :  { %1658 = vmatmul.f32.gmra.mxu1 %v5146_v55 }
 0x6c6   :  { %1693 = vmatmul.f32.gmra.mxu2 %v7017_v27 }
 0x6c7   :  { %1734 = vmatmul.f32.gmra.mxu3 %v7025_v32 }
 0x6ca   :  { %1620 = vmatmul.f32.gmra.mxu0 %v6991_v3 }
 0x6cb   :  { %1661 = vmatmul.f32.gmra.mxu1 %v6992_v4 }
 0x6ce   :  { %1696 = vmatmul.f32.gmra.mxu2 %v6993_v5 }
 0x6cf   :  { %1737 = vmatmul.f32.gmra.mxu3 %v7024_v41 }
 0x6d2   :  { %1623 = vmatmul.f32.gmra.mxu0 %v6995_v8 }
 0x6d3   :  { %1664 = vmatmul.f32.gmra.mxu1 %v6996_v9 }
 0x6d6   :  { %1699 = vmatmul.f32.gmra.mxu2 %v6997_v10 }
 0x6d7   :  { %1740 = vmatmul.f32.gmra.mxu3 %v7023_v20 }
 0x6da   :  { %1766 = vmatmul.f32.vlgmr.msrb.gmra.mxu0 %v5671_v59 }
 0x6db   :  { %1786 = vmatmul.f32.vlgmr.msrb.gmra.mxu1 %v5674_v19 }
 0x6de   :  { %1702 = vmatmul.f32.gmra.mxu2 %v6999_v21 }
 0x6df   :  { %1743 = vmatmul.f32.gmra.mxu3 %v7022_v15 }
 0x6e6   :  { %1705 = vmatmul.f32.gmra.mxu2 %v7001_v53 }
 0x6e7   :  { %1746 = vmatmul.f32.gmra.mxu3 %v7021_v56 }
 0x6e9   :  { %v1962_v33 = vpop.trf.xlu0 }
 0x6ee   :  { %1806 = vmatmul.f32.vlgmr.msra.gmra.mxu2 %v5691_v57 }
 0x6ef   :  { %1826 = vmatmul.f32.vlgmr.msra.gmra.mxu3 %v5693_v24 }
 0x700   :  { %v1862_v24 = vpop.trf.xlu1 }
 0x708   :  { %v1863_v52 = vpop.trf.xlu1 }
 0x710   :  { %v1864_v15 = vpop.trf.xlu1 }
 0x717   :  { %v5788_v2 = vpop.f32.mrf.mxu0 }
 0x718   :  { %v5790_v16 = vpop.f32.mrf.mxu1  ;;  %v1865_v27 = vpop.trf.xlu1 }
 0x71f   :  { %v5792_v37 = vpop.f32.mrf.mxu0 }
 0x720   :  { %v5794_v0 = vpop.f32.mrf.mxu1 }
 0x727   :  { %v5796_v31 = vpop.f32.mrf.mxu0 }
 0x728   :  { %v5798_v6 = vpop.f32.mrf.mxu1 }
 0x72f   :  { %v5800_v28 = vpop.f32.mrf.mxu0 }
 0x730   :  { %v5802_v11 = vpop.f32.mrf.mxu1 }
 0x731   :  { %v5804_v23 = vpop.f32.mrf.mxu2 }
 0x732   :  { %v5806_v45 = vpop.f32.mrf.mxu3 }
 0x737   :  { %v5808_v29 = vpop.f32.mrf.mxu0 }
 0x738   :  { %v5810_v40 = vpop.f32.mrf.mxu1 }
 0x739   :  { %v5812_v49 = vpop.f32.mrf.mxu2 }
 0x73a   :  { %v5814_v26 = vpop.f32.mrf.mxu3 }
 0x73f   :  { %v5816_v60 = vpop.f32.mrf.mxu0 }
 0x740   :  { %v5818_v44 = vpop.f32.mrf.mxu1 }
 0x741   :  { %v5820_v12 = vpop.f32.mrf.mxu2 }
 0x742   :  { %v5822_v62 = vpop.f32.mrf.mxu3 }
 0x747   :  { %v5824_v18 = vpop.f32.mrf.mxu0 }
 0x748   :  { %v5826_v61 = vpop.f32.mrf.mxu1 }
 0x749   :  { %v5828_v1 = vpop.f32.mrf.mxu2 }
 0x74a   :  { %v5830_v14 = vpop.f32.mrf.mxu3 }
 0x74f   :  { %v5832_v57 = vpop.f32.mrf.mxu0 }
 0x750   :  { %v5834_v19 = vpop.f32.mrf.mxu1 }
 0x751   :  { %v5836_v59 = vpop.f32.mrf.mxu2 }
 0x752   :  { %v5838_v25 = vpop.f32.mrf.mxu3 }
 0x757   :  { %v1767_v7 = vpop.f32.mrf.mxu0 }
 0x758   :  { %v1787_v63 = vpop.f32.mrf.mxu1 }
 0x759   :  { %v1788_v32 = vadd.f32 %v1787_v63, %v1767_v7  ;;  %v5840_v41 = vpop.f32.mrf.mxu2  ;;  %v1963_v7 = vpop.trf.xlu0 }
 0x75a   :  { %v5842_v20 = vpop.f32.mrf.mxu3 }
 0x75b   :  { %4472 = vmatpush.msk.msra.mxu0 %vm506_vm2, %v1788_v32 }
 0x75c   :  { %4473 = vmatmul.msk.f32.vlgmr.msra.gmra.mxu0 %vm1055_vm3, %v1862_v24  ;;  %v1866_v24 = vpop.trf.xlu1 }
 0x761   :  { %v5846_v56 = vpop.f32.mrf.mxu2 }
 0x762   :  { %v5848_v30 = vpop.f32.mrf.mxu3 }
 0x764   :  { %4474 = vmatmul.msk.f32.gmra.mxu0 %vm1055_vm3, %v1863_v52  ;;  %v1964_v52 = vpop.trf.xlu0  ;;  %v1867_v21 = vpop.trf.xlu1 }
 0x769   :  { %v5851_v22 = vpop.f32.mrf.mxu2 }
 0x76a   :  { %v5853_v63 = vpop.f32.mrf.mxu3 }
 0x76c   :  { %4475 = vmatmul.msk.f32.gmra.mxu0 %vm1055_vm3, %v1864_v15  ;;  %v1965_v53 = vpop.trf.xlu0  ;;  %v1868_v15 = vpop.trf.xlu1 }
 0x771   :  { %v1807_v5 = vpop.f32.mrf.mxu2 }
 0x772   :  { %v1827_v32 = vpop.f32.mrf.mxu3 }
 0x773   :  { %v1828_v10 = vadd.f32 %v1827_v32, %v1807_v5 }
 0x774   :  { %4476 = vmatmul.msk.f32.gmra.mxu0 %vm1055_vm3, %v1865_v27  ;;  %v1966_v5 = vpop.trf.xlu0 }
 0x775   :  { %4481 = vmatpush.msk.msra.mxu1 %vm506_vm2, %v1828_v10  ;;  %v1869_v10 = vpop.trf.xlu1 }
 0x776   :  { %4482 = vmatmul.msk.f32.vlgmr.msra.gmra.mxu1 %vm1055_vm3, %v1962_v33 }
 0x77c   :  { %4477 = vmatmul.msk.f32.gmra.mxu0 %vm1055_vm3, %v1866_v24  ;;  %v1967_v27 = vpop.trf.xlu0 }
 0x77e   :  { %4483 = vmatmul.msk.f32.gmra.mxu1 %vm1055_vm3, %v1963_v7 }
 0x784   :  { %4478 = vmatmul.msk.f32.gmra.mxu0 %vm1055_vm3, %v1867_v21  ;;  %v1968_v33 = vpop.trf.xlu0 }
 0x786   :  { %4484 = vmatmul.msk.f32.gmra.mxu1 %vm1055_vm3, %v1964_v52 }
 0x78c   :  { %4479 = vmatmul.msk.f32.gmra.mxu0 %vm1055_vm3, %v1868_v15  ;;  %v1969_v21 = vpop.trf.xlu0 }
 0x78e   :  { %4485 = vmatmul.msk.f32.gmra.mxu1 %vm1055_vm3, %v1965_v53  ;;  %v1645_v53 = vadd.f32 %v5790_v16, %v5788_v2 }
 0x790   :  { %v1830_v24 = vmul.f32 %v1645_v53, %v5474_v48  ;;  %v1651_v48 = vadd.f32 %v5798_v6, %v5796_v31  ;;  %v1727_v31 = vadd.f32 %v5806_v45, %v5804_v23 }
 0x792   :  { %v1832_v2 = vmul.f32 %v1651_v48, %v5490_v36 }
 0x794   :  { %4480 = vmatmul.msk.f32.gmra.mxu0 %vm1055_vm3, %v1869_v10 }
 0x796   :  { %4486 = vmatmul.msk.f32.gmra.mxu1 %vm1055_vm3, %v1966_v5 }
 0x79e   :  { %4487 = vmatmul.msk.f32.gmra.mxu1 %vm1055_vm3, %v1967_v27  ;;  %v1648_v27 = vadd.f32 %v5794_v0, %v5792_v37 }
 0x7a6   :  { %4488 = vmatmul.msk.f32.gmra.mxu1 %vm1055_vm3, %v1968_v33  ;;  %v1831_v33 = vmul.f32 %v1648_v27, %v5482_v58  ;;  %v1838_v27 = vmul.f32 %v1727_v31, %v5508_v13  ;;  %v7048_v13 = vld [vmem:[#allocation25_spill] sm:$0xff] }
 0x7ae   :  { %4489 = vmatmul.msk.f32.gmra.mxu1 %vm1055_vm3, %v1969_v21 }
 0x7d9   :  { %v1922_v7 = vpop.f32.mrf.mxu0 }
 0x7da   :  { %v1923_v32 = vadd.f32 1e-06, %v1922_v7 }
 0x7dc   :  { %4709 = vrcp.f32 %v1923_v32 }
 0x7e1   :  { %v1925_v52 = vpop.f32.mrf.mxu0 }
 0x7e2   :  { %v4710_v15 = vpop.eup %4709  ;;  %v1926_v5 = vadd.f32 1e-06, %v1925_v52  ;;  %v1654_v52 = vadd.f32 %v5802_v11, %v5800_v28  ;;  %v1657_v28 = vadd.f32 %v5810_v40, %v5808_v29 }
 0x7e3   :  { %v5873_v10 = vmul.f32 %v4710_v15, %v1830_v24 }
 0x7e4   :  { %4711 = vrcp.f32 %v1926_v5  ;;  %v1833_v6 = vmul.f32 %v1654_v52, %v5503_v17  ;;  %v1730_v17 = vadd.f32 %v5814_v26, %v5812_v49  ;;  %v1834_v23 = vmul.f32 %v1657_v28, %v7048_v13  ;;  %v7051_v52 = vld [vmem:[#allocation29_spill] sm:$0xff] }
 0x7e5   :  { %2078 = vxpose.xlu2.b32.start [1/8] (short) (narrow) %v5873_v10, 8  ;;  %v1733_v26 = vadd.f32 %v5822_v62, %v5820_v12  ;;  %v1736_v12 = vadd.f32 %v5830_v14, %v5828_v1  ;;  %v7054_v28 = vld [vmem:[#allocation9_spill] sm:$0xff]  ;;  %v1739_v1 = vadd.f32 %v5838_v25, %v5836_v59  ;;  %v1742_v25 = vadd.f32 %v5842_v20, %v5840_v41  ;;  %v7061_v59 = vld [vmem:[#allocation40_spill] sm:$0xff] }
 0x7e6   :  { %v1745_v20 = vadd.f32 %v5848_v30, %v5846_v56  ;;  %v7063_v41 = vld [vmem:[#allocation41_spill] sm:$0xff]  ;;  %v7065_v30 = vld [vmem:[#allocation42_spill] sm:$0xff] }
 0x7e9   :  { %v1928_v21 = vpop.f32.mrf.mxu0 }
 0x7ea   :  { %v4712_v7 = vpop.eup %4711  ;;  %v1929_v32 = vadd.f32 1e-06, %v1928_v21 }
 0x7eb   :  { %v5879_v35 = vmul.f32 %v4712_v7, %v1831_v33 }
 0x7ec   :  { %4713 = vrcp.f32 %v1929_v32 }
 0x7ed   :  { %2079 = vxpose.xlu2.b32.cont [2/8] (short) (narrow) %v5879_v35, 8 }
 0x7f1   :  { %v1931_v16 = vpop.f32.mrf.mxu0 }
 0x7f2   :  { %v4714_v53 = vpop.eup %4713  ;;  %v1932_v37 = vadd.f32 1e-06, %v1931_v16  ;;  %v7049_v16 = vld [vmem:[#allocation26_spill] sm:$0xff] }
 0x7f3   :  { %v5885_v0 = vmul.f32 %v4714_v53, %v1832_v2  ;;  %v2022_v24 = vpop.f32.mrf.mxu1  ;;  %v1839_v53 = vmul.f32 %v1730_v17, %v7049_v16 }
 0x7f4   :  { %4715 = vrcp.f32 %v1932_v37  ;;  %v2023_v58 = vadd.f32 1e-06, %v2022_v24 }
 0x7f5   :  { %2080 = vxpose.xlu2.b32.cont [3/8] (short) (narrow) %v5885_v0, 8 }
 0x7f6   :  { %4717 = vrcp.f32 %v2023_v58  ;;  %v1660_v58 = vadd.f32 %v5818_v44, %v5816_v60 }
 0x7f8   :  { %v1835_v31 = vmul.f32 %v1660_v58, %v7051_v52 }
 0x7f9   :  { %v1934_v36 = vpop.f32.mrf.mxu0 }
 0x7fa   :  { %v4716_v15 = vpop.eup %4715  ;;  %v1935_v5 = vadd.f32 1e-06, %v1934_v36 }
 0x7fb   :  { %v5894_v33 = vmul.f32 %v4716_v15, %v1833_v6  ;;  %v2025_v21 = vpop.f32.mrf.mxu1 }
 0x7fc   :  { %v4718_v7 = vpop.eup %4717  ;;  %4719 = vrcp.f32 %v1935_v5  ;;  %v2026_v32 = vadd.f32 1e-06, %v2025_v21  ;;  %v7052_v5 = vld [vmem:[#allocation30_spill] sm:$0xff] }
 0x7fd   :  { %2081 = vxpose.xlu2.b32.cont [4/8] (short) (narrow) %v5894_v33, 8  ;;  %v5899_v11 = vmul.f32 %v4718_v7, %v1838_v27  ;;  %v1840_v27 = vmul.f32 %v1733_v26, %v7052_v5  ;;  %v7058_v26 = vld [vmem:[#allocation39_spill] sm:$0xff] }
 0x7fe   :  { %4721 = vrcp.f32 %v2026_v32  ;;  %v1663_v32 = vadd.f32 %v5826_v61, %v5824_v18  ;;  %v1842_v52 = vmul.f32 %v1739_v1, %v7058_v26  ;;  %v7072_v1 = vld [vmem:[#allocation23_spill] sm:$0xff]  ;;  %v7076_v26 = vld [vmem:[#allocation14_spill] sm:$0xff] }
 0x7ff   :  { %7047 = vst [vmem:[#allocation51_spill] sm:$0xff] %v5899_v11  ;;  %2133 = vxpose.xlu0.b32.start [1/8] (short) (narrow) %v5899_v11, 8 }
 0x800   :  { %v1836_v17 = vmul.f32 %v1663_v32, %v7054_v28 }
 0x801   :  { %v1937_v45 = vpop.f32.mrf.mxu0 }
 0x802   :  { %v4720_v48 = vpop.eup %4719  ;;  %v1938_v2 = vadd.f32 1e-06, %v1937_v45 }
 0x803   :  { %v5906_v37 = vmul.f32 %v4720_v48, %v1834_v23  ;;  %v2028_v29 = vpop.f32.mrf.mxu1  ;;  %v7055_v48 = vld [vmem:[#allocation37_spill] sm:$0xff] }
 0x804   :  { %v4722_v40 = vpop.eup %4721  ;;  %4723 = vrcp.f32 %v1938_v2  ;;  %v2029_v24 = vadd.f32 1e-06, %v2028_v29  ;;  %v1841_v2 = vmul.f32 %v1736_v12, %v7055_v48  ;;  %v1666_v29 = vadd.f32 %v5834_v19, %v5832_v57 }
 0x805   :  { %2082 = vxpose.xlu2.b32.cont [5/8] (short) (narrow) %v5906_v37, 8  ;;  %v5911_v49 = vmul.f32 %v4722_v40, %v1839_v53  ;;  %v7057_v40 = vld [vmem:[#allocation38_spill] sm:$0xff]  ;;  %v7068_v48 = vmov 2  }
 0x806   :  { %4725 = vrcp.f32 %v2029_v24  ;;  %v1837_v24 = vmul.f32 %v1666_v29, %v7057_v40  ;;  %v7071_v29 = vld [vmem:[#allocation27_spill] sm:$0xff]  ;;  %v7073_v40 = vld [vmem:[#allocation21_spill] sm:$0xff] }
 0x807   :  { %7050 = vst [vmem:[#allocation25_spill] sm:$0xff] %v5911_v49  ;;  %2134 = vxpose.xlu0.b32.cont [2/8] (short) (narrow) %v5911_v49, 8 }
 0x809   :  { %v1940_v6 = vpop.f32.mrf.mxu0 }
 0x80a   :  { %v4724_v36 = vpop.eup %4723  ;;  %v1941_v15 = vadd.f32 1e-06, %v1940_v6 }
 0x80b   :  { %v5918_v21 = vmul.f32 %v4724_v36, %v1835_v31  ;;  %v2031_v44 = vpop.f32.mrf.mxu1 }
 0x80c   :  { %v4726_v60 = vpop.eup %4725  ;;  %4727 = vrcp.f32 %v1941_v15  ;;  %v2032_v7 = vadd.f32 1e-06, %v2031_v44  ;;  %v1843_v15 = vmul.f32 %v1742_v25, %v7061_v59  ;;  %v7080_v25 = vld [vmem:[#allocation24_spill] sm:$0xff]  ;;  %v7081_v59 = vld [vmem:[#allocation22_spill] sm:$0xff] }
 0x80d   :  { %2083 = vxpose.xlu2.b32.cont [6/8] (short) (narrow) %v5918_v21, 8  ;;  %v5923_v62 = vmul.f32 %v4726_v60, %v1840_v27 }
 0x80e   :  { %4729 = vrcp.f32 %v2032_v7  ;;  %v1844_v7 = vmul.f32 %v1745_v20, %v7063_v41  ;;  %v7086_v41 = vmov 3  }
 0x80f   :  { %7053 = vst [vmem:[#allocation26_spill] sm:$0xff] %v5923_v62  ;;  %2135 = vxpose.xlu0.b32.cont [3/8] (short) (narrow) %v5923_v62, 8 }
 0x811   :  { %v1943_v13 = vpop.f32.mrf.mxu0 }
 0x812   :  { %v4728_v23 = vpop.eup %4727  ;;  %v1944_v45 = vadd.f32 1e-06, %v1943_v13  ;;  %v1748_v13 = vadd.f32 %v5853_v63, %v5851_v22  ;;  %v7067_v63 = vmov 1  }
 0x813   :  { %v5930_v16 = vmul.f32 %v4728_v23, %v1836_v17  ;;  %v2034_v61 = vpop.f32.mrf.mxu1 }
 0x814   :  { %v4730_v18 = vpop.eup %4729  ;;  %4731 = vrcp.f32 %v1944_v45  ;;  %v2035_v53 = vadd.f32 1e-06, %v2034_v61  ;;  %v1845_v56 = vmul.f32 %v1748_v13, %v7065_v30  ;;  %v7069_v61 = vld [vmem:[#allocation10_spill] sm:$0xff] }
 0x815   :  { %2084 = vxpose.xlu2.b32.cont [7/8] (short) (narrow) %v5930_v16, 8  ;;  %v5935_v14 = vmul.f32 %v4730_v18, %v1841_v2  ;;  %v7089_v13 = vld [vmem:[#allocation34_spill] sm:$0xff] }
 0x816   :  { %4733 = vrcp.f32 %v2035_v53  ;;  %v7070_v53 = vld [vmem:[#allocation31_spill] sm:$0xff]  ;;  %v2325_v30 = vperm.slane %v7089_v13, 0 }
 0x817   :  { %7056 = vst [vmem:[#allocation29_spill] sm:$0xff] %v5935_v14  ;;  %2136 = vxpose.xlu0.b32.cont [4/8] (short) (narrow) %v5935_v14, 8 }
 0x81a   :  { %v4732_v58 = vpop.eup %4731 }
 0x81b   :  { %v5942_v31 = vmul.f32 %v4732_v58, %v1837_v24  ;;  %v2037_v6 = vpop.f32.mrf.mxu1  ;;  %v7074_v24 = vld [vmem:[#allocation19_spill] sm:$0xff]  ;;  %v7075_v58 = vld [vmem:[#allocation17_spill] sm:$0xff] }
 0x81c   :  { %v4734_v36 = vpop.eup %4733  ;;  %v2038_v19 = vadd.f32 1e-06, %v2037_v6 }
 0x81d   :  { %7059 = vst [vmem:[#allocation30_spill] sm:$0xff] %v5942_v31  ;;  %2085 = vxpose.xlu2.b32.end [8/8] (short) (narrow) %v5942_v31, 8  ;;  %2199 = vmatpush.msra.mxu2 %v5942_v31  ;;  %v5946_v57 = vmul.f32 %v4734_v36, %v1842_v52  ;;  %v7077_v52 = vld [vmem:[#allocation11_spill] sm:$0xff]  ;;  %v7078_v36 = vld [vmem:[#allocation32_spill] sm:$0xff] }
 0x81e   :  { %4735 = vrcp.f32 %v2038_v19  ;;  %v7079_v19 = vld [vmem:[#allocation28_spill] sm:$0xff] }
 0x81f   :  { %7060 = vst [vmem:[#allocation9_spill] sm:$0xff] %v5946_v57  ;;  %2200 = vmatpush.msra.mxu2 %v5930_v16  ;;  %2137 = vxpose.xlu0.b32.cont [5/8] (short) (narrow) %v5946_v57, 8 }
 0x821   :  { %2201 = vmatpush.msra.mxu2 %v5918_v21 }
 0x823   :  { %v2040_v5 = vpop.f32.mrf.mxu1  ;;  %2202 = vmatpush.msra.mxu2 %v5906_v37 }
 0x824   :  { %v4736_v27 = vpop.eup %4735  ;;  %v2041_v44 = vadd.f32 1e-06, %v2040_v5  ;;  %v7083_v5 = vld [vmem:[#allocation18_spill] sm:$0xff] }
 0x825   :  { %2203 = vmatpush.msra.mxu2 %v5894_v33  ;;  %v5956_v60 = vmul.f32 %v4736_v27, %v1843_v15  ;;  %v7082_v15 = vld [vmem:[#allocation20_spill] sm:$0xff]  ;;  %v7084_v27 = vld [vmem:[#allocation15_spill] sm:$0xff] }
 0x826   :  { %4737 = vrcp.f32 %v2041_v44  ;;  %v7085_v44 = vld [vmem:[#allocation12_spill] sm:$0xff] }
 0x827   :  { %7062 = vst [vmem:[#allocation37_spill] sm:$0xff] %v5956_v60  ;;  %2204 = vmatpush.msra.mxu2 %v5885_v0  ;;  %2138 = vxpose.xlu0.b32.cont [6/8] (short) (narrow) %v5956_v60, 8 }
 0x829   :  { %2205 = vmatpush.msra.mxu2 %v5879_v35 }
 0x82b   :  { %v2043_v32 = vpop.f32.mrf.mxu1  ;;  %2206 = vmatpush.msra.mxu2 %v5873_v10 }
 0x82c   :  { %v4738_v12 = vpop.eup %4737  ;;  %v2044_v28 = vadd.f32 1e-06, %v2043_v32 }
 0x82d   :  { %v5965_v17 = vmul.f32 %v4738_v12, %v1844_v7  ;;  %v7087_v7 = vmov 0   ;;  %v7088_v12 = vld [vmem:[#allocation33_spill] sm:$0xff] }
 0x82e   :  { %4739 = vrcp.f32 %v2044_v28  ;;  %v2324_v28 = vperm.slane %v7088_v12, 0 }
 0x82f   :  { %7064 = vst [vmem:[#allocation38_spill] sm:$0xff] %v5965_v17  ;;  %2139 = vxpose.xlu0.b32.cont [7/8] (short) (narrow) %v5965_v17, 8 }
 0x834   :  { %v4740_v23 = vpop.eup %4739 }
 0x835   :  { %v5971_v45 = vmul.f32 %v4740_v23, %v1845_v56 }
 0x837   :  { %7066 = vst [vmem:[#allocation39_spill] sm:$0xff] %v5971_v45  ;;  %2140 = vxpose.xlu0.b32.end [8/8] (short) (narrow) %v5971_v45, 8  ;;  %2222 = vmatpush.msra.mxu3 %v5971_v45 }
 0x839   :  { %2223 = vmatpush.msra.mxu3 %v5965_v17 }
 0x83b   :  { %2224 = vmatpush.msra.mxu3 %v5956_v60 }
 0x83d   :  { %2225 = vmatpush.msra.mxu3 %v5946_v57 }
 0x83f   :  { %2226 = vmatpush.msra.mxu3 %v5935_v14 }
 0x841   :  { %2227 = vmatpush.msra.mxu3 %v5923_v62  ;;  %v2380_v62 = vperm.slane %v7088_v12, 3 }
 0x843   :  { %2228 = vmatpush.msra.mxu3 %v5911_v49  ;;  %v2381_v49 = vperm.slane %v7089_v13, 3 }
 0x845   :  { %2229 = vmatpush.msra.mxu3 %v5899_v11 }
 0x87e   :  { %v2094_v22 = vpop.trf.xlu2 }
 0x87f   :  { %4490 = vmatmul.msk.f32.vlgmr.msrb.gmra.mxu2 %vm387_vm1, %v2094_v22  ;;  %4621 = vset.pattern.permute.xlu2 %v7067_v63 }
 0x880   :  { %2242 = vmatpush.msrb.mxu2 %v6995_v8 }
 0x882   :  { %2243 = vmatpush.msrb.mxu2 %v6991_v3 }
 0x884   :  { %2244 = vmatpush.msrb.mxu2 %v5144_v54 }
 0x886   :  { %2245 = vmatpush.msrb.mxu2 %v5136_v50 }
 0x888   :  { %2246 = vmatpush.msrb.mxu2 %v5128_v46 }
 0x88a   :  { %2247 = vmatpush.msrb.mxu2 %v5120_v42 }
 0x88c   :  { %2248 = vmatpush.msrb.mxu2 %v5112_v38 }
 0x88e   :  { %2249 = vmatpush.msrb.mxu2 %v5104_v34 }
 0x89e   :  { %4622 = vset.pattern.permute.xlu0 %v7068_v48 }
 0x8a3   :  { %v2149_v2 = vpop.trf.xlu0 }
 0x8a4   :  { %4491 = vmatmul.msk.f32.vlgmr.msrb.gmra.mxu3 %vm387_vm1, %v2149_v2 }
 0x8a5   :  { %2262 = vmatpush.msrb.mxu3 %v6996_v9 }
 0x8a7   :  { %2263 = vmatpush.msrb.mxu3 %v6992_v4 }
 0x8a9   :  { %2264 = vmatpush.msrb.mxu3 %v5146_v55 }
 0x8ab   :  { %2265 = vmatpush.msrb.mxu3 %v5138_v51 }
 0x8ad   :  { %2266 = vmatpush.msrb.mxu3 %v5130_v47 }
 0x8af   :  { %2267 = vmatpush.msrb.mxu3 %v5122_v43 }
 0x8b1   :  { %2268 = vmatpush.msrb.mxu3 %v5114_v39 }
 0x8b3   :  { %2269 = vmatpush.msrb.mxu3 %v7069_v61 }
 0x902   :  { %v2130_v18 = vpop.f32.mrf.mxu2 }
 0x903   :  { %4492 = vmatmul.msk.f32.vlgmr.msra.gmra.mxu2 %vm387_vm1, %v2130_v18 }
 0x904   :  { %2282 = vmatpush.msra.mxu2 %v7070_v53 }
 0x906   :  { %2283 = vmatpush.msra.mxu2 %v7071_v29 }
 0x908   :  { %2284 = vmatpush.msra.mxu2 %v7072_v1 }
 0x90a   :  { %2285 = vmatpush.msra.mxu2 %v7073_v40 }
 0x90b   :  { %4494 = vmatmul.msk.f32.vlgmr.msrb.gmra.mxu2 %vm387_vm1, %v2094_v22 }
 0x90c   :  { %2286 = vmatpush.msra.mxu2 %v7074_v24 }
 0x90e   :  { %2287 = vmatpush.msra.mxu2 %v7075_v58 }
 0x910   :  { %2288 = vmatpush.msra.mxu2 %v7076_v26 }
 0x912   :  { %2289 = vmatpush.msra.mxu2 %v7077_v52 }
 0x913   :  { %4496 = vmatmul.msk.f32.vlgmr.msra.gmra.mxu2 %vm387_vm1, %v2149_v2 }
 0x927   :  { %v2185_v6 = vpop.f32.mrf.mxu3 }
 0x928   :  { %4493 = vmatmul.msk.f32.vlgmr.msra.gmra.mxu3 %vm387_vm1, %v2185_v6 }
 0x929   :  { %2302 = vmatpush.msra.mxu3 %v7078_v36 }
 0x92b   :  { %2303 = vmatpush.msra.mxu3 %v7079_v19 }
 0x92d   :  { %2304 = vmatpush.msra.mxu3 %v7080_v25 }
 0x92f   :  { %2305 = vmatpush.msra.mxu3 %v7081_v59 }
 0x930   :  { %4495 = vmatmul.msk.f32.vlgmr.msrb.gmra.mxu3 %vm387_vm1, %v2094_v22  ;;  %v2340_v22 = vperm.slane %v7088_v12, 1 }
 0x931   :  { %2306 = vmatpush.msra.mxu3 %v7082_v15 }
 0x933   :  { %2307 = vmatpush.msra.mxu3 %v7083_v5 }
 0x935   :  { %2308 = vmatpush.msra.mxu3 %v7084_v27 }
 0x937   :  { %2309 = vmatpush.msra.mxu3 %v7085_v44 }
 0x938   :  { %4497 = vmatmul.msk.f32.vlgmr.msra.gmra.mxu3 %vm387_vm1, %v2149_v2  ;;  %v2341_v2 = vperm.slane %v7089_v13, 1 }
 0x986   :  { %v2208_v20 = vpop.f32.mrf.mxu2 }
 0x987   :  { %2333 = vperm.xlu2 %4621, %v2208_v20   ;;  %2316 = vperm.xlu1 %4620, %v2208_v20  }
 0x988   :  { %2353 = vperm.xlu0 %4622, %v2208_v20  }
 0x98f   :  { %4623 = vset.pattern.permute.xlu1 %v7086_v41 }
 0x990   :  { %2373 = vperm.xlu1 %4623, %v2208_v20  }
 0x998   :  { %4624 = vset.pattern.permute.xlu1 %v7087_v7 }
 0x9ab   :  { %v2231_v32 = vpop.f32.mrf.mxu3 }
 0x9ac   :  { %2321 = vperm.xlu1 %4624, %v2231_v32  }
 0x9ad   :  { %2668 = vxpose.xlu2.b32.start.end [1/1] (short) (narrow) %v2130_v18, 64 }
 0x9b4   :  { %4625 = vset.pattern.permute.xlu1 %v7067_v63 }
 0x9b5   :  { %2337 = vperm.xlu1 %4625, %v2231_v32  }
 0x9bd   :  { %4626 = vset.pattern.permute.xlu1 %v7068_v48 }
 0x9be   :  { %2357 = vperm.xlu1 %4626, %v2231_v32  }
 0x9c6   :  { %4627 = vset.pattern.permute.xlu1 %v7086_v41  ;;  %v2361_v41 = vperm.slane %v7089_v13, 2 }
 0x9c7   :  { %2377 = vperm.xlu1 %4627, %v2231_v32   ;;  %v2360_v32 = vperm.slane %v7088_v12, 2 }
 0x9e1   :  { %v2334_v23 = vpop.permute.xlu2 %2333 }
 0x9e2   :  { %v2344_v63 = vmul.f32 %v2340_v22, %v2334_v23  ;;  %v2345_v45 = vmul.f32 %v2341_v2, %v2334_v23  ;;  %v2271_v2 = vpop.f32.mrf.mxu3 }
 0x9f9   :  { %v2317_v56 = vpop.permute.xlu1 %2316 }
 0x9fa   :  { %v2328_v18 = vmul.f32 %v2324_v28, %v2317_v56  ;;  %v2329_v20 = vmul.f32 %v2325_v30, %v2317_v56  ;;  %v2354_v48 = vpop.permute.xlu0 %2353 }
 0x9fb   :  { %v2364_v57 = vmul.f32 %v2360_v32, %v2354_v48  ;;  %v2365_v14 = vmul.f32 %v2361_v41, %v2354_v48  ;;  %v2393_v41 = vmul.f32 %v2271_v2, %v7089_v13 }
 0x9fc   :  { %2768 = vxpose.xlu1.b32.start.end [1/1] (short) (narrow) %v2185_v6, 64  ;;  %v2348_v17 = vadd.f32 %v2344_v63, %v2328_v18  ;;  %v2349_v60 = vadd.f32 %v2345_v45, %v2329_v20  ;;  %v2251_v45 = vpop.f32.mrf.mxu2 }
 0x9fd   :  { %v2392_v18 = vmul.f32 %v2251_v45, %v7088_v12 }
 0x9fe   :  { %v2368_v31 = vadd.f32 %v2364_v57, %v2348_v17  ;;  %v2369_v28 = vadd.f32 %v2365_v14, %v2349_v60  ;;  %v7092_v14 = vld [vmem:[#allocation35_spill] sm:$0xff]  ;;  %v7093_v60 = vld [vmem:[#allocation36_spill] sm:$0xff] }
 0x9ff   :  { %v2343_v17 = vperm.slane %v7093_v60, 1  ;;  %v2326_v12 = vperm.slane %v7092_v14, 0  ;;  %v2362_v13 = vperm.slane %v7092_v14, 2 }
 0xa02   :  { %v2374_v11 = vpop.permute.xlu1 %2373 }
 0xa03   :  { %v2384_v30 = vmul.f32 %v2380_v62, %v2374_v11  ;;  %v2385_v6 = vmul.f32 %v2381_v49, %v2374_v11 }
 0xa05   :  { %v2388_v56 = vadd.f32 %v2384_v30, %v2368_v31  ;;  %v2389_v23 = vadd.f32 %v2385_v6, %v2369_v28  ;;  %v2342_v31 = vperm.slane %v7092_v14, 1  ;;  %v2327_v28 = vperm.slane %v7093_v60, 0 }
 0xa07   :  { %v2396_v22 = vadd.f32 1e-06, %v2388_v56  ;;  %v2397_v63 = vadd.f32 1e-06, %v2389_v23  ;;  %v2363_v56 = vperm.slane %v7093_v60, 2 }
 0xa09   :  { %4741 = vrcp.f32 %v2396_v22 }
 0xa0a   :  { %4743 = vrcp.f32 %v2397_v63 }
 0xa0f   :  { %v4742_v48 = vpop.eup %4741 }
 0xa10   :  { %v4744_v20 = vpop.eup %4743  ;;  %v6039_v32 = vmul.f32 %v4742_v48, %v2392_v18  ;;  %v2382_v48 = vperm.slane %v7092_v14, 3 }
 0xa11   :  { %v6041_v57 = vmul.f32 %v4744_v20, %v2393_v41  ;;  %v2383_v41 = vperm.slane %v7093_v60, 3 }
 0xa12   :  { %7090 = vst [vmem:[#allocation40_spill] sm:$0xff] %v6039_v32  ;;  %2423 = vmatpush.xpose.msrb.mxu0 %v6039_v32 }
 0xa13   :  { %7091 = vst [vmem:[#allocation41_spill] sm:$0xff] %v6041_v57  ;;  %2464 = vmatpush.xpose.msrb.mxu1 %v6041_v57 }
 0xa15   :  { %2424 = vmatmul.f32.vlgmr.msrb.gmra.mxu0 %v5104_v34 }
 0xa16   :  { %2587 = vmatpush.xpose.msra.mxu0 %v6039_v32  ;;  %2465 = vmatmul.f32.vlgmr.msrb.gmra.mxu1 %v7069_v61 }
 0xa17   :  { %2607 = vmatpush.xpose.msra.mxu1 %v6041_v57 }
 0xa1d   :  { %2427 = vmatmul.f32.gmra.mxu0 %v5112_v38 }
 0xa1e   :  { %2468 = vmatmul.f32.gmra.mxu1 %v5114_v39  ;;  %v2322_v11 = vpop.permute.xlu1 %2321 }
 0xa1f   :  { %v2330_v23 = vmul.f32 %v2326_v12, %v2322_v11  ;;  %v2331_v22 = vmul.f32 %v2327_v28, %v2322_v11 }
 0xa25   :  { %2430 = vmatmul.f32.gmra.mxu0 %v5120_v42 }
 0xa26   :  { %2471 = vmatmul.f32.gmra.mxu1 %v5122_v43 }
 0xa27   :  { %v2338_v49 = vpop.permute.xlu1 %2337 }
 0xa28   :  { %v2346_v30 = vmul.f32 %v2342_v31, %v2338_v49  ;;  %v2347_v6 = vmul.f32 %v2343_v17, %v2338_v49 }
 0xa2a   :  { %v2350_v2 = vadd.f32 %v2346_v30, %v2330_v23  ;;  %v2351_v18 = vadd.f32 %v2347_v6, %v2331_v22  ;;  %v7099_v23 = vld [vmem:[#allocation46_spill] sm:$0xff]  ;;  %v7100_v22 = vld [vmem:[#allocation47_spill] sm:$0xff] }
 0xa2d   :  { %2433 = vmatmul.f32.gmra.mxu0 %v5128_v46 }
 0xa2e   :  { %2474 = vmatmul.f32.gmra.mxu1 %v5130_v47 }
 0xa30   :  { %v2358_v62 = vpop.permute.xlu1 %2357 }
 0xa31   :  { %v2366_v63 = vmul.f32 %v2362_v13, %v2358_v62  ;;  %v2367_v45 = vmul.f32 %v2363_v56, %v2358_v62  ;;  %v2291_v62 = vpop.f32.mrf.mxu2  ;;  %v2311_v13 = vpop.f32.mrf.mxu3 }
 0xa32   :  { %v2394_v28 = vmul.f32 %v2291_v62, %v7092_v14  ;;  %v2395_v6 = vmul.f32 %v2311_v13, %v7093_v60  ;;  %v7097_v14 = vld [vmem:[#allocation44_spill] sm:$0xff]  ;;  %v7098_v60 = vld [vmem:[#allocation45_spill] sm:$0xff] }
 0xa33   :  { %v2370_v61 = vadd.f32 %v2366_v63, %v2350_v2  ;;  %v2371_v31 = vadd.f32 %v2367_v45, %v2351_v18  ;;  %v7101_v63 = vld [vmem:[#allocation48_spill] sm:$0xff]  ;;  %v7102_v45 = vld [vmem:[#allocation49_spill] sm:$0xff]  ;;  %v7103_v2 = vld [vmem:[#allocation50_spill] sm:$0xff] }
 0xa35   :  { %2436 = vmatmul.f32.gmra.mxu0 %v5136_v50 }
 0xa36   :  { %2477 = vmatmul.f32.gmra.mxu1 %v5138_v51 }
 0xa39   :  { %v2378_v20 = vpop.permute.xlu1 %2377 }
 0xa3a   :  { %v2386_v49 = vmul.f32 %v2382_v48, %v2378_v20  ;;  %v2387_v17 = vmul.f32 %v2383_v41, %v2378_v20 }
 0xa3c   :  { %v2390_v39 = vadd.f32 %v2386_v49, %v2370_v61  ;;  %v2391_v43 = vadd.f32 %v2387_v17, %v2371_v31 }
 0xa3d   :  { %2439 = vmatmul.f32.gmra.mxu0 %v5144_v54 }
 0xa3e   :  { %v2398_v11 = vadd.f32 1e-06, %v2390_v39  ;;  %v2399_v12 = vadd.f32 1e-06, %v2391_v43  ;;  %2480 = vmatmul.f32.gmra.mxu1 %v5146_v55  ;;  %v7096_v43 = vld [vmem:[#allocation43_spill] sm:$0xff] }
 0xa40   :  { %4745 = vrcp.f32 %v2398_v11 }
 0xa41   :  { %4747 = vrcp.f32 %v2399_v12 }
 0xa45   :  { %2442 = vmatmul.f32.gmra.mxu0 %v6991_v3 }
 0xa46   :  { %v4746_v30 = vpop.eup %4745  ;;  %2483 = vmatmul.f32.gmra.mxu1 %v6992_v4 }
 0xa47   :  { %v4748_v61 = vpop.eup %4747  ;;  %v6071_v56 = vmul.f32 %v4746_v30, %v2394_v28 }
 0xa48   :  { %v6073_v39 = vmul.f32 %v4748_v61, %v2395_v6  ;;  %v2684_v61 = vpop.trf.xlu2 }
 0xa49   :  { %7094 = vst [vmem:[#allocation42_spill] sm:$0xff] %v6071_v56  ;;  %2505 = vmatpush.xpose.msrb.mxu2 %v6071_v56 }
 0xa4a   :  { %7095 = vst [vmem:[#allocation33_spill] sm:$0xff] %v6073_v39  ;;  %2546 = vmatpush.xpose.msrb.mxu3 %v6073_v39 }
 0xa4c   :  { %2506 = vmatmul.f32.vlgmr.msrb.gmra.mxu2 %v7077_v52 }
 0xa4d   :  { %2627 = vmatpush.xpose.msra.mxu2 %v6071_v56  ;;  %2547 = vmatmul.f32.vlgmr.msrb.gmra.mxu3 %v7085_v44 }
 0xa4e   :  { %2647 = vmatpush.xpose.msra.mxu3 %v6073_v39  ;;  %2445 = vmatmul.f32.gmra.mxu0 %v6995_v8 }
 0xa4f   :  { %2486 = vmatmul.f32.gmra.mxu1 %v6996_v9  ;;  %4628 = vset.pattern.permute.xlu1 %v7087_v7 }
 0xa51   :  { %2943 = vmatpush.msrb.mxu2 %v7096_v43 }
 0xa52   :  { %2998 = vmatpush.msrb.mxu3 %v7096_v43 }
 0xa53   :  { %2944 = vmatpush.msrb.mxu2 %v7097_v14 }
 0xa54   :  { %2999 = vmatpush.msrb.mxu3 %v7097_v14  ;;  %2509 = vmatmul.f32.gmra.mxu2 %v7076_v26 }
 0xa55   :  { %2945 = vmatpush.msrb.mxu2 %v7098_v60  ;;  %2550 = vmatmul.f32.gmra.mxu3 %v7084_v27 }
 0xa56   :  { %3000 = vmatpush.msrb.mxu3 %v7098_v60  ;;  %2588 = vmatmul.f32.vlgmr.msra.gmra.mxu0 %v6039_v32 }
 0xa57   :  { %2608 = vmatmul.f32.vlgmr.msra.gmra.mxu1 %v6041_v57  ;;  %2946 = vmatpush.msrb.mxu2 %v7099_v23 }
 0xa58   :  { %3001 = vmatpush.msrb.mxu3 %v7099_v23 }
 0xa59   :  { %2947 = vmatpush.msrb.mxu2 %v7100_v22 }
 0xa5a   :  { %3002 = vmatpush.msrb.mxu3 %v7100_v22  ;;  %v2685_v22 = vpop.trf.xlu2 }
 0xa5b   :  { %2948 = vmatpush.msrb.mxu2 %v7101_v63 }
 0xa5c   :  { %3003 = vmatpush.msrb.mxu3 %v7101_v63  ;;  %2512 = vmatmul.f32.gmra.mxu2 %v7075_v58 }
 0xa5d   :  { %2553 = vmatmul.f32.gmra.mxu3 %v7083_v5  ;;  %2949 = vmatpush.msrb.mxu2 %v7102_v45 }
 0xa5e   :  { %3004 = vmatpush.msrb.mxu3 %v7102_v45 }
 0xa5f   :  { %2950 = vmatpush.msrb.mxu2 %v7103_v2 }
 0xa60   :  { %3005 = vmatpush.msrb.mxu3 %v7103_v2 }
 0xa62   :  { %v2686_v57 = vpop.trf.xlu2 }
 0xa64   :  { %2515 = vmatmul.f32.gmra.mxu2 %v7074_v24 }
 0xa65   :  { %2556 = vmatmul.f32.gmra.mxu3 %v7082_v15 }
 0xa6a   :  { %v2687_v44 = vpop.trf.xlu2 }
 0xa6c   :  { %2518 = vmatmul.f32.gmra.mxu2 %v7073_v40 }
 0xa6d   :  { %2559 = vmatmul.f32.gmra.mxu3 %v7081_v59 }
 0xa74   :  { %2521 = vmatmul.f32.gmra.mxu2 %v7072_v1 }
 0xa75   :  { %2562 = vmatmul.f32.gmra.mxu3 %v7080_v25 }
 0xa7c   :  { %2524 = vmatmul.f32.gmra.mxu2 %v7071_v29 }
 0xa7d   :  { %2565 = vmatmul.f32.gmra.mxu3 %v7079_v19 }
 0xa84   :  { %2527 = vmatmul.f32.gmra.mxu2 %v7070_v53 }
 0xa85   :  { %2568 = vmatmul.f32.gmra.mxu3 %v7078_v36 }
 0xa8c   :  { %2628 = vmatmul.f32.vlgmr.msra.gmra.mxu2 %v6071_v56 }
 0xa8d   :  { %2648 = vmatmul.f32.vlgmr.msra.gmra.mxu3 %v6073_v39 }
 0xa92   :  { %v6118_v18 = vpop.f32.mrf.mxu0 }
 0xa93   :  { %v6120_v48 = vpop.f32.mrf.mxu1 }
 0xa9a   :  { %v6122_v41 = vpop.f32.mrf.mxu0 }
 0xa9b   :  { %v6124_v20 = vpop.f32.mrf.mxu1 }
 0xaa0   :  { %v2784_v19 = vpop.trf.xlu1 }
 0xaa2   :  { %v6126_v31 = vpop.f32.mrf.mxu0 }
 0xaa3   :  { %v6128_v49 = vpop.f32.mrf.mxu1 }
 0xaa8   :  { %v2785_v52 = vpop.trf.xlu1 }
 0xaaa   :  { %v6130_v17 = vpop.f32.mrf.mxu0 }
 0xaab   :  { %v6132_v11 = vpop.f32.mrf.mxu1 }
 0xab2   :  { %v6134_v12 = vpop.f32.mrf.mxu0 }
 0xab3   :  { %v6136_v62 = vpop.f32.mrf.mxu1 }
 0xaba   :  { %v6138_v13 = vpop.f32.mrf.mxu0 }
 0xabb   :  { %v6140_v28 = vpop.f32.mrf.mxu1 }
 0xac2   :  { %v6142_v30 = vpop.f32.mrf.mxu0 }
 0xac3   :  { %v6144_v6 = vpop.f32.mrf.mxu1 }
 0xacb   :  { %v6146_v43 = vpop.f32.mrf.mxu0 }
 0xacc   :  { %v6148_v14 = vpop.f32.mrf.mxu1 }
 0xacf   :  { %v6150_v60 = vpop.f32.mrf.mxu2 }
 0xad0   :  { %v6152_v23 = vpop.f32.mrf.mxu3 }
 0xad3   :  { %v2589_v63 = vpop.f32.mrf.mxu0 }
 0xad4   :  { %v2609_v45 = vpop.f32.mrf.mxu1 }
 0xad5   :  { %v2610_v2 = vadd.f32 %v2609_v45, %v2589_v63  ;;  %v2688_v45 = vpop.trf.xlu2 }
 0xad7   :  { %4498 = vmatpush.msk.msrb.mxu0 %vm506_vm2, %v2610_v2  ;;  %v6156_v39 = vpop.f32.mrf.mxu2 }
 0xad8   :  { %4499 = vmatmul.msk.f32.vlgmr.msrb.gmra.mxu0 %vm1055_vm3, %v2684_v61  ;;  %v6158_v56 = vpop.f32.mrf.mxu3 }
 0xadd   :  { %v2689_v15 = vpop.trf.xlu2 }
 0xadf   :  { %v6161_v32 = vpop.f32.mrf.mxu2 }
 0xae0   :  { %4500 = vmatmul.msk.f32.gmra.mxu0 %vm1055_vm3, %v2685_v22  ;;  %v6163_v7 = vpop.f32.mrf.mxu3 }
 0xae5   :  { %v2690_v25 = vpop.trf.xlu2 }
 0xae7   :  { %v6166_v27 = vpop.f32.mrf.mxu2 }
 0xae8   :  { %4501 = vmatmul.msk.f32.gmra.mxu0 %vm1055_vm3, %v2686_v57  ;;  %v6168_v63 = vpop.f32.mrf.mxu3 }
 0xaef   :  { %v6171_v61 = vpop.f32.mrf.mxu2 }
 0xaf0   :  { %4502 = vmatmul.msk.f32.gmra.mxu0 %vm1055_vm3, %v2687_v44  ;;  %v6173_v2 = vpop.f32.mrf.mxu3 }
 0xaf7   :  { %v6176_v22 = vpop.f32.mrf.mxu2 }
 0xaf8   :  { %4503 = vmatmul.msk.f32.gmra.mxu0 %vm1055_vm3, %v2688_v45  ;;  %v6178_v5 = vpop.f32.mrf.mxu3  ;;  %v2691_v45 = vpop.trf.xlu2 }
 0xaff   :  { %v6181_v57 = vpop.f32.mrf.mxu2 }
 0xb00   :  { %4504 = vmatmul.msk.f32.gmra.mxu0 %vm1055_vm3, %v2689_v15  ;;  %v6183_v59 = vpop.f32.mrf.mxu3  ;;  %v2786_v15 = vpop.trf.xlu1 }
 0xb07   :  { %v6186_v44 = vpop.f32.mrf.mxu2 }
 0xb08   :  { %4505 = vmatmul.msk.f32.gmra.mxu0 %vm1055_vm3, %v2690_v25  ;;  %v6188_v36 = vpop.f32.mrf.mxu3  ;;  %v2787_v40 = vpop.trf.xlu1 }
 0xb0f   :  { %v2629_v26 = vpop.f32.mrf.mxu2 }
 0xb10   :  { %4506 = vmatmul.msk.f32.gmra.mxu0 %vm1055_vm3, %v2691_v45  ;;  %v2649_v58 = vpop.f32.mrf.mxu3  ;;  %v2788_v25 = vpop.trf.xlu1 }
 0xb11   :  { %v2650_v24 = vadd.f32 %v2649_v58, %v2629_v26 }
 0xb13   :  { %4507 = vmatpush.msk.msrb.mxu1 %vm506_vm2, %v2650_v24 }
 0xb14   :  { %4508 = vmatmul.msk.f32.vlgmr.msrb.gmra.mxu1 %vm1055_vm3, %v2784_v19 }
 0xb18   :  { %v2789_v1 = vpop.trf.xlu1 }
 0xb1c   :  { %4509 = vmatmul.msk.f32.gmra.mxu1 %vm1055_vm3, %v2785_v52  ;;  %v2467_v52 = vadd.f32 %v6120_v48, %v6118_v18 }
 0xb1e   :  { %v2652_v19 = vmul.f32 %v2467_v52, %v5873_v10  ;;  %v2473_v10 = vadd.f32 %v6128_v49, %v6126_v31 }
 0xb20   :  { %v2790_v45 = vpop.trf.xlu1  ;;  %v2654_v18 = vmul.f32 %v2473_v10, %v5885_v0  ;;  %v2479_v0 = vadd.f32 %v6136_v62, %v6134_v12 }
 0xb24   :  { %4510 = vmatmul.msk.f32.gmra.mxu1 %vm1055_vm3, %v2786_v15 }
 0xb28   :  { %v2791_v24 = vpop.trf.xlu1 }
 0xb2c   :  { %4511 = vmatmul.msk.f32.gmra.mxu1 %vm1055_vm3, %v2787_v40 }
 0xb34   :  { %4512 = vmatmul.msk.f32.gmra.mxu1 %vm1055_vm3, %v2788_v25 }
 0xb3c   :  { %4513 = vmatmul.msk.f32.gmra.mxu1 %vm1055_vm3, %v2789_v1  ;;  %v2470_v1 = vadd.f32 %v6124_v20, %v6122_v41 }
 0xb44   :  { %4514 = vmatmul.msk.f32.gmra.mxu1 %vm1055_vm3, %v2790_v45  ;;  %v2653_v45 = vmul.f32 %v2470_v1, %v5879_v35  ;;  %v2476_v35 = vadd.f32 %v6132_v11, %v6130_v17 }
 0xb4c   :  { %4515 = vmatmul.msk.f32.gmra.mxu1 %vm1055_vm3, %v2791_v24 }
 0xb55   :  { %v2744_v58 = vpop.f32.mrf.mxu0 }
 0xb56   :  { %v2745_v26 = vadd.f32 1e-06, %v2744_v58 }
 0xb58   :  { %4749 = vrcp.f32 %v2745_v26 }
 0xb5d   :  { %v2747_v40 = vpop.f32.mrf.mxu0 }
 0xb5e   :  { %v4750_v15 = vpop.eup %4749  ;;  %v2748_v25 = vadd.f32 1e-06, %v2747_v40 }
 0xb5f   :  { %v6203_v29 = vmul.f32 %v4750_v15, %v2652_v19  ;;  %v2655_v19 = vmul.f32 %v2476_v35, %v5894_v33  ;;  %v2482_v33 = vadd.f32 %v6140_v28, %v6138_v13  ;;  %v7106_v35 = vld [vmem:[#allocation30_spill] sm:$0xff] }
 0xb60   :  { %4751 = vrcp.f32 %v2748_v25  ;;  %v2656_v25 = vmul.f32 %v2479_v0, %v5906_v37  ;;  %v2485_v37 = vadd.f32 %v6144_v6, %v6142_v30 }
 0xb61   :  { %2900 = vxpose.xlu2.b32.start [1/8] (short) (narrow) %v6203_v29, 8 }
 0xb62   :  { %v2658_v10 = vmul.f32 %v2485_v37, %v5930_v16  ;;  %v2549_v16 = vadd.f32 %v6152_v23, %v6150_v60  ;;  %v2552_v60 = vadd.f32 %v6158_v56, %v6156_v39  ;;  %v7110_v23 = vld [vmem:[#allocation25_spill] sm:$0xff]  ;;  %v2555_v56 = vadd.f32 %v6163_v7, %v6161_v32  ;;  %v7112_v39 = vld [vmem:[#allocation26_spill] sm:$0xff] }
 0xb65   :  { %v2750_v24 = vpop.f32.mrf.mxu0 }
 0xb66   :  { %v4752_v58 = vpop.eup %4751  ;;  %v2751_v26 = vadd.f32 1e-06, %v2750_v24  ;;  %v2657_v24 = vmul.f32 %v2482_v33, %v5918_v21  ;;  %v2488_v21 = vadd.f32 %v6148_v14, %v6146_v43 }
 0xb67   :  { %v6209_v53 = vmul.f32 %v4752_v58, %v2653_v45 }
 0xb68   :  { %4753 = vrcp.f32 %v2751_v26 }
 0xb69   :  { %2901 = vxpose.xlu2.b32.cont [2/8] (short) (narrow) %v6209_v53, 8 }
 0xb6d   :  { %v2753_v48 = vpop.f32.mrf.mxu0 }
 0xb6e   :  { %v4754_v52 = vpop.eup %4753  ;;  %v2754_v41 = vadd.f32 1e-06, %v2753_v48 }
 0xb6f   :  { %v6215_v20 = vmul.f32 %v4754_v52, %v2654_v18 }
 0xb70   :  { %4755 = vrcp.f32 %v2754_v41 }
 0xb71   :  { %2902 = vxpose.xlu2.b32.cont [3/8] (short) (narrow) %v6215_v20, 8 }
 0xb75   :  { %v2756_v40 = vpop.f32.mrf.mxu0 }
 0xb76   :  { %v4756_v15 = vpop.eup %4755  ;;  %v2757_v31 = vadd.f32 1e-06, %v2756_v40  ;;  %v7108_v40 = vld [vmem:[#allocation51_spill] sm:$0xff] }
 0xb77   :  { %v6221_v49 = vmul.f32 %v4756_v15, %v2655_v19  ;;  %v2659_v19 = vmul.f32 %v2488_v21, %v7106_v35  ;;  %v2660_v15 = vmul.f32 %v2549_v16, %v7108_v40  ;;  %v2564_v16 = vadd.f32 %v6178_v5, %v6176_v22  ;;  %v7118_v40 = vld [vmem:[#allocation37_spill] sm:$0xff] }
 0xb78   :  { %4757 = vrcp.f32 %v2757_v31 }
 0xb79   :  { %2903 = vxpose.xlu2.b32.cont [4/8] (short) (narrow) %v6221_v49, 8 }
 0xb7d   :  { %v2759_v1 = vpop.f32.mrf.mxu0 }
 0xb7e   :  { %v4758_v45 = vpop.eup %4757  ;;  %v2760_v17 = vadd.f32 1e-06, %v2759_v1 }
 0xb7f   :  { %v6227_v11 = vmul.f32 %v4758_v45, %v2656_v25  ;;  %v2661_v25 = vmul.f32 %v2552_v60, %v7110_v23  ;;  %v7120_v60 = vld [vmem:[#allocation38_spill] sm:$0xff] }
 0xb80   :  { %4759 = vrcp.f32 %v2760_v17 }
 0xb81   :  { %2904 = vxpose.xlu2.b32.cont [5/8] (short) (narrow) %v6227_v11, 8 }
 0xb85   :  { %v2762_v58 = vpop.f32.mrf.mxu0 }
 0xb86   :  { %v4760_v26 = vpop.eup %4759  ;;  %v2763_v12 = vadd.f32 1e-06, %v2762_v58 }
 0xb87   :  { %v6233_v62 = vmul.f32 %v4760_v26, %v2657_v24  ;;  %v2662_v24 = vmul.f32 %v2555_v56, %v7112_v39 }
 0xb88   :  { %4761 = vrcp.f32 %v2763_v12 }
 0xb89   :  { %7104 = vst [vmem:[#allocation34_spill] sm:$0xff] %v6233_v62  ;;  %2905 = vxpose.xlu2.b32.cont [6/8] (short) (narrow) %v6233_v62, 8 }
 0xb8d   :  { %v2765_v18 = vpop.f32.mrf.mxu0 }
 0xb8e   :  { %v4762_v48 = vpop.eup %4761  ;;  %v2766_v13 = vadd.f32 1e-06, %v2765_v18  ;;  %v7114_v18 = vld [vmem:[#allocation29_spill] sm:$0xff] }
 0xb8f   :  { %v6239_v28 = vmul.f32 %v4762_v48, %v2658_v10  ;;  %v2558_v10 = vadd.f32 %v6168_v63, %v6166_v27 }
 0xb90   :  { %4763 = vrcp.f32 %v2766_v13 }
 0xb91   :  { %7105 = vst [vmem:[#allocation35_spill] sm:$0xff] %v6239_v28  ;;  %2906 = vxpose.xlu2.b32.cont [7/8] (short) (narrow) %v6239_v28, 8  ;;  %v2844_v52 = vpop.f32.mrf.mxu1  ;;  %v2663_v48 = vmul.f32 %v2558_v10, %v7114_v18  ;;  %v7129_v18 = vld [vmem:[#allocation31_spill] sm:$0xff] }
 0xb92   :  { %v2845_v41 = vadd.f32 1e-06, %v2844_v52  ;;  %v2561_v52 = vadd.f32 %v6173_v2, %v6171_v61 }
 0xb94   :  { %4765 = vrcp.f32 %v2845_v41  ;;  %v7116_v41 = vld [vmem:[#allocation9_spill] sm:$0xff] }
 0xb95   :  { %v2664_v35 = vmul.f32 %v2561_v52, %v7116_v41  ;;  %v7134_v52 = vld [vmem:[#allocation17_spill] sm:$0xff]  ;;  %v7135_v41 = vld [vmem:[#allocation14_spill] sm:$0xff] }
 0xb96   :  { %v4764_v30 = vpop.eup %4763 }
 0xb97   :  { %v6247_v6 = vmul.f32 %v4764_v30, %v2659_v19 }
 0xb99   :  { %7107 = vst [vmem:[#allocation36_spill] sm:$0xff] %v6247_v6  ;;  %3021 = vmatpush.msra.mxu2 %v6247_v6  ;;  %2907 = vxpose.xlu2.b32.end [8/8] (short) (narrow) %v6247_v6, 8  ;;  %v2847_v43 = vpop.f32.mrf.mxu1 }
 0xb9a   :  { %v4766_v14 = vpop.eup %4765  ;;  %v2848_v31 = vadd.f32 1e-06, %v2847_v43 }
 0xb9b   :  { %3022 = vmatpush.msra.mxu2 %v6239_v28  ;;  %v6253_v0 = vmul.f32 %v4766_v14, %v2660_v15  ;;  %v2665_v15 = vmul.f32 %v2564_v16, %v7118_v40  ;;  %v7139_v16 = vld [vmem:[#allocation24_spill] sm:$0xff]  ;;  %v7140_v40 = vld [vmem:[#allocation22_spill] sm:$0xff] }
 0xb9c   :  { %4767 = vrcp.f32 %v2848_v31  ;;  %v2567_v31 = vadd.f32 %v6183_v59, %v6181_v57  ;;  %v7124_v59 = vmov 2   ;;  %v7125_v57 = vmov 1  }
 0xb9d   :  { %7109 = vst [vmem:[#allocation43_spill] sm:$0xff] %v6253_v0  ;;  %3023 = vmatpush.msra.mxu2 %v6233_v62  ;;  %2955 = vxpose.xlu0.b32.start [1/8] (short) (narrow) %v6253_v0, 8 }
 0xb9e   :  { %v2666_v23 = vmul.f32 %v2567_v31, %v7120_v60  ;;  %v7145_v60 = vmov 3  }
 0xb9f   :  { %3024 = vmatpush.msra.mxu2 %v6227_v11 }
 0xba1   :  { %3025 = vmatpush.msra.mxu2 %v6221_v49  ;;  %v2850_v1 = vpop.f32.mrf.mxu1 }
 0xba2   :  { %v4768_v45 = vpop.eup %4767  ;;  %v2851_v17 = vadd.f32 1e-06, %v2850_v1 }
 0xba3   :  { %3026 = vmatpush.msra.mxu2 %v6215_v20  ;;  %v6263_v33 = vmul.f32 %v4768_v45, %v2661_v25  ;;  %v2570_v45 = vadd.f32 %v6188_v36, %v6186_v44 }
 0xba4   :  { %4769 = vrcp.f32 %v2851_v17  ;;  %v7122_v17 = vld [vmem:[#allocation39_spill] sm:$0xff] }
 0xba5   :  { %7111 = vst [vmem:[#allocation44_spill] sm:$0xff] %v6263_v33  ;;  %3027 = vmatpush.msra.mxu2 %v6209_v53  ;;  %2956 = vxpose.xlu0.b32.cont [2/8] (short) (narrow) %v6263_v33, 8  ;;  %v2667_v56 = vmul.f32 %v2570_v45, %v7122_v17  ;;  %v7148_v45 = vld [vmem:[#allocation41_spill] sm:$0xff] }
 0xba6   :  { %v3147_v17 = vperm.slane %v7148_v45, 0 }
 0xba7   :  { %3028 = vmatpush.msra.mxu2 %v6203_v29 }
 0xba9   :  { %v2853_v58 = vpop.f32.mrf.mxu1 }
 0xbaa   :  { %v4770_v26 = vpop.eup %4769  ;;  %v2854_v12 = vadd.f32 1e-06, %v2853_v58  ;;  %v7126_v58 = vld [vmem:[#allocation16_spill] sm:$0xff] }
 0xbab   :  { %v6271_v37 = vmul.f32 %v4770_v26, %v2662_v24  ;;  %v7127_v26 = vld [vmem:[#allocation13_spill] sm:$0xff] }
 0xbac   :  { %4771 = vrcp.f32 %v2854_v12  ;;  %v7128_v12 = vld [vmem:[#allocation10_spill] sm:$0xff] }
 0xbad   :  { %7113 = vst [vmem:[#allocation45_spill] sm:$0xff] %v6271_v37  ;;  %2957 = vxpose.xlu0.b32.cont [3/8] (short) (narrow) %v6271_v37, 8 }
 0xbb1   :  { %v2856_v7 = vpop.f32.mrf.mxu1 }
 0xbb2   :  { %v4772_v32 = vpop.eup %4771  ;;  %v2857_v13 = vadd.f32 1e-06, %v2856_v7  ;;  %v7131_v7 = vld [vmem:[#allocation23_spill] sm:$0xff] }
 0xbb3   :  { %v6277_v21 = vmul.f32 %v4772_v32, %v2663_v48  ;;  %v7130_v48 = vld [vmem:[#allocation27_spill] sm:$0xff]  ;;  %v7132_v32 = vld [vmem:[#allocation21_spill] sm:$0xff] }
 0xbb4   :  { %4773 = vrcp.f32 %v2857_v13  ;;  %v7133_v13 = vld [vmem:[#allocation19_spill] sm:$0xff] }
 0xbb5   :  { %7115 = vst [vmem:[#allocation46_spill] sm:$0xff] %v6277_v21  ;;  %2958 = vxpose.xlu0.b32.cont [4/8] (short) (narrow) %v6277_v21, 8 }
 0xbb9   :  { %v2859_v19 = vpop.f32.mrf.mxu1 }
 0xbba   :  { %v4774_v30 = vpop.eup %4773  ;;  %v2860_v27 = vadd.f32 1e-06, %v2859_v19 }
 0xbbb   :  { %v6283_v63 = vmul.f32 %v4774_v30, %v2664_v35  ;;  %v7136_v35 = vld [vmem:[#allocation11_spill] sm:$0xff]  ;;  %v7137_v30 = vld [vmem:[#allocation32_spill] sm:$0xff] }
 0xbbc   :  { %4775 = vrcp.f32 %v2860_v27  ;;  %v7138_v27 = vld [vmem:[#allocation28_spill] sm:$0xff] }
 0xbbd   :  { %7117 = vst [vmem:[#allocation47_spill] sm:$0xff] %v6283_v63  ;;  %2959 = vxpose.xlu0.b32.cont [5/8] (short) (narrow) %v6283_v63, 8 }
 0xbc1   :  { %v2862_v43 = vpop.f32.mrf.mxu1 }
 0xbc2   :  { %v4776_v14 = vpop.eup %4775  ;;  %v2863_v61 = vadd.f32 1e-06, %v2862_v43  ;;  %v7142_v43 = vld [vmem:[#allocation18_spill] sm:$0xff] }
 0xbc3   :  { %v6289_v2 = vmul.f32 %v4776_v14, %v2665_v15  ;;  %v7141_v15 = vld [vmem:[#allocation20_spill] sm:$0xff]  ;;  %v7143_v14 = vld [vmem:[#allocation15_spill] sm:$0xff] }
 0xbc4   :  { %4777 = vrcp.f32 %v2863_v61  ;;  %v7144_v61 = vld [vmem:[#allocation12_spill] sm:$0xff] }
 0xbc5   :  { %7119 = vst [vmem:[#allocation48_spill] sm:$0xff] %v6289_v2  ;;  %2960 = vxpose.xlu0.b32.cont [6/8] (short) (narrow) %v6289_v2, 8 }
 0xbc9   :  { %v2865_v25 = vpop.f32.mrf.mxu1 }
 0xbca   :  { %v4778_v1 = vpop.eup %4777  ;;  %v2866_v5 = vadd.f32 1e-06, %v2865_v25 }
 0xbcb   :  { %v6295_v22 = vmul.f32 %v4778_v1, %v2666_v23  ;;  %v7146_v23 = vmov 0   ;;  %v7147_v1 = vld [vmem:[#allocation40_spill] sm:$0xff] }
 0xbcc   :  { %4779 = vrcp.f32 %v2866_v5  ;;  %v3146_v5 = vperm.slane %v7147_v1, 0 }
 0xbcd   :  { %7121 = vst [vmem:[#allocation49_spill] sm:$0xff] %v6295_v22  ;;  %2961 = vxpose.xlu0.b32.cont [7/8] (short) (narrow) %v6295_v22, 8 }
 0xbd2   :  { %v4780_v39 = vpop.eup %4779 }
 0xbd3   :  { %v6301_v24 = vmul.f32 %v4780_v39, %v2667_v56  ;;  %v3162_v39 = vperm.slane %v7147_v1, 1 }
 0xbd5   :  { %7123 = vst [vmem:[#allocation50_spill] sm:$0xff] %v6301_v24  ;;  %3044 = vmatpush.msra.mxu3 %v6301_v24  ;;  %2962 = vxpose.xlu0.b32.end [8/8] (short) (narrow) %v6301_v24, 8 }
 0xbd7   :  { %3045 = vmatpush.msra.mxu3 %v6295_v22 }
 0xbd9   :  { %3046 = vmatpush.msra.mxu3 %v6289_v2 }
 0xbdb   :  { %3047 = vmatpush.msra.mxu3 %v6283_v63 }
 0xbdd   :  { %3048 = vmatpush.msra.mxu3 %v6277_v21 }
 0xbdf   :  { %3049 = vmatpush.msra.mxu3 %v6271_v37  ;;  %v3202_v37 = vperm.slane %v7147_v1, 3 }
 0xbe1   :  { %3050 = vmatpush.msra.mxu3 %v6263_v33  ;;  %v3203_v33 = vperm.slane %v7148_v45, 3 }
 0xbe3   :  { %3051 = vmatpush.msra.mxu3 %v6253_v0 }
 0xbfa   :  { %v2916_v36 = vpop.trf.xlu2 }
 0xbfb   :  { %4516 = vmatmul.msk.f32.vlgmr.msrb.gmra.mxu2 %vm387_vm1, %v2916_v36  ;;  %4630 = vset.pattern.permute.xlu2 %v7124_v59 }
 0xbfc   :  { %3064 = vmatpush.msrb.mxu2 %v6995_v8 }
 0xbfe   :  { %3065 = vmatpush.msrb.mxu2 %v6991_v3 }
 0xc00   :  { %3066 = vmatpush.msrb.mxu2 %v5144_v54 }
 0xc02   :  { %3067 = vmatpush.msrb.mxu2 %v5136_v50 }
 0xc04   :  { %3068 = vmatpush.msrb.mxu2 %v5128_v46 }
 0xc06   :  { %3069 = vmatpush.msrb.mxu2 %v5120_v42 }
 0xc08   :  { %3070 = vmatpush.msrb.mxu2 %v5112_v38 }
 0xc0a   :  { %3071 = vmatpush.msrb.mxu2 %v5104_v34 }
 0xc3c   :  { %4629 = vset.pattern.permute.xlu0 %v7125_v57 }
 0xc41   :  { %v2971_v44 = vpop.trf.xlu0 }
 0xc42   :  { %4517 = vmatmul.msk.f32.vlgmr.msrb.gmra.mxu3 %vm387_vm1, %v2971_v44 }
 0xc43   :  { %3084 = vmatpush.msrb.mxu3 %v6996_v9 }
 0xc45   :  { %3085 = vmatpush.msrb.mxu3 %v6992_v4 }
 0xc47   :  { %3086 = vmatpush.msrb.mxu3 %v5146_v55 }
 0xc49   :  { %3087 = vmatpush.msrb.mxu3 %v5138_v51 }
 0xc4b   :  { %3088 = vmatpush.msrb.mxu3 %v5130_v47 }
 0xc4d   :  { %3089 = vmatpush.msrb.mxu3 %v7126_v58 }
 0xc4f   :  { %3090 = vmatpush.msrb.mxu3 %v7127_v26 }
 0xc51   :  { %3091 = vmatpush.msrb.mxu3 %v7128_v12 }
 0xc7e   :  { %v2952_v10 = vpop.f32.mrf.mxu2 }
 0xc7f   :  { %4518 = vmatmul.msk.f32.vlgmr.msra.gmra.mxu2 %vm387_vm1, %v2952_v10 }
 0xc80   :  { %3104 = vmatpush.msra.mxu2 %v7129_v18 }
 0xc82   :  { %3105 = vmatpush.msra.mxu2 %v7130_v48 }
 0xc84   :  { %3106 = vmatpush.msra.mxu2 %v7131_v7 }
 0xc86   :  { %3107 = vmatpush.msra.mxu2 %v7132_v32 }
 0xc87   :  { %4520 = vmatmul.msk.f32.vlgmr.msrb.gmra.mxu2 %vm387_vm1, %v2916_v36 }
 0xc88   :  { %3108 = vmatpush.msra.mxu2 %v7133_v13 }
 0xc8a   :  { %3109 = vmatpush.msra.mxu2 %v7134_v52 }
 0xc8c   :  { %3110 = vmatpush.msra.mxu2 %v7135_v41 }
 0xc8e   :  { %3111 = vmatpush.msra.mxu2 %v7136_v35 }
 0xc8f   :  { %4522 = vmatmul.msk.f32.vlgmr.msra.gmra.mxu2 %vm387_vm1, %v2971_v44 }
 0xcc5   :  { %v6343_v19 = vpop.f32.mrf.mxu3 }
 0xcc6   :  { %4519 = vmatmul.msk.f32.vlgmr.msra.gmra.mxu3 %vm387_vm1, %v6343_v19 }
 0xcc7   :  { %3124 = vmatpush.msra.mxu3 %v7137_v30 }
 0xcc9   :  { %3125 = vmatpush.msra.mxu3 %v7138_v27 }
 0xccb   :  { %3126 = vmatpush.msra.mxu3 %v7139_v16 }
 0xccd   :  { %3127 = vmatpush.msra.mxu3 %v7140_v40 }
 0xcce   :  { %4521 = vmatmul.msk.f32.vlgmr.msrb.gmra.mxu3 %vm387_vm1, %v2916_v36  ;;  %v3163_v36 = vperm.slane %v7148_v45, 1 }
 0xccf   :  { %3128 = vmatpush.msra.mxu3 %v7141_v15 }
 0xcd1   :  { %3129 = vmatpush.msra.mxu3 %v7142_v43 }
 0xcd3   :  { %3130 = vmatpush.msra.mxu3 %v7143_v14 }
 0xcd5   :  { %3131 = vmatpush.msra.mxu3 %v7144_v61 }
 0xcd6   :  { %4523 = vmatmul.msk.f32.vlgmr.msra.gmra.mxu3 %vm387_vm1, %v2971_v44 }
 0xd02   :  { %v3030_v31 = vpop.f32.mrf.mxu2 }
 0xd03   :  { %3175 = vperm.xlu2 %4630, %v3030_v31   ;;  %3138 = vperm.xlu1 %4628, %v3030_v31  }
 0xd04   :  { %3155 = vperm.xlu0 %4629, %v3030_v31  }
 0xd0a   :  { %v3073_v62 = vpop.f32.mrf.mxu2 }
 0xd0b   :  { %4631 = vset.pattern.permute.xlu1 %v7145_v60 }
 0xd0c   :  { %3195 = vperm.xlu1 %4631, %v3030_v31  }
 0xd14   :  { %4632 = vset.pattern.permute.xlu1 %v7146_v23 }
 0xd26   :  { %3490 = vxpose.xlu0.b32.start.end [1/1] (short) (narrow) %v2952_v10, 64 }
 0xd49   :  { %v3053_v25 = vpop.f32.mrf.mxu3 }
 0xd4a   :  { %3143 = vperm.xlu1 %4632, %v3053_v25  }
 0xd52   :  { %4633 = vset.pattern.permute.xlu1 %v7125_v57 }
 0xd53   :  { %3159 = vperm.xlu1 %4633, %v3053_v25  }
 0xd5b   :  { %4634 = vset.pattern.permute.xlu1 %v7124_v59  ;;  %v3182_v59 = vperm.slane %v7147_v1, 2 }
 0xd5c   :  { %3179 = vperm.xlu1 %4634, %v3053_v25  }
 0xd5d   :  { %v3176_v22 = vpop.permute.xlu2 %3175 }
 0xd5e   :  { %v3186_v63 = vmul.f32 %v3182_v59, %v3176_v22 }
 0xd64   :  { %4635 = vset.pattern.permute.xlu1 %v7145_v60  ;;  %v3183_v60 = vperm.slane %v7148_v45, 2 }
 0xd65   :  { %3199 = vperm.xlu1 %4635, %v3053_v25  }
 0xd66   :  { %v3187_v21 = vmul.f32 %v3183_v60, %v3176_v22 }
 0xd75   :  { %v3139_v56 = vpop.permute.xlu1 %3138 }
 0xd76   :  { %v3156_v44 = vpop.permute.xlu0 %3155  ;;  %v3150_v10 = vmul.f32 %v3146_v5, %v3139_v56  ;;  %v3151_v31 = vmul.f32 %v3147_v17, %v3139_v56 }
 0xd77   :  { %v3166_v57 = vmul.f32 %v3162_v39, %v3156_v44  ;;  %v3167_v24 = vmul.f32 %v3163_v36, %v3156_v44 }
 0xd79   :  { %v3170_v25 = vadd.f32 %v3166_v57, %v3150_v10  ;;  %v3171_v2 = vadd.f32 %v3167_v24, %v3151_v31  ;;  %v3093_v57 = vpop.f32.mrf.mxu3  ;;  %v3214_v24 = vmul.f32 %v3073_v62, %v7147_v1 }
 0xd7a   :  { %v3215_v59 = vmul.f32 %v3093_v57, %v7148_v45 }
 0xd7b   :  { %v3190_v6 = vadd.f32 %v3186_v63, %v3170_v25  ;;  %v3191_v28 = vadd.f32 %v3187_v21, %v3171_v2 }
 0xd7e   :  { %v3196_v0 = vpop.permute.xlu1 %3195 }
 0xd7f   :  { %v3206_v5 = vmul.f32 %v3202_v37, %v3196_v0  ;;  %v3207_v17 = vmul.f32 %v3203_v33, %v3196_v0  ;;  %v7151_v0 = vld [vmem:[#allocation42_spill] sm:$0xff]  ;;  %v7152_v37 = vld [vmem:[#allocation33_spill] sm:$0xff] }
 0xd80   :  { %v3164_v33 = vperm.slane %v7151_v0, 1  ;;  %v3165_v21 = vperm.slane %v7152_v37, 1  ;;  %v3148_v2 = vperm.slane %v7151_v0, 0  ;;  %v3149_v1 = vperm.slane %v7152_v37, 0 }
 0xd81   :  { %v3210_v56 = vadd.f32 %v3206_v5, %v3190_v6  ;;  %v3211_v39 = vadd.f32 %v3207_v17, %v3191_v28  ;;  %v3185_v25 = vperm.slane %v7152_v37, 2  ;;  %v3204_v57 = vperm.slane %v7151_v0, 3 }
 0xd83   :  { %v3218_v36 = vadd.f32 1e-06, %v3210_v56  ;;  %v3219_v44 = vadd.f32 1e-06, %v3211_v39 }
 0xd85   :  { %4781 = vrcp.f32 %v3218_v36 }
 0xd86   :  { %4783 = vrcp.f32 %v3219_v44 }
 0xd8b   :  { %v4782_v22 = vpop.eup %4781 }
 0xd8c   :  { %v4784_v60 = vpop.eup %4783  ;;  %v6372_v10 = vmul.f32 %v4782_v22, %v3214_v24  ;;  %v3205_v24 = vperm.slane %v7152_v37, 3 }
 0xd8d   :  { %v6374_v63 = vmul.f32 %v4784_v60, %v3215_v59 }
 0xd8e   :  { %7149 = vst [vmem:[#allocation30_spill] sm:$0xff] %v6372_v10  ;;  %3245 = vmatpush.xpose.msra.mxu0 %v6372_v10 }
 0xd8f   :  { %7150 = vst [vmem:[#allocation51_spill] sm:$0xff] %v6374_v63  ;;  %3286 = vmatpush.xpose.msra.mxu1 %v6374_v63 }
 0xd91   :  { %3246 = vmatmul.f32.vlgmr.msra.gmra.mxu0 %v5104_v34 }
 0xd92   :  { %3409 = vmatpush.xpose.msrb.mxu0 %v6372_v10  ;;  %3287 = vmatmul.f32.vlgmr.msra.gmra.mxu1 %v7128_v12 }
 0xd93   :  { %3429 = vmatpush.xpose.msrb.mxu1 %v6374_v63 }
 0xd99   :  { %3249 = vmatmul.f32.gmra.mxu0 %v5112_v38 }
 0xd9a   :  { %3290 = vmatmul.f32.gmra.mxu1 %v7127_v26  ;;  %3590 = vxpose.xlu1.b32.start.end [1/1] (short) (narrow) %v6343_v19, 64  ;;  %v3184_v19 = vperm.slane %v7151_v0, 2 }
 0xda1   :  { %3252 = vmatmul.f32.gmra.mxu0 %v5120_v42 }
 0xda2   :  { %3293 = vmatmul.f32.gmra.mxu1 %v7126_v58 }
 0xda9   :  { %3255 = vmatmul.f32.gmra.mxu0 %v5128_v46 }
 0xdaa   :  { %3296 = vmatmul.f32.gmra.mxu1 %v5130_v47 }
 0xdb1   :  { %3258 = vmatmul.f32.gmra.mxu0 %v5136_v50 }
 0xdb2   :  { %3299 = vmatmul.f32.gmra.mxu1 %v5138_v51 }
 0xdb9   :  { %3261 = vmatmul.f32.gmra.mxu0 %v5144_v54 }
 0xdba   :  { %3302 = vmatmul.f32.gmra.mxu1 %v5146_v55 }
 0xdbc   :  { %v3144_v62 = vpop.permute.xlu1 %3143 }
 0xdbd   :  { %v3152_v5 = vmul.f32 %v3148_v2, %v3144_v62  ;;  %v3153_v17 = vmul.f32 %v3149_v1, %v3144_v62  ;;  %v3113_v62 = vpop.f32.mrf.mxu2  ;;  %v3133_v2 = vpop.f32.mrf.mxu3 }
 0xdbe   :  { %v3217_v1 = vmul.f32 %v3133_v2, %v7152_v37  ;;  %v4856_v37 = vld [vmem:[%s6776_s2 + $0x18] sm:$0xff] }
 0xdc1   :  { %3264 = vmatmul.f32.gmra.mxu0 %v6991_v3 }
 0xdc2   :  { %3305 = vmatmul.f32.gmra.mxu1 %v6992_v4 }
 0xdc5   :  { %v3160_v28 = vpop.permute.xlu1 %3159 }
 0xdc6   :  { %v3168_v45 = vmul.f32 %v3164_v33, %v3160_v28  ;;  %v3169_v31 = vmul.f32 %v3165_v21, %v3160_v28 }
 0xdc8   :  { %v3172_v36 = vadd.f32 %v3168_v45, %v3152_v5  ;;  %v3173_v44 = vadd.f32 %v3169_v31, %v3153_v17  ;;  %v4857_v5 = vld [vmem:[%s6776_s2 + $0x10] sm:$0xff]  ;;  %v4858_v17 = vld [vmem:[%s6776_s2 + $0x8] sm:$0xff] }
 0xdc9   :  { %3267 = vmatmul.f32.gmra.mxu0 %v6995_v8 }
 0xdca   :  { %3308 = vmatmul.f32.gmra.mxu1 %v6996_v9 }
 0xdce   :  { %v3180_v6 = vpop.permute.xlu1 %3179 }
 0xdcf   :  { %v3188_v56 = vmul.f32 %v3184_v19, %v3180_v6  ;;  %v3189_v39 = vmul.f32 %v3185_v25, %v3180_v6  ;;  %v3216_v6 = vmul.f32 %v3113_v62, %v7151_v0  ;;  %v4855_v0 = vld [vmem:[%s6776_s2 + $0x20] sm:$0xff] }
 0xdd1   :  { %3410 = vmatmul.f32.vlgmr.msrb.gmra.mxu0 %v6372_v10  ;;  %v3192_v59 = vadd.f32 %v3188_v56, %v3172_v36  ;;  %v3193_v60 = vadd.f32 %v3189_v39, %v3173_v44  ;;  %v4859_v56 = vld [vmem:[%s6776_s2] sm:$0xff] }
 0xdd2   :  { %3430 = vmatmul.f32.vlgmr.msrb.gmra.mxu1 %v6374_v63 }
 0xdd7   :  { %v3200_v22 = vpop.permute.xlu1 %3199 }
 0xdd8   :  { %v3208_v63 = vmul.f32 %v3204_v57, %v3200_v22  ;;  %v3209_v10 = vmul.f32 %v3205_v24, %v3200_v22 }
 0xdda   :  { %v3212_v12 = vadd.f32 %v3208_v63, %v3192_v59  ;;  %v3213_v33 = vadd.f32 %v3209_v10, %v3193_v60  ;;  %v4853_v10 = vld [vmem:[%s6776_s2 + $0x30] sm:$0xff]  ;;  %v4854_v63 = vld [vmem:[%s6776_s2 + $0x28] sm:$0xff] }
 0xddc   :  { %v3220_v28 = vadd.f32 1e-06, %v3212_v12  ;;  %v3221_v21 = vadd.f32 1e-06, %v3213_v33  ;;  %v4852_v12 = vld [vmem:[%s6776_s2 + $0x38] sm:$0xff]  ;;  %s4921_s2 = smov [#allocation6]  }
 0xddd   :  { %s4387_s7 = sshll.u32 %s4921_s2, 4  ;;  %s4388_s7 = int_to_ptr.vmem [resolvable:$true] %s4387_s7 }
 0xdde   :  { %4785 = vrcp.f32 %v3220_v28 }
 0xddf   :  { %4787 = vrcp.f32 %v3221_v21 }
 0xde4   :  { %v4786_v19 = vpop.eup %4785 }
 0xde5   :  { %v4788_v45 = vpop.eup %4787  ;;  %v6409_v31 = vmul.f32 %v4786_v19, %v3216_v6 }
 0xde6   :  { %v6411_v25 = vmul.f32 %v4788_v45, %v3217_v1 }
 0xde7   :  { %7153 = vst [vmem:[#allocation25_spill] sm:$0xff] %v6409_v31  ;;  %3327 = vmatpush.xpose.msrb.mxu2 %v6409_v31 }
 0xde8   :  { %7154 = vst [vmem:[#allocation26_spill] sm:$0xff] %v6411_v25  ;;  %3368 = vmatpush.xpose.msrb.mxu3 %v6411_v25 }
 0xdea   :  { %3328 = vmatmul.f32.vlgmr.msrb.gmra.mxu2 %v7136_v35 }
 0xdeb   :  { %3449 = vmatpush.xpose.msra.mxu2 %v6409_v31  ;;  %3369 = vmatmul.f32.vlgmr.msrb.gmra.mxu3 %v7144_v61 }
 0xdec   :  { %3469 = vmatpush.xpose.msra.mxu3 %v6411_v25 }
 0xded   :  { %4636 = vset.pattern.permute.xlu1 %v7146_v23 }
 0xdef   :  { %3765 = vmatpush.msrb.mxu2 %v4852_v12 }
 0xdf0   :  { %3820 = vmatpush.msrb.mxu3 %v4852_v12 }
 0xdf1   :  { %3766 = vmatpush.msrb.mxu2 %v4853_v10 }
 0xdf2   :  { %3821 = vmatpush.msrb.mxu3 %v4853_v10  ;;  %3331 = vmatmul.f32.gmra.mxu2 %v7135_v41  ;;  %v3506_v10 = vpop.trf.xlu0 }
 0xdf3   :  { %3767 = vmatpush.msrb.mxu2 %v4854_v63  ;;  %3372 = vmatmul.f32.gmra.mxu3 %v7143_v14 }
 0xdf4   :  { %3822 = vmatpush.msrb.mxu3 %v4854_v63 }
 0xdf5   :  { %3768 = vmatpush.msrb.mxu2 %v4855_v0 }
 0xdf6   :  { %3823 = vmatpush.msrb.mxu3 %v4855_v0 }
 0xdf7   :  { %3769 = vmatpush.msrb.mxu2 %v4856_v37 }
 0xdf8   :  { %3824 = vmatpush.msrb.mxu3 %v4856_v37 }
 0xdf9   :  { %3770 = vmatpush.msrb.mxu2 %v4857_v5 }
 0xdfa   :  { %3825 = vmatpush.msrb.mxu3 %v4857_v5  ;;  %3334 = vmatmul.f32.gmra.mxu2 %v7134_v52  ;;  %v3507_v5 = vpop.trf.xlu0 }
 0xdfb   :  { %3771 = vmatpush.msrb.mxu2 %v4858_v17  ;;  %3375 = vmatmul.f32.gmra.mxu3 %v7142_v43 }
 0xdfc   :  { %3826 = vmatpush.msrb.mxu3 %v4858_v17 }
 0xdfd   :  { %3772 = vmatpush.msrb.mxu2 %v4859_v56 }
 0xdfe   :  { %3827 = vmatpush.msrb.mxu3 %v4859_v56 }
 0xe02   :  { %3337 = vmatmul.f32.gmra.mxu2 %v7133_v13 }
 0xe03   :  { %3378 = vmatmul.f32.gmra.mxu3 %v7141_v15 }
 0xe0a   :  { %3340 = vmatmul.f32.gmra.mxu2 %v7132_v32 }
 0xe0b   :  { %3381 = vmatmul.f32.gmra.mxu3 %v7140_v40 }
 0xe0e   :  { %v6452_v39 = vpop.f32.mrf.mxu0 }
 0xe0f   :  { %v6454_v36 = vpop.f32.mrf.mxu1 }
 0xe12   :  { %3343 = vmatmul.f32.gmra.mxu2 %v7131_v7 }
 0xe13   :  { %3384 = vmatmul.f32.gmra.mxu3 %v7139_v16 }
 0xe16   :  { %v6458_v44 = vpop.f32.mrf.mxu0 }
 0xe17   :  { %v6460_v57 = vpop.f32.mrf.mxu1 }
 0xe1a   :  { %3346 = vmatmul.f32.gmra.mxu2 %v7130_v48 }
 0xe1b   :  { %3387 = vmatmul.f32.gmra.mxu3 %v7138_v27 }
 0xe1e   :  { %v6464_v24 = vpop.f32.mrf.mxu0 }
 0xe1f   :  { %v6466_v22 = vpop.f32.mrf.mxu1 }
 0xe22   :  { %3349 = vmatmul.f32.gmra.mxu2 %v7129_v18 }
 0xe23   :  { %3390 = vmatmul.f32.gmra.mxu3 %v7137_v30 }
 0xe26   :  { %v3256_v59 = vpop.f32.mrf.mxu0 }
 0xe27   :  { %v3297_v60 = vpop.f32.mrf.mxu1 }
 0xe28   :  { %v6470_v33 = vadd.f32 %v3297_v60, %v3256_v59  ;;  %v3508_v60 = vpop.trf.xlu0 }
 0xe2a   :  { %3450 = vmatmul.f32.vlgmr.msra.gmra.mxu2 %v6409_v31 }
 0xe2b   :  { %3470 = vmatmul.f32.vlgmr.msra.gmra.mxu3 %v6411_v25 }
 0xe2e   :  { %v3259_v28 = vpop.f32.mrf.mxu0 }
 0xe2f   :  { %v3300_v21 = vpop.f32.mrf.mxu1 }
 0xe30   :  { %v6474_v62 = vadd.f32 %v3300_v21, %v3259_v28  ;;  %v3509_v28 = vpop.trf.xlu0 }
 0xe36   :  { %v3262_v2 = vpop.f32.mrf.mxu0 }
 0xe37   :  { %v3303_v6 = vpop.f32.mrf.mxu1 }
 0xe38   :  { %v6476_v19 = vadd.f32 %v3303_v6, %v3262_v2  ;;  %v3510_v21 = vpop.trf.xlu0 }
 0xe3e   :  { %v3265_v1 = vpop.f32.mrf.mxu0 }
 0xe3f   :  { %v3306_v45 = vpop.f32.mrf.mxu1 }
 0xe40   :  { %v6478_v12 = vadd.f32 %v3306_v45, %v3265_v1  ;;  %v3511_v45 = vpop.trf.xlu0 }
 0xe46   :  { %v3268_v63 = vpop.f32.mrf.mxu0 }
 0xe47   :  { %v3309_v0 = vpop.f32.mrf.mxu1 }
 0xe48   :  { %v6480_v37 = vadd.f32 %v3309_v0, %v3268_v63 }
 0xe4e   :  { %v3411_v17 = vpop.f32.mrf.mxu0 }
 0xe4f   :  { %v3431_v56 = vpop.f32.mrf.mxu1 }
 0xe50   :  { %v3432_v59 = vadd.f32 %v3431_v56, %v3411_v17 }
 0xe52   :  { %4524 = vmatpush.msk.msra.mxu0 %vm506_vm2, %v3432_v59 }
 0xe53   :  { %4525 = vmatmul.msk.f32.vlgmr.msra.gmra.mxu0 %vm1055_vm3, %v3506_v10 }
 0xe5b   :  { %4526 = vmatmul.msk.f32.gmra.mxu0 %vm1055_vm3, %v3507_v5  ;;  %v3512_v5 = vpop.trf.xlu0 }
 0xe63   :  { %4527 = vmatmul.msk.f32.gmra.mxu0 %vm1055_vm3, %v3508_v60 }
 0xe6b   :  { %4528 = vmatmul.msk.f32.gmra.mxu0 %vm1055_vm3, %v3509_v28 }
 0xe6d   :  { %v3329_v2 = vpop.f32.mrf.mxu2 }
 0xe6e   :  { %v3370_v6 = vpop.f32.mrf.mxu3 }
 0xe6f   :  { %v6487_v1 = vadd.f32 %v3370_v6, %v3329_v2  ;;  %v3513_v6 = vpop.trf.xlu0 }
 0xe73   :  { %4529 = vmatmul.msk.f32.gmra.mxu0 %vm1055_vm3, %v3510_v21 }
 0xe75   :  { %v3332_v63 = vpop.f32.mrf.mxu2 }
 0xe76   :  { %v3373_v0 = vpop.f32.mrf.mxu3 }
 0xe77   :  { %v6490_v17 = vadd.f32 %v3373_v0, %v3332_v63 }
 0xe7b   :  { %4530 = vmatmul.msk.f32.gmra.mxu0 %vm1055_vm3, %v3511_v45 }
 0xe7d   :  { %v3335_v10 = vpop.f32.mrf.mxu2 }
 0xe7e   :  { %v3376_v56 = vpop.f32.mrf.mxu3 }
 0xe7f   :  { %v6493_v59 = vadd.f32 %v3376_v56, %v3335_v10 }
 0xe83   :  { %4531 = vmatmul.msk.f32.gmra.mxu0 %vm1055_vm3, %v3512_v5  ;;  %v3606_v5 = vpop.trf.xlu1 }
 0xe85   :  { %v3338_v60 = vpop.f32.mrf.mxu2 }
 0xe86   :  { %v3379_v28 = vpop.f32.mrf.mxu3 }
 0xe87   :  { %v6496_v2 = vadd.f32 %v3379_v28, %v3338_v60 }
 0xe8b   :  { %4532 = vmatmul.msk.f32.gmra.mxu0 %vm1055_vm3, %v3513_v6  ;;  %v3607_v28 = vpop.trf.xlu1 }
 0xe8d   :  { %v3341_v21 = vpop.f32.mrf.mxu2 }
 0xe8e   :  { %v3382_v25 = vpop.f32.mrf.mxu3 }
 0xe8f   :  { %v6499_v63 = vadd.f32 %v3382_v25, %v3341_v21 }
 0xe93   :  { %v3608_v25 = vpop.trf.xlu1 }
 0xe95   :  { %v3344_v0 = vpop.f32.mrf.mxu2 }
 0xe96   :  { %v3385_v45 = vpop.f32.mrf.mxu3 }
 0xe97   :  { %v6501_v31 = vadd.f32 %v3385_v45, %v3344_v0 }
 0xe9b   :  { %v3609_v21 = vpop.trf.xlu1 }
 0xe9d   :  { %v3347_v23 = vpop.f32.mrf.mxu2 }
 0xe9e   :  { %v3388_v10 = vpop.f32.mrf.mxu3 }
 0xe9f   :  { %v6503_v56 = vadd.f32 %v3388_v10, %v3347_v23 }
 0xea3   :  { %v3610_v23 = vpop.trf.xlu1 }
 0xea5   :  { %v3350_v61 = vpop.f32.mrf.mxu2 }
 0xea6   :  { %v3391_v14 = vpop.f32.mrf.mxu3 }
 0xea7   :  { %v6505_v60 = vadd.f32 %v3391_v14, %v3350_v61 }
 0xead   :  { %v3451_v43 = vpop.f32.mrf.mxu2 }
 0xeae   :  { %v3471_v6 = vpop.f32.mrf.mxu3 }
 0xeaf   :  { %v3472_v15 = vadd.f32 %v3471_v6, %v3451_v43  ;;  %v3289_v43 = vadd.f32 %v6454_v36, %v6452_v39  ;;  %v3292_v6 = vadd.f32 %v6460_v57, %v6458_v44 }
 0xeb1   :  { %4533 = vmatpush.msk.msra.mxu1 %vm506_vm2, %v3472_v15  ;;  %v3611_v15 = vpop.trf.xlu1  ;;  %v3474_v61 = vmul.f32 %v3289_v43, %v6203_v29 }
 0xeb2   :  { %4534 = vmatmul.msk.f32.vlgmr.msra.gmra.mxu1 %vm1055_vm3, %v3606_v5 }
 0xeba   :  { %4535 = vmatmul.msk.f32.gmra.mxu1 %vm1055_vm3, %v3607_v28 }
 0xec2   :  { %4536 = vmatmul.msk.f32.gmra.mxu1 %vm1055_vm3, %v3608_v25  ;;  %v3612_v25 = vpop.trf.xlu1 }
 0xeca   :  { %4537 = vmatmul.msk.f32.gmra.mxu1 %vm1055_vm3, %v3609_v21  ;;  %v3475_v21 = vmul.f32 %v3292_v6, %v6209_v53 }
 0xed0   :  { %v3566_v0 = vpop.f32.mrf.mxu0 }
 0xed1   :  { %v3567_v14 = vadd.f32 1e-06, %v3566_v0  ;;  %v3295_v0 = vadd.f32 %v6466_v22, %v6464_v24 }
 0xed2   :  { %4538 = vmatmul.msk.f32.gmra.mxu1 %vm1055_vm3, %v3610_v23 }
 0xed3   :  { %4789 = vrcp.f32 %v3567_v14  ;;  %v3476_v44 = vmul.f32 %v3295_v0, %v6215_v20  ;;  %v3613_v14 = vpop.trf.xlu1  ;;  %v3478_v20 = vmul.f32 %v6474_v62, %v6227_v11  ;;  %v7156_v11 = vld [vmem:[#allocation35_spill] sm:$0xff] }
 0xed4   :  { %v3480_v62 = vmul.f32 %v6478_v12, %v7156_v11 }
 0xed8   :  { %v3569_v45 = vpop.f32.mrf.mxu0 }
 0xed9   :  { %v4790_v10 = vpop.eup %4789  ;;  %v3570_v5 = vadd.f32 1e-06, %v3569_v45 }
 0xeda   :  { %v6516_v28 = vmul.f32 %v4790_v10, %v3474_v61  ;;  %4539 = vmatmul.msk.f32.gmra.mxu1 %vm1055_vm3, %v3611_v15  ;;  %v3477_v61 = vmul.f32 %v6470_v33, %v6221_v49  ;;  %v7155_v49 = vld [vmem:[#allocation34_spill] sm:$0xff] }
 0xedb   :  { %4791 = vrcp.f32 %v3570_v5  ;;  %v3479_v33 = vmul.f32 %v6476_v19, %v7155_v49  ;;  %v7157_v19 = vld [vmem:[#allocation36_spill] sm:$0xff] }
 0xedc   :  { %3722 = vxpose.xlu2.b32.start [1/8] (short) (narrow) %v6516_v28, 8  ;;  %v7159_v49 = vld [vmem:[#allocation44_spill] sm:$0xff] }
 0xee0   :  { %v3572_v39 = vpop.f32.mrf.mxu0 }
 0xee1   :  { %v4792_v36 = vpop.eup %4791  ;;  %v3573_v23 = vadd.f32 1e-06, %v3572_v39 }
 0xee2   :  { %v6523_v29 = vmul.f32 %v4792_v36, %v3475_v21  ;;  %4540 = vmatmul.msk.f32.gmra.mxu1 %vm1055_vm3, %v3612_v25 }
 0xee3   :  { %4793 = vrcp.f32 %v3573_v23 }
 0xee4   :  { %3723 = vxpose.xlu2.b32.cont [2/8] (short) (narrow) %v6523_v29, 8 }
 0xee8   :  { %v3575_v57 = vpop.f32.mrf.mxu0 }
 0xee9   :  { %v4794_v43 = vpop.eup %4793  ;;  %v3576_v15 = vadd.f32 1e-06, %v3575_v57 }
 0xeea   :  { %v6530_v53 = vmul.f32 %v4794_v43, %v3476_v44  ;;  %4541 = vmatmul.msk.f32.gmra.mxu1 %vm1055_vm3, %v3613_v14 }
 0xeeb   :  { %4795 = vrcp.f32 %v3576_v15  ;;  %v3481_v15 = vmul.f32 %v6480_v37, %v7157_v19 }
 0xeec   :  { %3724 = vxpose.xlu2.b32.cont [3/8] (short) (narrow) %v6530_v53, 8 }
 0xef0   :  { %v3578_v45 = vpop.f32.mrf.mxu0 }
 0xef1   :  { %v4796_v24 = vpop.eup %4795  ;;  %v3579_v22 = vadd.f32 1e-06, %v3578_v45 }
 0xef2   :  { %v6536_v10 = vmul.f32 %v4796_v24, %v3477_v61  ;;  %v7158_v24 = vld [vmem:[#allocation43_spill] sm:$0xff] }
 0xef3   :  { %4797 = vrcp.f32 %v3579_v22  ;;  %v3482_v22 = vmul.f32 %v6487_v1, %v7158_v24  ;;  %v7160_v1 = vld [vmem:[#allocation45_spill] sm:$0xff] }
 0xef4   :  { %3725 = vxpose.xlu2.b32.cont [4/8] (short) (narrow) %v6536_v10, 8 }
 0xef8   :  { %v3581_v5 = vpop.f32.mrf.mxu0 }
 0xef9   :  { %v4798_v6 = vpop.eup %4797  ;;  %v3582_v25 = vadd.f32 1e-06, %v3581_v5 }
 0xefa   :  { %v6541_v21 = vmul.f32 %v4798_v6, %v3478_v20 }
 0xefb   :  { %4799 = vrcp.f32 %v3582_v25 }
 0xefc   :  { %3726 = vxpose.xlu2.b32.cont [5/8] (short) (narrow) %v6541_v21, 8 }
 0xf00   :  { %v3584_v39 = vpop.f32.mrf.mxu0 }
 0xf01   :  { %v4800_v36 = vpop.eup %4799  ;;  %v3585_v23 = vadd.f32 1e-06, %v3584_v39 }
 0xf02   :  { %v6546_v0 = vmul.f32 %v4800_v36, %v3479_v33  ;;  %v3483_v33 = vmul.f32 %v6490_v17, %v7159_v49  ;;  %v7161_v17 = vld [vmem:[#allocation46_spill] sm:$0xff] }
 0xf03   :  { %4801 = vrcp.f32 %v3585_v23 }
 0xf04   :  { %3727 = vxpose.xlu2.b32.cont [6/8] (short) (narrow) %v6546_v0, 8 }
 0xf08   :  { %v3587_v44 = vpop.f32.mrf.mxu0 }
 0xf09   :  { %v4802_v57 = vpop.eup %4801  ;;  %v3588_v14 = vadd.f32 1e-06, %v3587_v44 }
 0xf0a   :  { %v6551_v43 = vmul.f32 %v4802_v57, %v3480_v62  ;;  %v3484_v62 = vmul.f32 %v6493_v59, %v7160_v1  ;;  %v7162_v59 = vld [vmem:[#allocation47_spill] sm:$0xff] }
 0xf0b   :  { %4803 = vrcp.f32 %v3588_v14 }
 0xf0c   :  { %3728 = vxpose.xlu2.b32.cont [7/8] (short) (narrow) %v6551_v43, 8 }
 0xf11   :  { %v4804_v61 = vpop.eup %4803 }
 0xf12   :  { %v6556_v45 = vmul.f32 %v4804_v61, %v3481_v15  ;;  %v3485_v15 = vmul.f32 %v6496_v2, %v7161_v17  ;;  %v7163_v2 = vld [vmem:[#allocation48_spill] sm:$0xff] }
 0xf14   :  { %3843 = vmatpush.msra.mxu2 %v6556_v45  ;;  %3729 = vxpose.xlu2.b32.end [8/8] (short) (narrow) %v6556_v45, 8 }
 0xf16   :  { %3844 = vmatpush.msra.mxu2 %v6551_v43 }
 0xf18   :  { %3845 = vmatpush.msra.mxu2 %v6546_v0 }
 0xf1a   :  { %3846 = vmatpush.msra.mxu2 %v6541_v21 }
 0xf1c   :  { %3847 = vmatpush.msra.mxu2 %v6536_v10 }
 0xf1e   :  { %3848 = vmatpush.msra.mxu2 %v6530_v53 }
 0xf20   :  { %3849 = vmatpush.msra.mxu2 %v6523_v29 }
 0xf22   :  { %3850 = vmatpush.msra.mxu2 %v6516_v28 }
 0xf2f   :  { %v3666_v12 = vpop.f32.mrf.mxu1 }
 0xf30   :  { %v3667_v37 = vadd.f32 1e-06, %v3666_v12 }
 0xf32   :  { %4805 = vrcp.f32 %v3667_v37 }
 0xf37   :  { %v3669_v20 = vpop.f32.mrf.mxu1 }
 0xf38   :  { %v4806_v5 = vpop.eup %4805  ;;  %v3670_v6 = vadd.f32 1e-06, %v3669_v20 }
 0xf39   :  { %v6569_v25 = vmul.f32 %v4806_v5, %v3482_v22  ;;  %v3486_v22 = vmul.f32 %v6499_v63, %v7162_v59  ;;  %v7164_v63 = vld [vmem:[#allocation49_spill] sm:$0xff] }
 0xf3a   :  { %4807 = vrcp.f32 %v3670_v6 }
 0xf3b   :  { %3777 = vxpose.xlu0.b32.start [1/8] (short) (narrow) %v6569_v25, 8 }
 0xf3f   :  { %v3672_v39 = vpop.f32.mrf.mxu1 }
 0xf40   :  { %v4808_v36 = vpop.eup %4807  ;;  %v3673_v23 = vadd.f32 1e-06, %v3672_v39 }
 0xf41   :  { %v6574_v11 = vmul.f32 %v4808_v36, %v3483_v33  ;;  %v3487_v33 = vmul.f32 %v6501_v31, %v7163_v2  ;;  %v7165_v31 = vld [vmem:[#allocation50_spill] sm:$0xff] }
 0xf42   :  { %4809 = vrcp.f32 %v3673_v23 }
 0xf43   :  { %3778 = vxpose.xlu0.b32.cont [2/8] (short) (narrow) %v6574_v11, 8 }
 0xf47   :  { %v3675_v44 = vpop.f32.mrf.mxu1 }
 0xf48   :  { %v4810_v57 = vpop.eup %4809  ;;  %v3676_v14 = vadd.f32 1e-06, %v3675_v44 }
 0xf49   :  { %v6579_v19 = vmul.f32 %v4810_v57, %v3484_v62  ;;  %v3488_v62 = vmul.f32 %v6503_v56, %v7164_v63  ;;  %v7166_v56 = vmov 1  }
 0xf4a   :  { %4811 = vrcp.f32 %v3676_v14 }
 0xf4b   :  { %3779 = vxpose.xlu0.b32.cont [3/8] (short) (narrow) %v6579_v19, 8 }
 0xf4f   :  { %v3678_v61 = vpop.f32.mrf.mxu1 }
 0xf50   :  { %v4812_v12 = vpop.eup %4811  ;;  %v3679_v37 = vadd.f32 1e-06, %v3678_v61 }
 0xf51   :  { %v6584_v24 = vmul.f32 %v4812_v12, %v3485_v15  ;;  %v3489_v15 = vmul.f32 %v6505_v60, %v7165_v31 }
 0xf52   :  { %4813 = vrcp.f32 %v3679_v37 }
 0xf53   :  { %3780 = vxpose.xlu0.b32.cont [4/8] (short) (narrow) %v6584_v24, 8 }
 0xf57   :  { %v3681_v20 = vpop.f32.mrf.mxu1 }
 0xf58   :  { %v4814_v5 = vpop.eup %4813  ;;  %v3682_v6 = vadd.f32 1e-06, %v3681_v20 }
 0xf59   :  { %v6589_v49 = vmul.f32 %v4814_v5, %v3486_v22 }
 0xf5a   :  { %4815 = vrcp.f32 %v3682_v6 }
 0xf5b   :  { %3781 = vxpose.xlu0.b32.cont [5/8] (short) (narrow) %v6589_v49, 8 }
 0xf5f   :  { %v3684_v39 = vpop.f32.mrf.mxu1 }
 0xf60   :  { %v4816_v36 = vpop.eup %4815  ;;  %v3685_v23 = vadd.f32 1e-06, %v3684_v39 }
 0xf61   :  { %v6594_v1 = vmul.f32 %v4816_v36, %v3487_v33 }
 0xf62   :  { %4817 = vrcp.f32 %v3685_v23 }
 0xf63   :  { %3782 = vxpose.xlu0.b32.cont [6/8] (short) (narrow) %v6594_v1, 8 }
 0xf67   :  { %v3687_v44 = vpop.f32.mrf.mxu1 }
 0xf68   :  { %v4818_v57 = vpop.eup %4817  ;;  %v3688_v14 = vadd.f32 1e-06, %v3687_v44 }
 0xf69   :  { %v6599_v17 = vmul.f32 %v4818_v57, %v3488_v62 }
 0xf6a   :  { %4819 = vrcp.f32 %v3688_v14 }
 0xf6b   :  { %3783 = vxpose.xlu0.b32.cont [7/8] (short) (narrow) %v6599_v17, 8 }
 0xf70   :  { %v4820_v61 = vpop.eup %4819 }
 0xf71   :  { %v6604_v12 = vmul.f32 %v4820_v61, %v3489_v15 }
 0xf73   :  { %3866 = vmatpush.msra.mxu3 %v6604_v12  ;;  %3784 = vxpose.xlu0.b32.end [8/8] (short) (narrow) %v6604_v12, 8 }
 0xf75   :  { %v3738_v37 = vpop.trf.xlu2  ;;  %3867 = vmatpush.msra.mxu3 %v6599_v17 }
 0xf76   :  { %4542 = vmatmul.msk.f32.vlgmr.msrb.gmra.mxu2 %vm387_vm1, %v3738_v37  ;;  %4637 = vset.pattern.permute.xlu2 %v7166_v56 }
 0xf77   :  { %3886 = vmatpush.msrb.mxu2 %v6995_v8  ;;  %3868 = vmatpush.msra.mxu3 %v6594_v1  ;;  %v7174_v8 = vmov 0  }
 0xf79   :  { %3887 = vmatpush.msrb.mxu2 %v6991_v3  ;;  %3869 = vmatpush.msra.mxu3 %v6589_v49  ;;  %v7167_v3 = vmov 2  }
 0xf7b   :  { %3888 = vmatpush.msrb.mxu2 %v5144_v54  ;;  %3870 = vmatpush.msra.mxu3 %v6584_v24 }
 0xf7d   :  { %3889 = vmatpush.msrb.mxu2 %v5136_v50  ;;  %3871 = vmatpush.msra.mxu3 %v6579_v19  ;;  %v7171_v50 = vld [vmem:[#allocation15_spill] sm:$0xff] }
 0xf7f   :  { %3890 = vmatpush.msrb.mxu2 %v5128_v46  ;;  %3872 = vmatpush.msra.mxu3 %v6574_v11  ;;  %v7169_v46 = vld [vmem:[#allocation20_spill] sm:$0xff] }
 0xf81   :  { %3891 = vmatpush.msrb.mxu2 %v5120_v42  ;;  %3873 = vmatpush.msra.mxu3 %v6569_v25 }
 0xf83   :  { %3892 = vmatpush.msrb.mxu2 %v5112_v38 }
 0xf85   :  { %3893 = vmatpush.msrb.mxu2 %v5104_v34  ;;  %v7168_v34 = vld [vmem:[#allocation10_spill] sm:$0xff] }
 0xfda   :  { %4638 = vset.pattern.permute.xlu0 %v7167_v3 }
 0xfdf   :  { %v3793_v54 = vpop.trf.xlu0 }
 0xfe0   :  { %4543 = vmatmul.msk.f32.vlgmr.msrb.gmra.mxu3 %vm387_vm1, %v3793_v54 }
 0xfe1   :  { %3906 = vmatpush.msrb.mxu3 %v6996_v9 }
 0xfe3   :  { %3907 = vmatpush.msrb.mxu3 %v6992_v4  ;;  %v7173_v4 = vmov 3  }
 0xfe5   :  { %3908 = vmatpush.msrb.mxu3 %v5146_v55 }
 0xfe7   :  { %3909 = vmatpush.msrb.mxu3 %v5138_v51  ;;  %v7172_v51 = vld [vmem:[#allocation12_spill] sm:$0xff] }
 0xfe9   :  { %3910 = vmatpush.msrb.mxu3 %v5130_v47  ;;  %v7170_v47 = vld [vmem:[#allocation18_spill] sm:$0xff] }
 0xfeb   :  { %3911 = vmatpush.msrb.mxu3 %v7126_v58  ;;  %v7175_v58 = vld [vmem:[#allocation30_spill] sm:$0xff] }
 0xfec   :  { %v4004_v59 = vperm.slane %v7175_v58, 2  ;;  %v4024_v6 = vperm.slane %v7175_v58, 3 }
 0xfed   :  { %3912 = vmatpush.msrb.mxu3 %v7127_v26  ;;  %v3968_v26 = vperm.slane %v7175_v58, 0 }
 0xfef   :  { %3913 = vmatpush.msrb.mxu3 %v7168_v34 }
 0xff9   :  { %v3774_v38 = vpop.f32.mrf.mxu2 }
 0xffa   :  { %4544 = vmatmul.msk.f32.vlgmr.msra.gmra.mxu2 %vm387_vm1, %v3774_v38 }
 0xffb   :  { %3926 = vmatpush.msra.mxu2 %v7129_v18  ;;  %v7176_v18 = vld [vmem:[#allocation51_spill] sm:$0xff] }
 0xffc   :  { %v4005_v22 = vperm.slane %v7176_v18, 2  ;;  %v4025_v2 = vperm.slane %v7176_v18, 3 }
 0xffd   :  { %3927 = vmatpush.msra.mxu2 %v7130_v48  ;;  %v3969_v48 = vperm.slane %v7176_v18, 0 }
 0xfff   :  { %3928 = vmatpush.msra.mxu2 %v7131_v7 }
0x1001   :  { %3929 = vmatpush.msra.mxu2 %v7132_v32 }
0x1002   :  { %4546 = vmatmul.msk.f32.vlgmr.msrb.gmra.mxu2 %vm387_vm1, %v3738_v37 }
0x1003   :  { %3930 = vmatpush.msra.mxu2 %v7133_v13  ;;  %v3984_v13 = vperm.slane %v7175_v58, 1 }
0x1005   :  { %3931 = vmatpush.msra.mxu2 %v7134_v52  ;;  %v3985_v52 = vperm.slane %v7176_v18, 1 }
0x1007   :  { %3932 = vmatpush.msra.mxu2 %v7135_v41 }
0x1009   :  { %3933 = vmatpush.msra.mxu2 %v7136_v35 }
0x100a   :  { %4548 = vmatmul.msk.f32.vlgmr.msra.gmra.mxu2 %vm387_vm1, %v3793_v54 }
0x1063   :  { %v3829_v42 = vpop.f32.mrf.mxu3 }
0x1064   :  { %4545 = vmatmul.msk.f32.vlgmr.msra.gmra.mxu3 %vm387_vm1, %v3829_v42 }
0x1065   :  { %3946 = vmatpush.msra.mxu3 %v7137_v30 }
0x1067   :  { %3947 = vmatpush.msra.mxu3 %v7138_v27 }
0x1069   :  { %3948 = vmatpush.msra.mxu3 %v7139_v16 }
0x106b   :  { %3949 = vmatpush.msra.mxu3 %v7140_v40 }
0x106c   :  { %4547 = vmatmul.msk.f32.vlgmr.msrb.gmra.mxu3 %vm387_vm1, %v3738_v37 }
0x106d   :  { %3950 = vmatpush.msra.mxu3 %v7169_v46 }
0x106f   :  { %3951 = vmatpush.msra.mxu3 %v7170_v47 }
0x1071   :  { %3952 = vmatpush.msra.mxu3 %v7171_v50 }
0x1073   :  { %3953 = vmatpush.msra.mxu3 %v7172_v51 }
0x1074   :  { %4549 = vmatmul.msk.f32.vlgmr.msra.gmra.mxu3 %vm387_vm1, %v3793_v54 }
0x107d   :  { %v3852_v55 = vpop.f32.mrf.mxu2 }
0x107e   :  { %3977 = vperm.xlu2 %4637, %v3852_v55   ;;  %3960 = vperm.xlu1 %4636, %v3852_v55  }
0x107f   :  { %3997 = vperm.xlu0 %4638, %v3852_v55  }
0x1085   :  { %v3895_v31 = vpop.f32.mrf.mxu2 }
0x1086   :  { %4639 = vset.pattern.permute.xlu1 %v7173_v4  ;;  %4642 = vset.pattern.permute.xlu2 %v7167_v3  ;;  %v4036_v61 = vmul.f32 %v3895_v31, %v7175_v58 }
0x1087   :  { %4017 = vperm.xlu1 %4639, %v3852_v55   ;;  %4644 = vset.pattern.permute.xlu0 %v7173_v4 }
0x108f   :  { %4640 = vset.pattern.permute.xlu1 %v7174_v8 }
0x10d8   :  { %v3978_v32 = vpop.permute.xlu2 %3977 }
0x10d9   :  { %v3988_v30 = vmul.f32 %v3984_v13, %v3978_v32  ;;  %v3989_v27 = vmul.f32 %v3985_v52, %v3978_v32 }
0x10e7   :  { %v3875_v9 = vpop.f32.mrf.mxu3 }
0x10e8   :  { %4001 = vperm.xlu2 %4642, %v3875_v9   ;;  %3965 = vperm.xlu1 %4640, %v3875_v9  }
0x10ef   :  { %v3915_v15 = vpop.f32.mrf.mxu3 }
0x10f0   :  { %v3961_v7 = vpop.permute.xlu1 %3960  ;;  %4641 = vset.pattern.permute.xlu1 %v7166_v56  ;;  %v4037_v56 = vmul.f32 %v3915_v15, %v7176_v18 }
0x10f1   :  { %v3972_v41 = vmul.f32 %v3968_v26, %v3961_v7  ;;  %v3973_v35 = vmul.f32 %v3969_v48, %v3961_v7  ;;  %3981 = vperm.xlu1 %4641, %v3875_v9   ;;  %v3998_v16 = vpop.permute.xlu0 %3997 }
0x10f2   :  { %v4008_v20 = vmul.f32 %v4004_v59, %v3998_v16  ;;  %v4009_v5 = vmul.f32 %v4005_v22, %v3998_v16 }
0x10f3   :  { %v3992_v40 = vadd.f32 %v3988_v30, %v3972_v41  ;;  %v3993_v60 = vadd.f32 %v3989_v27, %v3973_v35 }
0x10f5   :  { %v4012_v39 = vadd.f32 %v4008_v20, %v3992_v40  ;;  %v4013_v36 = vadd.f32 %v4009_v5, %v3993_v60 }
0x10f9   :  { %v4018_v33 = vpop.permute.xlu1 %4017  ;;  %4643 = vset.pattern.permute.xlu1 %v7173_v4  ;;  %v7177_v4 = vld [vmem:[#allocation25_spill] sm:$0xff] }
0x10fa   :  { %v4028_v23 = vmul.f32 %v4024_v6, %v4018_v33  ;;  %v4029_v63 = vmul.f32 %v4025_v2, %v4018_v33  ;;  %4021 = vperm.xlu1 %4643, %v3875_v9   ;;  %v3986_v8 = vperm.slane %v7177_v4, 1  ;;  %v7178_v9 = vld [vmem:[#allocation26_spill] sm:$0xff]  ;;  %v3970_v58 = vperm.slane %v7177_v4, 0 }
0x10fb   :  { %v3971_v18 = vperm.slane %v7178_v9, 0  ;;  %v4006_v41 = vperm.slane %v7177_v4, 2  ;;  %v4026_v30 = vperm.slane %v7177_v4, 3  ;;  %v4007_v16 = vperm.slane %v7178_v9, 2 }
0x10fc   :  { %v4032_v62 = vadd.f32 %v4028_v23, %v4012_v39  ;;  %v4033_v44 = vadd.f32 %v4029_v63, %v4013_v36  ;;  %v4027_v60 = vperm.slane %v7178_v9, 3 }
0x10fe   :  { %v4040_v57 = vadd.f32 1e-06, %v4032_v62  ;;  %v4041_v14 = vadd.f32 1e-06, %v4033_v44 }
0x1100   :  { %4821 = vrcp.f32 %v4040_v57  ;;  %v3935_v57 = vpop.f32.mrf.mxu2 }
0x1101   :  { %4823 = vrcp.f32 %v4041_v14  ;;  %v3955_v14 = vpop.f32.mrf.mxu3 }
0x1106   :  { %v4822_v37 = vpop.eup %4821 }
0x1107   :  { %v4824_v3 = vpop.eup %4823  ;;  %v4048_v54 = vmul.f32 %v4822_v37, %v4036_v61  ;;  %v4038_v61 = vmul.f32 %v3935_v57, %v7177_v4  ;;  %v4039_v37 = vmul.f32 %v3955_v14, %v7178_v9 }
0x1108   :  { %v4049_v34 = vmul.f32 %v4824_v3, %v4037_v56 }
0x1109   :  { %4550 = vmatpush.msk.msrb.mxu0 %vm506_vm2, %v4048_v54  ;;  %v6723_v54 = vld [vmem:[#allocation3] sm:$0xff] }
0x110a   :  { %4559 = vmatpush.msk.msrb.mxu1 %vm506_vm2, %v4049_v34  ;;  %4551 = vmatmul.msk.f32.vlgmr.msrb.gmra.mxu0 %vm1055_vm3, %v6516_v28  ;;  %v4861_v34 = vld [vmem:[#allocation3 + $0x8] sm:$0xff] }
0x110b   :  { %4560 = vmatmul.msk.f32.vlgmr.msrb.gmra.mxu1 %vm1055_vm3, %v6516_v28 }
0x1112   :  { %4552 = vmatmul.msk.f32.gmra.mxu0 %vm1055_vm3, %v6523_v29 }
0x1113   :  { %4561 = vmatmul.msk.f32.gmra.mxu1 %vm1055_vm3, %v6523_v29 }
0x111a   :  { %4553 = vmatmul.msk.f32.gmra.mxu0 %vm1055_vm3, %v6530_v53 }
0x111b   :  { %4562 = vmatmul.msk.f32.gmra.mxu1 %vm1055_vm3, %v6530_v53 }
0x1122   :  { %4554 = vmatmul.msk.f32.gmra.mxu0 %vm1055_vm3, %v6536_v10 }
0x1123   :  { %4563 = vmatmul.msk.f32.gmra.mxu1 %vm1055_vm3, %v6536_v10 }
0x112a   :  { %4555 = vmatmul.msk.f32.gmra.mxu0 %vm1055_vm3, %v6541_v21 }
0x112b   :  { %4564 = vmatmul.msk.f32.gmra.mxu1 %vm1055_vm3, %v6541_v21 }
0x1132   :  { %4556 = vmatmul.msk.f32.gmra.mxu0 %vm1055_vm3, %v6546_v0 }
0x1133   :  { %4565 = vmatmul.msk.f32.gmra.mxu1 %vm1055_vm3, %v6546_v0 }
0x113a   :  { %4557 = vmatmul.msk.f32.gmra.mxu0 %vm1055_vm3, %v6551_v43 }
0x113b   :  { %4566 = vmatmul.msk.f32.gmra.mxu1 %vm1055_vm3, %v6551_v43 }
0x1142   :  { %4558 = vmatmul.msk.f32.gmra.mxu0 %vm1055_vm3, %v6556_v45  ;;  %v4002_v32 = vpop.permute.xlu2 %4001 }
0x1143   :  { %4567 = vmatmul.msk.f32.gmra.mxu1 %vm1055_vm3, %v6556_v45  ;;  %v3987_v45 = vperm.slane %v7178_v9, 1  ;;  %v4010_v22 = vmul.f32 %v4006_v41, %v4002_v32  ;;  %v4011_v5 = vmul.f32 %v4007_v16, %v4002_v32 }
0x115a   :  { %v3966_v46 = vpop.permute.xlu1 %3965 }
0x115b   :  { %v3974_v7 = vmul.f32 %v3970_v58, %v3966_v46  ;;  %v3975_v13 = vmul.f32 %v3971_v18, %v3966_v46 }
0x1163   :  { %v3982_v43 = vpop.permute.xlu1 %3981 }
0x1164   :  { %v3990_v26 = vmul.f32 %v3986_v8, %v3982_v43  ;;  %v3991_v48 = vmul.f32 %v3987_v45, %v3982_v43 }
0x1166   :  { %v3994_v35 = vadd.f32 %v3990_v26, %v3974_v7  ;;  %v3995_v40 = vadd.f32 %v3991_v48, %v3975_v13 }
0x1168   :  { %v4014_v2 = vadd.f32 %v4010_v22, %v3994_v35  ;;  %v4015_v33 = vadd.f32 %v4011_v5, %v3995_v40 }
0x116c   :  { %v4022_v52 = vpop.permute.xlu1 %4021 }
0x116d   :  { %v4030_v20 = vmul.f32 %v4026_v30, %v4022_v52  ;;  %v4031_v6 = vmul.f32 %v4027_v60, %v4022_v52 }
0x116f   :  { %v4034_v39 = vadd.f32 %v4030_v20, %v4014_v2  ;;  %v4035_v36 = vadd.f32 %v4031_v6, %v4015_v33 }
0x1171   :  { %v4042_v62 = vadd.f32 1e-06, %v4034_v39  ;;  %v4043_v44 = vadd.f32 1e-06, %v4035_v36 }
0x1173   :  { %4825 = vrcp.f32 %v4042_v62 }
0x1174   :  { %4827 = vrcp.f32 %v4043_v44 }
0x1179   :  { %v4826_v31 = vpop.eup %4825 }
0x117a   :  { %v4828_v15 = vpop.eup %4827  ;;  %v4050_v56 = vmul.f32 %v4826_v31, %v4038_v61 }
0x117b   :  { %v4051_v3 = vmul.f32 %v4828_v15, %v4039_v37 }
0x1187   :  { %v6707_v28 = vpop.f32.mrf.mxu0 }
0x1188   :  { %v6709_v29 = vpop.f32.mrf.mxu1 }
0x118f   :  { %v4102_v53 = vpop.f32.mrf.mxu0 }
0x1190   :  { %v4143_v10 = vpop.f32.mrf.mxu1 }
0x1197   :  { %v4105_v21 = vpop.f32.mrf.mxu0 }
0x1198   :  { %v4146_v0 = vpop.f32.mrf.mxu1 }
0x119f   :  { %v4108_v38 = vpop.f32.mrf.mxu0 }
0x11a0   :  { %v4149_v42 = vpop.f32.mrf.mxu1 }
0x11a7   :  { %v4111_v47 = vpop.f32.mrf.mxu0 }
0x11a8   :  { %v4152_v50 = vpop.f32.mrf.mxu1 }
0x11af   :  { %v4114_v51 = vpop.f32.mrf.mxu0 }
0x11b0   :  { %v4155_v55 = vpop.f32.mrf.mxu1 }
0x11b7   :  { %v4117_v27 = vpop.f32.mrf.mxu0 }
0x11b8   :  { %v4158_v59 = vpop.f32.mrf.mxu1 }
0x11bf   :  { %v4120_v23 = vpop.f32.mrf.mxu0 }
0x11c0   :  { %v4161_v63 = vpop.f32.mrf.mxu1  ;;  %4178 = vmatpush.msrb.mxu2 %v4120_v23 }
0x11c1   :  { %4201 = vmatpush.msrb.mxu3 %v4161_v63 }
0x11c2   :  { %4179 = vmatpush.msrb.mxu2 %v4117_v27 }
0x11c3   :  { %4202 = vmatpush.msrb.mxu3 %v4158_v59 }
0x11c4   :  { %4180 = vmatpush.msrb.mxu2 %v4114_v51 }
0x11c5   :  { %4203 = vmatpush.msrb.mxu3 %v4155_v55 }
0x11c6   :  { %4181 = vmatpush.msrb.mxu2 %v4111_v47 }
0x11c7   :  { %4204 = vmatpush.msrb.mxu3 %v4152_v50 }
0x11c8   :  { %4182 = vmatpush.msrb.mxu2 %v4108_v38 }
0x11c9   :  { %4205 = vmatpush.msrb.mxu3 %v4149_v42 }
0x11ca   :  { %4183 = vmatpush.msrb.mxu2 %v4105_v21 }
0x11cb   :  { %4206 = vmatpush.msrb.mxu3 %v4146_v0 }
0x11cc   :  { %4184 = vmatpush.msrb.mxu2 %v4102_v53 }
0x11cd   :  { %4207 = vmatpush.msrb.mxu3 %v4143_v10 }
0x11ce   :  { %4185 = vmatpush.msrb.mxu2 %v6707_v28 }
0x11cf   :  { %4208 = vmatpush.msrb.mxu3 %v6709_v29  ;;  %4568 = vmatmul.msk.f32.vlgmr.msrb.gmra.mxu2 %vm387_vm1, %v6723_v54 }
0x11d0   :  { %4570 = vmatmul.msk.f32.vlgmr.msrb.gmra.mxu3 %vm387_vm1, %v6723_v54  ;;  %4572 = vmatpush.msk.msra.mxu2 %vm506_vm2, %v4050_v56 }
0x11d1   :  { %4581 = vmatpush.msk.msra.mxu3 %vm506_vm2, %v4051_v3 }
0x11d7   :  { %4569 = vmatmul.msk.f32.gmra.mxu2 %vm387_vm1, %v4861_v34 }
0x11d8   :  { %4571 = vmatmul.msk.f32.gmra.mxu3 %vm387_vm1, %v4861_v34 }
0x11df   :  { %4573 = vmatmul.msk.f32.vlgmr.msra.gmra.mxu2 %vm1055_vm3, %v6569_v25 }
0x11e0   :  { %4582 = vmatmul.msk.f32.vlgmr.msra.gmra.mxu3 %vm1055_vm3, %v6569_v25 }
0x11e7   :  { %4574 = vmatmul.msk.f32.gmra.mxu2 %vm1055_vm3, %v6574_v11 }
0x11e8   :  { %4583 = vmatmul.msk.f32.gmra.mxu3 %vm1055_vm3, %v6574_v11 }
0x11ef   :  { %4575 = vmatmul.msk.f32.gmra.mxu2 %vm1055_vm3, %v6579_v19 }
0x11f0   :  { %4584 = vmatmul.msk.f32.gmra.mxu3 %vm1055_vm3, %v6579_v19 }
0x11f7   :  { %4576 = vmatmul.msk.f32.gmra.mxu2 %vm1055_vm3, %v6584_v24 }
0x11f8   :  { %4585 = vmatmul.msk.f32.gmra.mxu3 %vm1055_vm3, %v6584_v24 }
0x11ff   :  { %4577 = vmatmul.msk.f32.gmra.mxu2 %vm1055_vm3, %v6589_v49 }
0x1200   :  { %4586 = vmatmul.msk.f32.gmra.mxu3 %vm1055_vm3, %v6589_v49 }
0x1207   :  { %4578 = vmatmul.msk.f32.gmra.mxu2 %vm1055_vm3, %v6594_v1 }
0x1208   :  { %4587 = vmatmul.msk.f32.gmra.mxu3 %vm1055_vm3, %v6594_v1 }
0x120f   :  { %4579 = vmatmul.msk.f32.gmra.mxu2 %vm1055_vm3, %v6599_v17 }
0x1210   :  { %4588 = vmatmul.msk.f32.gmra.mxu3 %vm1055_vm3, %v6599_v17 }
0x1217   :  { %4580 = vmatmul.msk.f32.gmra.mxu2 %vm1055_vm3, %v6604_v12 }
0x1218   :  { %4589 = vmatmul.msk.f32.gmra.mxu3 %vm1055_vm3, %v6604_v12 }
0x1252   :  { %v4187_v25 = vpop.f32.mrf.mxu2 }
0x1253   :  { %4216 = vst [vmem:[#allocation6] sm:$0xff] %v4187_v25  ;;  %v4210_v11 = vpop.f32.mrf.mxu3 }
0x1254   :  { %4217 = vst [vmem:[#allocation6 + $0x8] sm:$0xff] %v4210_v11 }
0x125a   :  { %v4190_v19 = vpop.f32.mrf.mxu2 }
0x125b   :  { %4218 = vst [vmem:[#allocation6 + $0x10] sm:$0xff] %v4190_v19  ;;  %v4213_v24 = vpop.f32.mrf.mxu3 }
0x125c   :  { %4219 = vst [vmem:[#allocation6 + $0x18] sm:$0xff] %v4213_v24 }
0x1262   :  { %v4267_v49 = vpop.f32.mrf.mxu2 }
0x1263   :  { %v4308_v1 = vpop.f32.mrf.mxu3 }
0x126a   :  { %v4270_v28 = vpop.f32.mrf.mxu2 }
0x126b   :  { %v4311_v29 = vpop.f32.mrf.mxu3 }
0x1272   :  { %v4273_v53 = vpop.f32.mrf.mxu2 }
0x1273   :  { %v4314_v17 = vpop.f32.mrf.mxu3 }
0x127a   :  { %v4276_v10 = vpop.f32.mrf.mxu2 }
0x127b   :  { %v4317_v21 = vpop.f32.mrf.mxu3 }
0x1282   :  { %v4279_v0 = vpop.f32.mrf.mxu2 }
0x1283   :  { %v4320_v38 = vpop.f32.mrf.mxu3 }
0x128a   :  { %v4282_v42 = vpop.f32.mrf.mxu2 }
0x128b   :  { %v4323_v12 = vpop.f32.mrf.mxu3 }
0x1292   :  { %v4285_v46 = vpop.f32.mrf.mxu2 }
0x1293   :  { %v4326_v47 = vpop.f32.mrf.mxu3 }
0x129a   :  { %v4288_v50 = vpop.f32.mrf.mxu2 }
0x129b   :  { %v4329_v43 = vpop.f32.mrf.mxu3  ;;  %4340 = vmatpush.msra.mxu0 %v4288_v50 }
0x129c   :  { %4363 = vmatpush.msra.mxu1 %v4329_v43 }
0x129d   :  { %4341 = vmatpush.msra.mxu0 %v4285_v46 }
0x129e   :  { %4364 = vmatpush.msra.mxu1 %v4326_v47 }
0x129f   :  { %4342 = vmatpush.msra.mxu0 %v4282_v42 }
0x12a0   :  { %4365 = vmatpush.msra.mxu1 %v4323_v12 }
0x12a1   :  { %4343 = vmatpush.msra.mxu0 %v4279_v0 }
0x12a2   :  { %4366 = vmatpush.msra.mxu1 %v4320_v38 }
0x12a3   :  { %4344 = vmatpush.msra.mxu0 %v4276_v10 }
0x12a4   :  { %4367 = vmatpush.msra.mxu1 %v4317_v21 }
0x12a5   :  { %4345 = vmatpush.msra.mxu0 %v4273_v53 }
0x12a6   :  { %4368 = vmatpush.msra.mxu1 %v4314_v17 }
0x12a7   :  { %4346 = vmatpush.msra.mxu0 %v4270_v28 }
0x12a8   :  { %4369 = vmatpush.msra.mxu1 %v4311_v29 }
0x12a9   :  { %4347 = vmatpush.msra.mxu0 %v4267_v49 }
0x12aa   :  { %4370 = vmatpush.msra.mxu1 %v4308_v1  ;;  %4590 = vmatmul.msk.f32.vlgmr.msra.gmra.mxu0 %vm387_vm1, %v6723_v54 }
0x12ab   :  { %4592 = vmatmul.msk.f32.vlgmr.msra.gmra.mxu1 %vm387_vm1, %v6723_v54 }
0x12b2   :  { %4591 = vmatmul.msk.f32.gmra.mxu0 %vm387_vm1, %v4861_v34 }
0x12b3   :  { %4593 = vmatmul.msk.f32.gmra.mxu1 %vm387_vm1, %v4861_v34 }
0x1327   :  { %v4349_v51 = vpop.f32.mrf.mxu0 }
0x1328   :  { %4379 = vst [vmem:[#allocation6 + $0x20] sm:$0xff] %v4349_v51  ;;  %v4372_v55 = vpop.f32.mrf.mxu1 }
0x1329   :  { %4380 = vst [vmem:[#allocation6 + $0x28] sm:$0xff] %v4372_v55 }
0x132f   :  { %v4352_v4 = vpop.f32.mrf.mxu0 }
0x1330   :  { %4381 = vst [vmem:[#allocation6 + $0x30] sm:$0xff] %v4352_v4  ;;  %v4375_v8 = vpop.f32.mrf.mxu1 }
0x1331   :  { %4382 = vst [vmem:[#allocation6 + $0x38] sm:$0xff] %v4375_v8 }
0x1332   :  { %4395 = dma.vmem_to_hbm [thread:$0]  %s4388_s7, 1024, %s4390_s10, [#allocation5], %s4922_s11, %s4922_s11, %s4923_s12  }
0x1333   :  { %4912 = dma.done.wait [#allocation5], 1024  }
0x1334   :  { %4913 = vsyncadd [#allocation5], 4294966272 }
0x1335   :  { %4400 = vsyncpa [#allocation4], 1 }
0x1336   :  { %4401 = vsyncpa [#allocation5], 1 }

</bundles_post_ra>
